<compile_context>
chip_gen: v7x
topology: tpu7x:2x2x1
jax: 0.10.0
libtpu: 0.0.40
codegen_flags: <defaults>
</compile_context>

<pallas_src>
import jax
import jax.numpy as jnp
from jax.experimental import pallas as pl
from jax.experimental.pallas import tpu as pltpu


# --------------------------- fused forward kernel -----------------------------
def make_fused_kernel(seq, H, unroll):
    """Fused 2-layer-LSTM (skewed) + FC + sigmoid kernel.

    Ref layout (inputs, outputs, scratch), per batch block of size Bt:
      x_ref        (seq, Bt, E)   bf16   time-major embeddings
      w_ih0_ref    (E, 4H)  bf16 ; w_hh0_ref (H, 4H) bf16 ; b0_ref (1, 4H) f32
      w1cat_ref    (2H, 4H) bf16   rows [W_hh_1 ; W_ih_1] ; b1_ref (1, 4H) f32
      h0_ref/c0_ref (2, Bt, H) f32 initial hidden/cell
      fcw_ref      (1, H) f32 ; fcb_ref (1, 1) f32
      sig_ref      (Bt, 1) f32 ; hN_ref/cN_ref (2, Bt, H) f32
      gx_sc        (seq, Bt, 4H) f32   hoisted layer-0 input-projection gates
    """

    def kernel(x_ref, w_ih0_ref, w_hh0_ref, b0_ref, w1cat_ref, b1_ref,
               h0_ref, c0_ref, fcw_ref, fcb_ref,
               sig_ref, hN_ref, cN_ref, gx_sc):
        Bt = x_ref.shape[1]
        E = x_ref.shape[2]

        # ---- hoisted layer-0 input projection: one fat MXU matmul, off the chain ----
        x2d = x_ref[...].reshape(seq * Bt, E)                     # bf16
        gx0 = jnp.dot(x2d, w_ih0_ref[...],
                      preferred_element_type=jnp.float32) + b0_ref[...]
        gx_sc[...] = gx0.reshape(seq, Bt, 4 * H)

        # hoisted layer-1 bias broadcast (avoid per-step broadcast_in_dim in the loop)
        b1b = jnp.broadcast_to(b1_ref[...], (Bt, 4 * H))

        def cell(pre, c_prev):
            # NOTE: gate slices assume H % 128 == 0 for lane alignment.
            i_g = jax.nn.sigmoid(pre[:, 0 * H:1 * H])
            f_g = jax.nn.sigmoid(pre[:, 1 * H:2 * H])
            g_g = jnp.tanh(pre[:, 2 * H:3 * H])
            o_g = jax.nn.sigmoid(pre[:, 3 * H:4 * H])
            c_new = f_g * c_prev + i_g * g_g                      # f32 cell state
            h_new = o_g * jnp.tanh(c_new)
            return h_new, c_new

        def layer0_step(t, h_prev, c_prev):
            # TODO(synk): hold W_hh_0 resident in the MXU weight staging registers
            # (pltpu.matmul_push_rhs once per layer + matmul_acc_lhs per step) to drop
            # the per-step weight push from the serial chain.
            pre = gx_sc[t] + jnp.dot(h_prev.astype(jnp.bfloat16), w_hh0_ref[...],
                                     preferred_element_type=jnp.float32)
            return cell(pre, c_prev)

        def layer1_step(h_feed, h_prev, c_prev):
            # Fused recurrent + input projection: (Bt, 2H) @ (2H, 4H); K=256 fills the
            # v6e/v7x MXU depth in a single push.
            lhs = jnp.concatenate([h_prev.astype(jnp.bfloat16),
                                   h_feed.astype(jnp.bfloat16)], axis=-1)
            pre = jnp.dot(lhs, w1cat_ref[...],
                          preferred_element_type=jnp.float32) + b1b
            return cell(pre, c_prev)

        # ---- skewed (software-pipelined) recurrence ----
        h0 = h0_ref[0]
        c0 = c0_ref[0]
        h1 = h0_ref[1]
        c1 = c0_ref[1]

        h0, c0 = layer0_step(0, h0, c0)                           # prologue: L0 step 0

        def step(t, carry):
            h0, c0, h1, c1 = carry
            # layer-1 step t-1 (consumes old h0) and layer-0 step t are independent,
            # so their MXU->EUP->VPU chains overlap within the iteration.
            h1n, c1n = layer1_step(h0, h1, c1)
            h0n, c0n = layer0_step(t, h0, c0)
            return (h0n, c0n, h1n, c1n)

        h0, c0, h1, c1 = jax.lax.fori_loop(1, seq, step, (h0, c0, h1, c1),
                                           unroll=unroll)

        h1, c1 = layer1_step(h0, h1, c1)                          # epilogue: L1 step seq-1

        hN_ref[0] = h0
        cN_ref[0] = c0
        hN_ref[1] = h1
        cN_ref[1] = c1

        # ---- FC + sigmoid on the LAST hidden state of layer 1 only (== out[:, -1]) ----
        # VPU multiply + lane reduction instead of a 1-column MXU matmul.
        logits = jnp.sum(h1 * fcw_ref[...], axis=-1, keepdims=True) + fcb_ref[...]
        sig_ref[...] = jax.nn.sigmoid(logits)

    return kernel


# ------------------------------ full forward ----------------------------------
def sentiment_rnn_forward(params, tokens, hidden, *, batch_block=None):
    """tokens: (B, seq) int32; hidden: (h, c) each (2, B, H).
    Returns (sigmoid_out (B,), (h_n, c_n))."""
    B, seq = tokens.shape
    h_in, c_in = hidden
    n_layers, _, H = h_in.shape
    assert n_layers == 2, "fused kernel is specialized for the module's 2-layer LSTM"
    assert H % 128 == 0, "gate slices require H % 128 == 0 (pad hidden dim)"
    E = params["embedding"].shape[-1]

    # Batch blocking: each block is an independent grid program ("parallel"), so on
    # v7x the batch splits across both TensorCores. Callers should raise effective
    # batch (~128 rows/block on v5e, ~256 on v6e/v7x) to fill MXU rows.
    if batch_block is None:
        batch_block = B if B <= 128 else 128
    assert B % batch_block == 0 and batch_block % 8 == 0
    nb = B // batch_block

    # Embedding gather directly into time-major layout; bf16 table -> bf16 MXU operand.
    x_tm = jnp.take(params["embedding"], tokens.T, axis=0)        # (seq, B, E) bf16

    unroll = True if seq <= 32 else 8                             # partial unroll at scale

    def full(shp):
        return pl.BlockSpec(shp, lambda b, _n=len(shp): (0,) * _n)

    def batched3(d0, d2):
        return pl.BlockSpec((d0, batch_block, d2), lambda b: (0, b, 0))

    out_shapes = (
        jax.ShapeDtypeStruct((B, 1), jnp.float32),                # sigmoid(last step)
        jax.ShapeDtypeStruct((n_layers, B, H), jnp.float32),      # h_n
        jax.ShapeDtypeStruct((n_layers, B, H), jnp.float32),      # c_n
    )
    in_specs = [
        batched3(seq, E),                                         # x (seq, B, E)
        full((E, 4 * H)),                                         # w_ih0
        full((H, 4 * H)),                                         # w_hh0
        full((1, 4 * H)),                                         # b0
        full((2 * H, 4 * H)),                                     # w1cat
        full((1, 4 * H)),                                         # b1
        batched3(n_layers, H),                                    # h_in
        batched3(n_layers, H),                                    # c_in
        full((1, H)),                                             # fc_w_row
        full((1, 1)),                                             # fc_b
    ]
    out_specs = (
        pl.BlockSpec((batch_block, 1), lambda b: (b, 0)),
        batched3(n_layers, H),
        batched3(n_layers, H),
    )

    # TODO(synk): at production shapes (e.g. seq=256, B=128, H=512) chunk the hoisted
    # input projection over seq (emit_pipeline / double-buffer) instead of the full
    # (seq, Bt, 4H) f32 gx scratch, and set vmem_limit_bytes with headroom on v7x (64 MiB).
    sig, h_n, c_n = pl.pallas_call(
        make_fused_kernel(seq, H, unroll),
        out_shape=out_shapes,
        grid=(nb,),
        in_specs=in_specs,
        out_specs=out_specs,
        scratch_shapes=[pltpu.VMEM((seq, batch_block, 4 * H), jnp.float32)],
        compiler_params=pltpu.CompilerParams(
            dimension_semantics=("parallel",)),
    )(x_tm, params["w_ih0"], params["w_hh0"], params["b0"],
      params["w1cat"], params["b1"], h_in, c_in,
      params["fc_w_row"], params["fc_b"])

    return sig[:, 0], (h_n, c_n)


# --------------------------- deterministic params -----------------------------
def init_params(key, vocab_size, embedding_dim, hidden_dim, n_layers, output_size):
    assert n_layers == 2
    keys = jax.random.split(key, 3 + 4 * n_layers)
    k = 1.0 / jnp.sqrt(hidden_dim)
    params = {}
    params["embedding"] = jax.random.normal(
        keys[0], (vocab_size, embedding_dim), jnp.float32).astype(jnp.bfloat16)

    raw = []
    for layer in range(n_layers):
        in_dim = embedding_dim if layer == 0 else hidden_dim
        kw = keys[3 + 4 * layer: 3 + 4 * (layer + 1)]
        w_ih = jax.random.uniform(kw[0], (4 * hidden_dim, in_dim), jnp.float32, -k, k)
        w_hh = jax.random.uniform(kw[1], (4 * hidden_dim, hidden_dim), jnp.float32, -k, k)
        b_ih = jax.random.uniform(kw[2], (4 * hidden_dim,), jnp.float32, -k, k)
        b_hh = jax.random.uniform(kw[3], (4 * hidden_dim,), jnp.float32, -k, k)
        raw.append((w_ih, w_hh, b_ih, b_hh))

    # layer 0: pre-transposed MXU operands, biases folded once
    w_ih0, w_hh0, b_ih0, b_hh0 = raw[0]
    params["w_ih0"] = w_ih0.T.astype(jnp.bfloat16)                # (E, 4H)
    params["w_hh0"] = w_hh0.T.astype(jnp.bfloat16)                # (H, 4H)
    params["b0"] = (b_ih0 + b_hh0)[None, :]                       # (1, 4H) f32

    # layer 1: fused [W_hh_1 ; W_ih_1] -> single (2H, 4H) RHS for the skewed step
    w_ih1, w_hh1, b_ih1, b_hh1 = raw[1]
    params["w1cat"] = jnp.concatenate([w_hh1.T, w_ih1.T], axis=0).astype(jnp.bfloat16)
    params["b1"] = (b_ih1 + b_hh1)[None, :]                       # (1, 4H) f32

    fc_w = jax.random.uniform(keys[1], (output_size, hidden_dim), jnp.float32, -k, k)
    fc_b = jax.random.uniform(keys[2], (output_size,), jnp.float32, -k, k)
    params["fc_w_row"] = fc_w                                     # (1, H) VPU FC row
    params["fc_b"] = fc_b[None, :]                                # (1, 1)
    return params


if __name__ == "__main__":
    # Small shapes consistent with the module (vocab, embed, hidden scaled down,
    # kept multiples of TPU tile dims: H % 128 == 0, B % 8 == 0).
    vocab_size = 50
    embedding_dim = 128
    hidden_dim = 128
    n_layers = 2
    output_size = 1
    batch = 8
    seq = 10

    key = jax.random.PRNGKey(0)
    pkey, tkey = jax.random.split(key)
    params = init_params(pkey, vocab_size, embedding_dim, hidden_dim,
                         n_layers, output_size)

    tokens = jax.random.randint(tkey, (batch, seq), 0, vocab_size, jnp.int32)
    hidden = (jnp.zeros((n_layers, batch, hidden_dim), jnp.float32),
              jnp.zeros((n_layers, batch, hidden_dim), jnp.float32))

    fwd = jax.jit(sentiment_rnn_forward)
    sig_out, (h_n, c_n) = fwd(params, tokens, hidden)
    jax.block_until_ready((sig_out, h_n, c_n))

    assert sig_out.shape == (batch,)
    assert h_n.shape == (n_layers, batch, hidden_dim)
    assert c_n.shape == (n_layers, batch, hidden_dim)
    assert bool(jnp.all(jnp.isfinite(sig_out)))
    print("KERNEL_OK")
</pallas_src>

<mosaic_0001>
module attributes {stable_mosaic.version = 11 : i64} {
  func.func @kernel(%arg0: i32, %arg1: memref<10x8x128xbf16, #tpu.memory_space<vmem>>, %arg2: memref<128x512xbf16, #tpu.memory_space<vmem>>, %arg3: memref<128x512xbf16, #tpu.memory_space<vmem>>, %arg4: memref<1x512xf32, #tpu.memory_space<vmem>>, %arg5: memref<256x512xbf16, #tpu.memory_space<vmem>>, %arg6: memref<1x512xf32, #tpu.memory_space<vmem>>, %arg7: memref<2x8x128xf32, #tpu.memory_space<vmem>>, %arg8: memref<2x8x128xf32, #tpu.memory_space<vmem>>, %arg9: memref<1x128xf32, #tpu.memory_space<vmem>>, %arg10: memref<1x1xf32, #tpu.memory_space<vmem>>, %arg11: memref<8x1xf32, #tpu.memory_space<vmem>>, %arg12: memref<2x8x128xf32, #tpu.memory_space<vmem>>, %arg13: memref<2x8x128xf32, #tpu.memory_space<vmem>>, %arg14: memref<10x8x512xf32, #tpu.memory_space<vmem>>) attributes {dimension_semantics = [#tpu.dimension_semantics<parallel>], iteration_bounds = array<i64: 1>, scalar_prefetch = 0 : i64, scratch_operands = 1 : i64, tpu.core_type = #tpu.core_type<tc>, window_params = [{transform_indices = @transform_0, window_bounds = array<i64: 10, 8, 128>}, {pipeline_mode = #tpu.pipeline_mode<synchronous>, transform_indices = @transform_1, window_bounds = array<i64: 128, 512>}, {pipeline_mode = #tpu.pipeline_mode<synchronous>, transform_indices = @transform_2, window_bounds = array<i64: 128, 512>}, {pipeline_mode = #tpu.pipeline_mode<synchronous>, transform_indices = @transform_3, window_bounds = array<i64: 1, 512>}, {pipeline_mode = #tpu.pipeline_mode<synchronous>, transform_indices = @transform_4, window_bounds = array<i64: 256, 512>}, {pipeline_mode = #tpu.pipeline_mode<synchronous>, transform_indices = @transform_5, window_bounds = array<i64: 1, 512>}, {transform_indices = @transform_6, window_bounds = array<i64: 2, 8, 128>}, {transform_indices = @transform_7, window_bounds = array<i64: 2, 8, 128>}, {pipeline_mode = #tpu.pipeline_mode<synchronous>, transform_indices = @transform_8, window_bounds = array<i64: 1, 128>}, {pipeline_mode = #tpu.pipeline_mode<synchronous>, transform_indices = @transform_9, window_bounds = array<i64: 1, 1>}, {transform_indices = @transform_10, window_bounds = array<i64: 8, 1>}, {transform_indices = @transform_11, window_bounds = array<i64: 2, 8, 128>}, {transform_indices = @transform_12, window_bounds = array<i64: 2, 8, 128>}]} {
    %c0 = arith.constant 0 : index
    %c0_0 = arith.constant 0 : index
    %c0_1 = arith.constant 0 : index
    %0 = vector.load %arg1[%c0, %c0_0, %c0_1] : memref<10x8x128xbf16, #tpu.memory_space<vmem>>, vector<10x8x128xbf16>
    %1 = vector.shape_cast %0 : vector<10x8x128xbf16> to vector<80x128xbf16>
    %c0_2 = arith.constant 0 : index
    %c0_3 = arith.constant 0 : index
    %2 = vector.load %arg2[%c0_2, %c0_3] : memref<128x512xbf16, #tpu.memory_space<vmem>>, vector<128x512xbf16>
    %cst = arith.constant dense<0.000000e+00> : vector<80x512xf32>
    %3 = tpu.matmul %1, %2, %cst {dimension_numbers = #tpu.dot_dimension_numbers<[1], [0], [0], [1], [0, 0, 1, 1], [], []>} : vector<80x128xbf16>, vector<128x512xbf16>, vector<80x512xf32> -> vector<80x512xf32>
    %c0_4 = arith.constant 0 : index
    %c0_5 = arith.constant 0 : index
    %4 = vector.load %arg4[%c0_4, %c0_5] : memref<1x512xf32, #tpu.memory_space<vmem>>, vector<1x512xf32>
    %5 = vector.broadcast %4 : vector<1x512xf32> to vector<80x512xf32>
    %6 = arith.addf %3, %5 : vector<80x512xf32>
    %7 = vector.shape_cast %6 : vector<80x512xf32> to vector<10x8x512xf32>
    %c0_6 = arith.constant 0 : index
    %c0_7 = arith.constant 0 : index
    %c0_8 = arith.constant 0 : index
    %8 = vector.load %arg14[%c0_6, %c0_7, %c0_8] : memref<10x8x512xf32, #tpu.memory_space<vmem>>, vector<10x8x512xf32>
    tpu.vector_store %arg14[%c0_6, %c0_7, %c0_8], %7 {strides = array<i32>} : memref<10x8x512xf32, #tpu.memory_space<vmem>>, vector<10x8x512xf32>,
    %c0_9 = arith.constant 0 : index
    %c0_10 = arith.constant 0 : index
    %9 = vector.load %arg6[%c0_9, %c0_10] : memref<1x512xf32, #tpu.memory_space<vmem>>, vector<1x512xf32>
    %10 = vector.shape_cast %9 : vector<1x512xf32> to vector<1x512xf32>
    %11 = vector.broadcast %10 : vector<1x512xf32> to vector<8x512xf32>
    %c0_11 = arith.constant 0 : index
    %c0_12 = arith.constant 0 : index
    %c0_13 = arith.constant 0 : index
    %12 = vector.load %arg7[%c0_11, %c0_12, %c0_13] : memref<2x8x128xf32, #tpu.memory_space<vmem>>, vector<1x8x128xf32>
    %13 = vector.shape_cast %12 : vector<1x8x128xf32> to vector<8x128xf32>
    %c0_14 = arith.constant 0 : index
    %c0_15 = arith.constant 0 : index
    %c0_16 = arith.constant 0 : index
    %14 = vector.load %arg8[%c0_14, %c0_15, %c0_16] : memref<2x8x128xf32, #tpu.memory_space<vmem>>, vector<1x8x128xf32>
    %15 = vector.shape_cast %14 : vector<1x8x128xf32> to vector<8x128xf32>
    %c1 = arith.constant 1 : index
    %c0_17 = arith.constant 0 : index
    %c0_18 = arith.constant 0 : index
    %16 = vector.load %arg7[%c1, %c0_17, %c0_18] : memref<2x8x128xf32, #tpu.memory_space<vmem>>, vector<1x8x128xf32>
    %17 = vector.shape_cast %16 : vector<1x8x128xf32> to vector<8x128xf32>
    %c1_19 = arith.constant 1 : index
    %c0_20 = arith.constant 0 : index
    %c0_21 = arith.constant 0 : index
    %18 = vector.load %arg8[%c1_19, %c0_20, %c0_21] : memref<2x8x128xf32, #tpu.memory_space<vmem>>, vector<1x8x128xf32>
    %19 = vector.shape_cast %18 : vector<1x8x128xf32> to vector<8x128xf32>
    %c0_22 = arith.constant 0 : index
    %c0_23 = arith.constant 0 : index
    %c0_24 = arith.constant 0 : index
    %20 = vector.load %arg14[%c0_22, %c0_23, %c0_24] : memref<10x8x512xf32, #tpu.memory_space<vmem>>, vector<1x8x512xf32>
    %21 = vector.shape_cast %20 : vector<1x8x512xf32> to vector<8x512xf32>
    %22 = arith.truncf %13 : vector<8x128xf32> to vector<8x128xbf16>
    %c0_25 = arith.constant 0 : index
    %c0_26 = arith.constant 0 : index
    %23 = vector.load %arg3[%c0_25, %c0_26] : memref<128x512xbf16, #tpu.memory_space<vmem>>, vector<128x512xbf16>
    %cst_27 = arith.constant dense<0.000000e+00> : vector<8x512xf32>
    %24 = tpu.matmul %22, %23, %cst_27 {dimension_numbers = #tpu.dot_dimension_numbers<[1], [0], [0], [1], [0, 0, 1, 1], [], []>} : vector<8x128xbf16>, vector<128x512xbf16>, vector<8x512xf32> -> vector<8x512xf32>
    %25 = arith.addf %21, %24 : vector<8x512xf32>
    %26 = vector.extract_strided_slice %25 {offsets = [0, 0], sizes = [8, 128], strides = [1, 1]} : vector<8x512xf32> to vector<8x128xf32>
    %27 = arith.negf %26 : vector<8x128xf32>
    %28 = math.exp %27 : vector<8x128xf32>
    %cst_28 = arith.constant 1.000000e+00 : f32
    %29 = vector.broadcast %cst_28 : f32 to vector<8x128xf32>
    %30 = arith.addf %29, %28 : vector<8x128xf32>
    %31 = arith.divf %29, %30 : vector<8x128xf32>
    %32 = vector.extract_strided_slice %25 {offsets = [0, 128], sizes = [8, 128], strides = [1, 1]} : vector<8x512xf32> to vector<8x128xf32>
    %33 = arith.negf %32 : vector<8x128xf32>
    %34 = math.exp %33 : vector<8x128xf32>
    %cst_29 = arith.constant 1.000000e+00 : f32
    %35 = vector.broadcast %cst_29 : f32 to vector<8x128xf32>
    %36 = arith.addf %35, %34 : vector<8x128xf32>
    %37 = arith.divf %35, %36 : vector<8x128xf32>
    %38 = vector.extract_strided_slice %25 {offsets = [0, 256], sizes = [8, 128], strides = [1, 1]} : vector<8x512xf32> to vector<8x128xf32>
    %39 = math.tanh %38 : vector<8x128xf32>
    %40 = vector.extract_strided_slice %25 {offsets = [0, 384], sizes = [8, 128], strides = [1, 1]} : vector<8x512xf32> to vector<8x128xf32>
    %41 = arith.negf %40 : vector<8x128xf32>
    %42 = math.exp %41 : vector<8x128xf32>
    %cst_30 = arith.constant 1.000000e+00 : f32
    %43 = vector.broadcast %cst_30 : f32 to vector<8x128xf32>
    %44 = arith.addf %43, %42 : vector<8x128xf32>
    %45 = arith.divf %43, %44 : vector<8x128xf32>
    %46 = arith.mulf %37, %15 : vector<8x128xf32>
    %47 = arith.mulf %31, %39 : vector<8x128xf32>
    %48 = arith.addf %46, %47 : vector<8x128xf32>
    %49 = math.tanh %48 : vector<8x128xf32>
    %50 = arith.mulf %45, %49 : vector<8x128xf32>
    %c1_i32 = arith.constant 1 : i32
    %51 = arith.truncf %17 : vector<8x128xf32> to vector<8x128xbf16>
    %52 = arith.truncf %50 : vector<8x128xf32> to vector<8x128xbf16>
    %53 = tpu.concatenate %51, %52 in 1 : vector<8x128xbf16>, vector<8x128xbf16> -> vector<8x256xbf16>
    %c0_31 = arith.constant 0 : index
    %c0_32 = arith.constant 0 : index
    %54 = vector.load %arg5[%c0_31, %c0_32] : memref<256x512xbf16, #tpu.memory_space<vmem>>, vector<256x512xbf16>
    %cst_33 = arith.constant dense<0.000000e+00> : vector<8x512xf32>
    %55 = tpu.matmul %53, %54, %cst_33 {dimension_numbers = #tpu.dot_dimension_numbers<[1], [0], [0], [1], [0, 0, 1, 1], [], []>} : vector<8x256xbf16>, vector<256x512xbf16>, vector<8x512xf32> -> vector<8x512xf32>
    %56 = arith.addf %55, %11 : vector<8x512xf32>
    %57 = vector.extract_strided_slice %56 {offsets = [0, 0], sizes = [8, 128], strides = [1, 1]} : vector<8x512xf32> to vector<8x128xf32>
    %58 = arith.negf %57 : vector<8x128xf32>
    %59 = math.exp %58 : vector<8x128xf32>
    %cst_34 = arith.constant 1.000000e+00 : f32
    %60 = vector.broadcast %cst_34 : f32 to vector<8x128xf32>
    %61 = arith.addf %60, %59 : vector<8x128xf32>
    %62 = arith.divf %60, %61 : vector<8x128xf32>
    %63 = vector.extract_strided_slice %56 {offsets = [0, 128], sizes = [8, 128], strides = [1, 1]} : vector<8x512xf32> to vector<8x128xf32>
    %64 = arith.negf %63 : vector<8x128xf32>
    %65 = math.exp %64 : vector<8x128xf32>
    %cst_35 = arith.constant 1.000000e+00 : f32
    %66 = vector.broadcast %cst_35 : f32 to vector<8x128xf32>
    %67 = arith.addf %66, %65 : vector<8x128xf32>
    %68 = arith.divf %66, %67 : vector<8x128xf32>
    %69 = vector.extract_strided_slice %56 {offsets = [0, 256], sizes = [8, 128], strides = [1, 1]} : vector<8x512xf32> to vector<8x128xf32>
    %70 = math.tanh %69 : vector<8x128xf32>
    %71 = vector.extract_strided_slice %56 {offsets = [0, 384], sizes = [8, 128], strides = [1, 1]} : vector<8x512xf32> to vector<8x128xf32>
    %72 = arith.negf %71 : vector<8x128xf32>
    %73 = math.exp %72 : vector<8x128xf32>
    %cst_36 = arith.constant 1.000000e+00 : f32
    %74 = vector.broadcast %cst_36 : f32 to vector<8x128xf32>
    %75 = arith.addf %74, %73 : vector<8x128xf32>
    %76 = arith.divf %74, %75 : vector<8x128xf32>
    %77 = arith.mulf %68, %19 : vector<8x128xf32>
    %78 = arith.mulf %62, %70 : vector<8x128xf32>
    %79 = arith.addf %77, %78 : vector<8x128xf32>
    %80 = math.tanh %79 : vector<8x128xf32>
    %81 = arith.mulf %76, %80 : vector<8x128xf32>
    %82 = arith.index_cast %c1_i32 : i32 to index
    %c0_37 = arith.constant 0 : index
    %c0_38 = arith.constant 0 : index
    %83 = vector.load %arg14[%82, %c0_37, %c0_38] : memref<10x8x512xf32, #tpu.memory_space<vmem>>, vector<1x8x512xf32>
    %84 = vector.shape_cast %83 : vector<1x8x512xf32> to vector<8x512xf32>
    %85 = arith.truncf %50 : vector<8x128xf32> to vector<8x128xbf16>
    %c0_39 = arith.constant 0 : index
    %c0_40 = arith.constant 0 : index
    %86 = vector.load %arg3[%c0_39, %c0_40] : memref<128x512xbf16, #tpu.memory_space<vmem>>, vector<128x512xbf16>
    %cst_41 = arith.constant dense<0.000000e+00> : vector<8x512xf32>
    %87 = tpu.matmul %85, %86, %cst_41 {dimension_numbers = #tpu.dot_dimension_numbers<[1], [0], [0], [1], [0, 0, 1, 1], [], []>} : vector<8x128xbf16>, vector<128x512xbf16>, vector<8x512xf32> -> vector<8x512xf32>
    %88 = arith.addf %84, %87 : vector<8x512xf32>
    %89 = vector.extract_strided_slice %88 {offsets = [0, 0], sizes = [8, 128], strides = [1, 1]} : vector<8x512xf32> to vector<8x128xf32>
    %90 = arith.negf %89 : vector<8x128xf32>
    %91 = math.exp %90 : vector<8x128xf32>
    %cst_42 = arith.constant 1.000000e+00 : f32
    %92 = vector.broadcast %cst_42 : f32 to vector<8x128xf32>
    %93 = arith.addf %92, %91 : vector<8x128xf32>
    %94 = arith.divf %92, %93 : vector<8x128xf32>
    %95 = vector.extract_strided_slice %88 {offsets = [0, 128], sizes = [8, 128], strides = [1, 1]} : vector<8x512xf32> to vector<8x128xf32>
    %96 = arith.negf %95 : vector<8x128xf32>
    %97 = math.exp %96 : vector<8x128xf32>
    %cst_43 = arith.constant 1.000000e+00 : f32
    %98 = vector.broadcast %cst_43 : f32 to vector<8x128xf32>
    %99 = arith.addf %98, %97 : vector<8x128xf32>
    %100 = arith.divf %98, %99 : vector<8x128xf32>
    %101 = vector.extract_strided_slice %88 {offsets = [0, 256], sizes = [8, 128], strides = [1, 1]} : vector<8x512xf32> to vector<8x128xf32>
    %102 = math.tanh %101 : vector<8x128xf32>
    %103 = vector.extract_strided_slice %88 {offsets = [0, 384], sizes = [8, 128], strides = [1, 1]} : vector<8x512xf32> to vector<8x128xf32>
    %104 = arith.negf %103 : vector<8x128xf32>
    %105 = math.exp %104 : vector<8x128xf32>
    %cst_44 = arith.constant 1.000000e+00 : f32
    %106 = vector.broadcast %cst_44 : f32 to vector<8x128xf32>
    %107 = arith.addf %106, %105 : vector<8x128xf32>
    %108 = arith.divf %106, %107 : vector<8x128xf32>
    %109 = arith.mulf %100, %48 : vector<8x128xf32>
    %110 = arith.mulf %94, %102 : vector<8x128xf32>
    %111 = arith.addf %109, %110 : vector<8x128xf32>
    %112 = math.tanh %111 : vector<8x128xf32>
    %113 = arith.mulf %108, %112 : vector<8x128xf32>
    %c2_i32 = arith.constant 2 : i32
    %114 = arith.truncf %81 : vector<8x128xf32> to vector<8x128xbf16>
    %115 = arith.truncf %113 : vector<8x128xf32> to vector<8x128xbf16>
    %116 = tpu.concatenate %114, %115 in 1 : vector<8x128xbf16>, vector<8x128xbf16> -> vector<8x256xbf16>
    %c0_45 = arith.constant 0 : index
    %c0_46 = arith.constant 0 : index
    %117 = vector.load %arg5[%c0_45, %c0_46] : memref<256x512xbf16, #tpu.memory_space<vmem>>, vector<256x512xbf16>
    %cst_47 = arith.constant dense<0.000000e+00> : vector<8x512xf32>
    %118 = tpu.matmul %116, %117, %cst_47 {dimension_numbers = #tpu.dot_dimension_numbers<[1], [0], [0], [1], [0, 0, 1, 1], [], []>} : vector<8x256xbf16>, vector<256x512xbf16>, vector<8x512xf32> -> vector<8x512xf32>
    %119 = arith.addf %118, %11 : vector<8x512xf32>
    %120 = vector.extract_strided_slice %119 {offsets = [0, 0], sizes = [8, 128], strides = [1, 1]} : vector<8x512xf32> to vector<8x128xf32>
    %121 = arith.negf %120 : vector<8x128xf32>
    %122 = math.exp %121 : vector<8x128xf32>
    %cst_48 = arith.constant 1.000000e+00 : f32
    %123 = vector.broadcast %cst_48 : f32 to vector<8x128xf32>
    %124 = arith.addf %123, %122 : vector<8x128xf32>
    %125 = arith.divf %123, %124 : vector<8x128xf32>
    %126 = vector.extract_strided_slice %119 {offsets = [0, 128], sizes = [8, 128], strides = [1, 1]} : vector<8x512xf32> to vector<8x128xf32>
    %127 = arith.negf %126 : vector<8x128xf32>
    %128 = math.exp %127 : vector<8x128xf32>
    %cst_49 = arith.constant 1.000000e+00 : f32
    %129 = vector.broadcast %cst_49 : f32 to vector<8x128xf32>
    %130 = arith.addf %129, %128 : vector<8x128xf32>
    %131 = arith.divf %129, %130 : vector<8x128xf32>
    %132 = vector.extract_strided_slice %119 {offsets = [0, 256], sizes = [8, 128], strides = [1, 1]} : vector<8x512xf32> to vector<8x128xf32>
    %133 = math.tanh %132 : vector<8x128xf32>
    %134 = vector.extract_strided_slice %119 {offsets = [0, 384], sizes = [8, 128], strides = [1, 1]} : vector<8x512xf32> to vector<8x128xf32>
    %135 = arith.negf %134 : vector<8x128xf32>
    %136 = math.exp %135 : vector<8x128xf32>
    %cst_50 = arith.constant 1.000000e+00 : f32
    %137 = vector.broadcast %cst_50 : f32 to vector<8x128xf32>
    %138 = arith.addf %137, %136 : vector<8x128xf32>
    %139 = arith.divf %137, %138 : vector<8x128xf32>
    %140 = arith.mulf %131, %79 : vector<8x128xf32>
    %141 = arith.mulf %125, %133 : vector<8x128xf32>
    %142 = arith.addf %140, %141 : vector<8x128xf32>
    %143 = math.tanh %142 : vector<8x128xf32>
    %144 = arith.mulf %139, %143 : vector<8x128xf32>
    %145 = arith.index_cast %c2_i32 : i32 to index
    %c0_51 = arith.constant 0 : index
    %c0_52 = arith.constant 0 : index
    %146 = vector.load %arg14[%145, %c0_51, %c0_52] : memref<10x8x512xf32, #tpu.memory_space<vmem>>, vector<1x8x512xf32>
    %147 = vector.shape_cast %146 : vector<1x8x512xf32> to vector<8x512xf32>
    %148 = arith.truncf %113 : vector<8x128xf32> to vector<8x128xbf16>
    %c0_53 = arith.constant 0 : index
    %c0_54 = arith.constant 0 : index
    %149 = vector.load %arg3[%c0_53, %c0_54] : memref<128x512xbf16, #tpu.memory_space<vmem>>, vector<128x512xbf16>
    %cst_55 = arith.constant dense<0.000000e+00> : vector<8x512xf32>
    %150 = tpu.matmul %148, %149, %cst_55 {dimension_numbers = #tpu.dot_dimension_numbers<[1], [0], [0], [1], [0, 0, 1, 1], [], []>} : vector<8x128xbf16>, vector<128x512xbf16>, vector<8x512xf32> -> vector<8x512xf32>
    %151 = arith.addf %147, %150 : vector<8x512xf32>
    %152 = vector.extract_strided_slice %151 {offsets = [0, 0], sizes = [8, 128], strides = [1, 1]} : vector<8x512xf32> to vector<8x128xf32>
    %153 = arith.negf %152 : vector<8x128xf32>
    %154 = math.exp %153 : vector<8x128xf32>
    %cst_56 = arith.constant 1.000000e+00 : f32
    %155 = vector.broadcast %cst_56 : f32 to vector<8x128xf32>
    %156 = arith.addf %155, %154 : vector<8x128xf32>
    %157 = arith.divf %155, %156 : vector<8x128xf32>
    %158 = vector.extract_strided_slice %151 {offsets = [0, 128], sizes = [8, 128], strides = [1, 1]} : vector<8x512xf32> to vector<8x128xf32>
    %159 = arith.negf %158 : vector<8x128xf32>
    %160 = math.exp %159 : vector<8x128xf32>
    %cst_57 = arith.constant 1.000000e+00 : f32
    %161 = vector.broadcast %cst_57 : f32 to vector<8x128xf32>
    %162 = arith.addf %161, %160 : vector<8x128xf32>
    %163 = arith.divf %161, %162 : vector<8x128xf32>
    %164 = vector.extract_strided_slice %151 {offsets = [0, 256], sizes = [8, 128], strides = [1, 1]} : vector<8x512xf32> to vector<8x128xf32>
    %165 = math.tanh %164 : vector<8x128xf32>
    %166 = vector.extract_strided_slice %151 {offsets = [0, 384], sizes = [8, 128], strides = [1, 1]} : vector<8x512xf32> to vector<8x128xf32>
    %167 = arith.negf %166 : vector<8x128xf32>
    %168 = math.exp %167 : vector<8x128xf32>
    %cst_58 = arith.constant 1.000000e+00 : f32
    %169 = vector.broadcast %cst_58 : f32 to vector<8x128xf32>
    %170 = arith.addf %169, %168 : vector<8x128xf32>
    %171 = arith.divf %169, %170 : vector<8x128xf32>
    %172 = arith.mulf %163, %111 : vector<8x128xf32>
    %173 = arith.mulf %157, %165 : vector<8x128xf32>
    %174 = arith.addf %172, %173 : vector<8x128xf32>
    %175 = math.tanh %174 : vector<8x128xf32>
    %176 = arith.mulf %171, %175 : vector<8x128xf32>
    %c3_i32 = arith.constant 3 : i32
    %177 = arith.truncf %144 : vector<8x128xf32> to vector<8x128xbf16>
    %178 = arith.truncf %176 : vector<8x128xf32> to vector<8x128xbf16>
    %179 = tpu.concatenate %177, %178 in 1 : vector<8x128xbf16>, vector<8x128xbf16> -> vector<8x256xbf16>
    %c0_59 = arith.constant 0 : index
    %c0_60 = arith.constant 0 : index
    %180 = vector.load %arg5[%c0_59, %c0_60] : memref<256x512xbf16, #tpu.memory_space<vmem>>, vector<256x512xbf16>
    %cst_61 = arith.constant dense<0.000000e+00> : vector<8x512xf32>
    %181 = tpu.matmul %179, %180, %cst_61 {dimension_numbers = #tpu.dot_dimension_numbers<[1], [0], [0], [1], [0, 0, 1, 1], [], []>} : vector<8x256xbf16>, vector<256x512xbf16>, vector<8x512xf32> -> vector<8x512xf32>
    %182 = arith.addf %181, %11 : vector<8x512xf32>
    %183 = vector.extract_strided_slice %182 {offsets = [0, 0], sizes = [8, 128], strides = [1, 1]} : vector<8x512xf32> to vector<8x128xf32>
    %184 = arith.negf %183 : vector<8x128xf32>
    %185 = math.exp %184 : vector<8x128xf32>
    %cst_62 = arith.constant 1.000000e+00 : f32
    %186 = vector.broadcast %cst_62 : f32 to vector<8x128xf32>
    %187 = arith.addf %186, %185 : vector<8x128xf32>
    %188 = arith.divf %186, %187 : vector<8x128xf32>
    %189 = vector.extract_strided_slice %182 {offsets = [0, 128], sizes = [8, 128], strides = [1, 1]} : vector<8x512xf32> to vector<8x128xf32>
    %190 = arith.negf %189 : vector<8x128xf32>
    %191 = math.exp %190 : vector<8x128xf32>
    %cst_63 = arith.constant 1.000000e+00 : f32
    %192 = vector.broadcast %cst_63 : f32 to vector<8x128xf32>
    %193 = arith.addf %192, %191 : vector<8x128xf32>
    %194 = arith.divf %192, %193 : vector<8x128xf32>
    %195 = vector.extract_strided_slice %182 {offsets = [0, 256], sizes = [8, 128], strides = [1, 1]} : vector<8x512xf32> to vector<8x128xf32>
    %196 = math.tanh %195 : vector<8x128xf32>
    %197 = vector.extract_strided_slice %182 {offsets = [0, 384], sizes = [8, 128], strides = [1, 1]} : vector<8x512xf32> to vector<8x128xf32>
    %198 = arith.negf %197 : vector<8x128xf32>
    %199 = math.exp %198 : vector<8x128xf32>
    %cst_64 = arith.constant 1.000000e+00 : f32
    %200 = vector.broadcast %cst_64 : f32 to vector<8x128xf32>
    %201 = arith.addf %200, %199 : vector<8x128xf32>
    %202 = arith.divf %200, %201 : vector<8x128xf32>
    %203 = arith.mulf %194, %142 : vector<8x128xf32>
    %204 = arith.mulf %188, %196 : vector<8x128xf32>
    %205 = arith.addf %203, %204 : vector<8x128xf32>
    %206 = math.tanh %205 : vector<8x128xf32>
    %207 = arith.mulf %202, %206 : vector<8x128xf32>
    %208 = arith.index_cast %c3_i32 : i32 to index
    %c0_65 = arith.constant 0 : index
    %c0_66 = arith.constant 0 : index
    %209 = vector.load %arg14[%208, %c0_65, %c0_66] : memref<10x8x512xf32, #tpu.memory_space<vmem>>, vector<1x8x512xf32>
    %210 = vector.shape_cast %209 : vector<1x8x512xf32> to vector<8x512xf32>
    %211 = arith.truncf %176 : vector<8x128xf32> to vector<8x128xbf16>
    %c0_67 = arith.constant 0 : index
    %c0_68 = arith.constant 0 : index
    %212 = vector.load %arg3[%c0_67, %c0_68] : memref<128x512xbf16, #tpu.memory_space<vmem>>, vector<128x512xbf16>
    %cst_69 = arith.constant dense<0.000000e+00> : vector<8x512xf32>
    %213 = tpu.matmul %211, %212, %cst_69 {dimension_numbers = #tpu.dot_dimension_numbers<[1], [0], [0], [1], [0, 0, 1, 1], [], []>} : vector<8x128xbf16>, vector<128x512xbf16>, vector<8x512xf32> -> vector<8x512xf32>
    %214 = arith.addf %210, %213 : vector<8x512xf32>
    %215 = vector.extract_strided_slice %214 {offsets = [0, 0], sizes = [8, 128], strides = [1, 1]} : vector<8x512xf32> to vector<8x128xf32>
    %216 = arith.negf %215 : vector<8x128xf32>
    %217 = math.exp %216 : vector<8x128xf32>
    %cst_70 = arith.constant 1.000000e+00 : f32
    %218 = vector.broadcast %cst_70 : f32 to vector<8x128xf32>
    %219 = arith.addf %218, %217 : vector<8x128xf32>
    %220 = arith.divf %218, %219 : vector<8x128xf32>
    %221 = vector.extract_strided_slice %214 {offsets = [0, 128], sizes = [8, 128], strides = [1, 1]} : vector<8x512xf32> to vector<8x128xf32>
    %222 = arith.negf %221 : vector<8x128xf32>
    %223 = math.exp %222 : vector<8x128xf32>
    %cst_71 = arith.constant 1.000000e+00 : f32
    %224 = vector.broadcast %cst_71 : f32 to vector<8x128xf32>
    %225 = arith.addf %224, %223 : vector<8x128xf32>
    %226 = arith.divf %224, %225 : vector<8x128xf32>
    %227 = vector.extract_strided_slice %214 {offsets = [0, 256], sizes = [8, 128], strides = [1, 1]} : vector<8x512xf32> to vector<8x128xf32>
    %228 = math.tanh %227 : vector<8x128xf32>
    %229 = vector.extract_strided_slice %214 {offsets = [0, 384], sizes = [8, 128], strides = [1, 1]} : vector<8x512xf32> to vector<8x128xf32>
    %230 = arith.negf %229 : vector<8x128xf32>
    %231 = math.exp %230 : vector<8x128xf32>
    %cst_72 = arith.constant 1.000000e+00 : f32
    %232 = vector.broadcast %cst_72 : f32 to vector<8x128xf32>
    %233 = arith.addf %232, %231 : vector<8x128xf32>
    %234 = arith.divf %232, %233 : vector<8x128xf32>
    %235 = arith.mulf %226, %174 : vector<8x128xf32>
    %236 = arith.mulf %220, %228 : vector<8x128xf32>
    %237 = arith.addf %235, %236 : vector<8x128xf32>
    %238 = math.tanh %237 : vector<8x128xf32>
    %239 = arith.mulf %234, %238 : vector<8x128xf32>
    %c4_i32 = arith.constant 4 : i32
    %240 = arith.truncf %207 : vector<8x128xf32> to vector<8x128xbf16>
    %241 = arith.truncf %239 : vector<8x128xf32> to vector<8x128xbf16>
    %242 = tpu.concatenate %240, %241 in 1 : vector<8x128xbf16>, vector<8x128xbf16> -> vector<8x256xbf16>
    %c0_73 = arith.constant 0 : index
    %c0_74 = arith.constant 0 : index
    %243 = vector.load %arg5[%c0_73, %c0_74] : memref<256x512xbf16, #tpu.memory_space<vmem>>, vector<256x512xbf16>
    %cst_75 = arith.constant dense<0.000000e+00> : vector<8x512xf32>
    %244 = tpu.matmul %242, %243, %cst_75 {dimension_numbers = #tpu.dot_dimension_numbers<[1], [0], [0], [1], [0, 0, 1, 1], [], []>} : vector<8x256xbf16>, vector<256x512xbf16>, vector<8x512xf32> -> vector<8x512xf32>
    %245 = arith.addf %244, %11 : vector<8x512xf32>
    %246 = vector.extract_strided_slice %245 {offsets = [0, 0], sizes = [8, 128], strides = [1, 1]} : vector<8x512xf32> to vector<8x128xf32>
    %247 = arith.negf %246 : vector<8x128xf32>
    %248 = math.exp %247 : vector<8x128xf32>
    %cst_76 = arith.constant 1.000000e+00 : f32
    %249 = vector.broadcast %cst_76 : f32 to vector<8x128xf32>
    %250 = arith.addf %249, %248 : vector<8x128xf32>
    %251 = arith.divf %249, %250 : vector<8x128xf32>
    %252 = vector.extract_strided_slice %245 {offsets = [0, 128], sizes = [8, 128], strides = [1, 1]} : vector<8x512xf32> to vector<8x128xf32>
    %253 = arith.negf %252 : vector<8x128xf32>
    %254 = math.exp %253 : vector<8x128xf32>
    %cst_77 = arith.constant 1.000000e+00 : f32
    %255 = vector.broadcast %cst_77 : f32 to vector<8x128xf32>
    %256 = arith.addf %255, %254 : vector<8x128xf32>
    %257 = arith.divf %255, %256 : vector<8x128xf32>
    %258 = vector.extract_strided_slice %245 {offsets = [0, 256], sizes = [8, 128], strides = [1, 1]} : vector<8x512xf32> to vector<8x128xf32>
    %259 = math.tanh %258 : vector<8x128xf32>
    %260 = vector.extract_strided_slice %245 {offsets = [0, 384], sizes = [8, 128], strides = [1, 1]} : vector<8x512xf32> to vector<8x128xf32>
    %261 = arith.negf %260 : vector<8x128xf32>
    %262 = math.exp %261 : vector<8x128xf32>
    %cst_78 = arith.constant 1.000000e+00 : f32
    %263 = vector.broadcast %cst_78 : f32 to vector<8x128xf32>
    %264 = arith.addf %263, %262 : vector<8x128xf32>
    %265 = arith.divf %263, %264 : vector<8x128xf32>
    %266 = arith.mulf %257, %205 : vector<8x128xf32>
    %267 = arith.mulf %251, %259 : vector<8x128xf32>
    %268 = arith.addf %266, %267 : vector<8x128xf32>
    %269 = math.tanh %268 : vector<8x128xf32>
    %270 = arith.mulf %265, %269 : vector<8x128xf32>
    %271 = arith.index_cast %c4_i32 : i32 to index
    %c0_79 = arith.constant 0 : index
    %c0_80 = arith.constant 0 : index
    %272 = vector.load %arg14[%271, %c0_79, %c0_80] : memref<10x8x512xf32, #tpu.memory_space<vmem>>, vector<1x8x512xf32>
    %273 = vector.shape_cast %272 : vector<1x8x512xf32> to vector<8x512xf32>
    %274 = arith.truncf %239 : vector<8x128xf32> to vector<8x128xbf16>
    %c0_81 = arith.constant 0 : index
    %c0_82 = arith.constant 0 : index
    %275 = vector.load %arg3[%c0_81, %c0_82] : memref<128x512xbf16, #tpu.memory_space<vmem>>, vector<128x512xbf16>
    %cst_83 = arith.constant dense<0.000000e+00> : vector<8x512xf32>
    %276 = tpu.matmul %274, %275, %cst_83 {dimension_numbers = #tpu.dot_dimension_numbers<[1], [0], [0], [1], [0, 0, 1, 1], [], []>} : vector<8x128xbf16>, vector<128x512xbf16>, vector<8x512xf32> -> vector<8x512xf32>
    %277 = arith.addf %273, %276 : vector<8x512xf32>
    %278 = vector.extract_strided_slice %277 {offsets = [0, 0], sizes = [8, 128], strides = [1, 1]} : vector<8x512xf32> to vector<8x128xf32>
    %279 = arith.negf %278 : vector<8x128xf32>
    %280 = math.exp %279 : vector<8x128xf32>
    %cst_84 = arith.constant 1.000000e+00 : f32
    %281 = vector.broadcast %cst_84 : f32 to vector<8x128xf32>
    %282 = arith.addf %281, %280 : vector<8x128xf32>
    %283 = arith.divf %281, %282 : vector<8x128xf32>
    %284 = vector.extract_strided_slice %277 {offsets = [0, 128], sizes = [8, 128], strides = [1, 1]} : vector<8x512xf32> to vector<8x128xf32>
    %285 = arith.negf %284 : vector<8x128xf32>
    %286 = math.exp %285 : vector<8x128xf32>
    %cst_85 = arith.constant 1.000000e+00 : f32
    %287 = vector.broadcast %cst_85 : f32 to vector<8x128xf32>
    %288 = arith.addf %287, %286 : vector<8x128xf32>
    %289 = arith.divf %287, %288 : vector<8x128xf32>
    %290 = vector.extract_strided_slice %277 {offsets = [0, 256], sizes = [8, 128], strides = [1, 1]} : vector<8x512xf32> to vector<8x128xf32>
    %291 = math.tanh %290 : vector<8x128xf32>
    %292 = vector.extract_strided_slice %277 {offsets = [0, 384], sizes = [8, 128], strides = [1, 1]} : vector<8x512xf32> to vector<8x128xf32>
    %293 = arith.negf %292 : vector<8x128xf32>
    %294 = math.exp %293 : vector<8x128xf32>
    %cst_86 = arith.constant 1.000000e+00 : f32
    %295 = vector.broadcast %cst_86 : f32 to vector<8x128xf32>
    %296 = arith.addf %295, %294 : vector<8x128xf32>
    %297 = arith.divf %295, %296 : vector<8x128xf32>
    %298 = arith.mulf %289, %237 : vector<8x128xf32>
    %299 = arith.mulf %283, %291 : vector<8x128xf32>
    %300 = arith.addf %298, %299 : vector<8x128xf32>
    %301 = math.tanh %300 : vector<8x128xf32>
    %302 = arith.mulf %297, %301 : vector<8x128xf32>
    %c5_i32 = arith.constant 5 : i32
    %303 = arith.truncf %270 : vector<8x128xf32> to vector<8x128xbf16>
    %304 = arith.truncf %302 : vector<8x128xf32> to vector<8x128xbf16>
    %305 = tpu.concatenate %303, %304 in 1 : vector<8x128xbf16>, vector<8x128xbf16> -> vector<8x256xbf16>
    %c0_87 = arith.constant 0 : index
    %c0_88 = arith.constant 0 : index
    %306 = vector.load %arg5[%c0_87, %c0_88] : memref<256x512xbf16, #tpu.memory_space<vmem>>, vector<256x512xbf16>
    %cst_89 = arith.constant dense<0.000000e+00> : vector<8x512xf32>
    %307 = tpu.matmul %305, %306, %cst_89 {dimension_numbers = #tpu.dot_dimension_numbers<[1], [0], [0], [1], [0, 0, 1, 1], [], []>} : vector<8x256xbf16>, vector<256x512xbf16>, vector<8x512xf32> -> vector<8x512xf32>
    %308 = arith.addf %307, %11 : vector<8x512xf32>
    %309 = vector.extract_strided_slice %308 {offsets = [0, 0], sizes = [8, 128], strides = [1, 1]} : vector<8x512xf32> to vector<8x128xf32>
    %310 = arith.negf %309 : vector<8x128xf32>
    %311 = math.exp %310 : vector<8x128xf32>
    %cst_90 = arith.constant 1.000000e+00 : f32
    %312 = vector.broadcast %cst_90 : f32 to vector<8x128xf32>
    %313 = arith.addf %312, %311 : vector<8x128xf32>
    %314 = arith.divf %312, %313 : vector<8x128xf32>
    %315 = vector.extract_strided_slice %308 {offsets = [0, 128], sizes = [8, 128], strides = [1, 1]} : vector<8x512xf32> to vector<8x128xf32>
    %316 = arith.negf %315 : vector<8x128xf32>
    %317 = math.exp %316 : vector<8x128xf32>
    %cst_91 = arith.constant 1.000000e+00 : f32
    %318 = vector.broadcast %cst_91 : f32 to vector<8x128xf32>
    %319 = arith.addf %318, %317 : vector<8x128xf32>
    %320 = arith.divf %318, %319 : vector<8x128xf32>
    %321 = vector.extract_strided_slice %308 {offsets = [0, 256], sizes = [8, 128], strides = [1, 1]} : vector<8x512xf32> to vector<8x128xf32>
    %322 = math.tanh %321 : vector<8x128xf32>
    %323 = vector.extract_strided_slice %308 {offsets = [0, 384], sizes = [8, 128], strides = [1, 1]} : vector<8x512xf32> to vector<8x128xf32>
    %324 = arith.negf %323 : vector<8x128xf32>
    %325 = math.exp %324 : vector<8x128xf32>
    %cst_92 = arith.constant 1.000000e+00 : f32
    %326 = vector.broadcast %cst_92 : f32 to vector<8x128xf32>
    %327 = arith.addf %326, %325 : vector<8x128xf32>
    %328 = arith.divf %326, %327 : vector<8x128xf32>
    %329 = arith.mulf %320, %268 : vector<8x128xf32>
    %330 = arith.mulf %314, %322 : vector<8x128xf32>
    %331 = arith.addf %329, %330 : vector<8x128xf32>
    %332 = math.tanh %331 : vector<8x128xf32>
    %333 = arith.mulf %328, %332 : vector<8x128xf32>
    %334 = arith.index_cast %c5_i32 : i32 to index
    %c0_93 = arith.constant 0 : index
    %c0_94 = arith.constant 0 : index
    %335 = vector.load %arg14[%334, %c0_93, %c0_94] : memref<10x8x512xf32, #tpu.memory_space<vmem>>, vector<1x8x512xf32>
    %336 = vector.shape_cast %335 : vector<1x8x512xf32> to vector<8x512xf32>
    %337 = arith.truncf %302 : vector<8x128xf32> to vector<8x128xbf16>
    %c0_95 = arith.constant 0 : index
    %c0_96 = arith.constant 0 : index
    %338 = vector.load %arg3[%c0_95, %c0_96] : memref<128x512xbf16, #tpu.memory_space<vmem>>, vector<128x512xbf16>
    %cst_97 = arith.constant dense<0.000000e+00> : vector<8x512xf32>
    %339 = tpu.matmul %337, %338, %cst_97 {dimension_numbers = #tpu.dot_dimension_numbers<[1], [0], [0], [1], [0, 0, 1, 1], [], []>} : vector<8x128xbf16>, vector<128x512xbf16>, vector<8x512xf32> -> vector<8x512xf32>
    %340 = arith.addf %336, %339 : vector<8x512xf32>
    %341 = vector.extract_strided_slice %340 {offsets = [0, 0], sizes = [8, 128], strides = [1, 1]} : vector<8x512xf32> to vector<8x128xf32>
    %342 = arith.negf %341 : vector<8x128xf32>
    %343 = math.exp %342 : vector<8x128xf32>
    %cst_98 = arith.constant 1.000000e+00 : f32
    %344 = vector.broadcast %cst_98 : f32 to vector<8x128xf32>
    %345 = arith.addf %344, %343 : vector<8x128xf32>
    %346 = arith.divf %344, %345 : vector<8x128xf32>
    %347 = vector.extract_strided_slice %340 {offsets = [0, 128], sizes = [8, 128], strides = [1, 1]} : vector<8x512xf32> to vector<8x128xf32>
    %348 = arith.negf %347 : vector<8x128xf32>
    %349 = math.exp %348 : vector<8x128xf32>
    %cst_99 = arith.constant 1.000000e+00 : f32
    %350 = vector.broadcast %cst_99 : f32 to vector<8x128xf32>
    %351 = arith.addf %350, %349 : vector<8x128xf32>
    %352 = arith.divf %350, %351 : vector<8x128xf32>
    %353 = vector.extract_strided_slice %340 {offsets = [0, 256], sizes = [8, 128], strides = [1, 1]} : vector<8x512xf32> to vector<8x128xf32>
    %354 = math.tanh %353 : vector<8x128xf32>
    %355 = vector.extract_strided_slice %340 {offsets = [0, 384], sizes = [8, 128], strides = [1, 1]} : vector<8x512xf32> to vector<8x128xf32>
    %356 = arith.negf %355 : vector<8x128xf32>
    %357 = math.exp %356 : vector<8x128xf32>
    %cst_100 = arith.constant 1.000000e+00 : f32
    %358 = vector.broadcast %cst_100 : f32 to vector<8x128xf32>
    %359 = arith.addf %358, %357 : vector<8x128xf32>
    %360 = arith.divf %358, %359 : vector<8x128xf32>
    %361 = arith.mulf %352, %300 : vector<8x128xf32>
    %362 = arith.mulf %346, %354 : vector<8x128xf32>
    %363 = arith.addf %361, %362 : vector<8x128xf32>
    %364 = math.tanh %363 : vector<8x128xf32>
    %365 = arith.mulf %360, %364 : vector<8x128xf32>
    %c6_i32 = arith.constant 6 : i32
    %366 = arith.truncf %333 : vector<8x128xf32> to vector<8x128xbf16>
    %367 = arith.truncf %365 : vector<8x128xf32> to vector<8x128xbf16>
    %368 = tpu.concatenate %366, %367 in 1 : vector<8x128xbf16>, vector<8x128xbf16> -> vector<8x256xbf16>
    %c0_101 = arith.constant 0 : index
    %c0_102 = arith.constant 0 : index
    %369 = vector.load %arg5[%c0_101, %c0_102] : memref<256x512xbf16, #tpu.memory_space<vmem>>, vector<256x512xbf16>
    %cst_103 = arith.constant dense<0.000000e+00> : vector<8x512xf32>
    %370 = tpu.matmul %368, %369, %cst_103 {dimension_numbers = #tpu.dot_dimension_numbers<[1], [0], [0], [1], [0, 0, 1, 1], [], []>} : vector<8x256xbf16>, vector<256x512xbf16>, vector<8x512xf32> -> vector<8x512xf32>
    %371 = arith.addf %370, %11 : vector<8x512xf32>
    %372 = vector.extract_strided_slice %371 {offsets = [0, 0], sizes = [8, 128], strides = [1, 1]} : vector<8x512xf32> to vector<8x128xf32>
    %373 = arith.negf %372 : vector<8x128xf32>
    %374 = math.exp %373 : vector<8x128xf32>
    %cst_104 = arith.constant 1.000000e+00 : f32
    %375 = vector.broadcast %cst_104 : f32 to vector<8x128xf32>
    %376 = arith.addf %375, %374 : vector<8x128xf32>
    %377 = arith.divf %375, %376 : vector<8x128xf32>
    %378 = vector.extract_strided_slice %371 {offsets = [0, 128], sizes = [8, 128], strides = [1, 1]} : vector<8x512xf32> to vector<8x128xf32>
    %379 = arith.negf %378 : vector<8x128xf32>
    %380 = math.exp %379 : vector<8x128xf32>
    %cst_105 = arith.constant 1.000000e+00 : f32
    %381 = vector.broadcast %cst_105 : f32 to vector<8x128xf32>
    %382 = arith.addf %381, %380 : vector<8x128xf32>
    %383 = arith.divf %381, %382 : vector<8x128xf32>
    %384 = vector.extract_strided_slice %371 {offsets = [0, 256], sizes = [8, 128], strides = [1, 1]} : vector<8x512xf32> to vector<8x128xf32>
    %385 = math.tanh %384 : vector<8x128xf32>
    %386 = vector.extract_strided_slice %371 {offsets = [0, 384], sizes = [8, 128], strides = [1, 1]} : vector<8x512xf32> to vector<8x128xf32>
    %387 = arith.negf %386 : vector<8x128xf32>
    %388 = math.exp %387 : vector<8x128xf32>
    %cst_106 = arith.constant 1.000000e+00 : f32
    %389 = vector.broadcast %cst_106 : f32 to vector<8x128xf32>
    %390 = arith.addf %389, %388 : vector<8x128xf32>
    %391 = arith.divf %389, %390 : vector<8x128xf32>
    %392 = arith.mulf %383, %331 : vector<8x128xf32>
    %393 = arith.mulf %377, %385 : vector<8x128xf32>
    %394 = arith.addf %392, %393 : vector<8x128xf32>
    %395 = math.tanh %394 : vector<8x128xf32>
    %396 = arith.mulf %391, %395 : vector<8x128xf32>
    %397 = arith.index_cast %c6_i32 : i32 to index
    %c0_107 = arith.constant 0 : index
    %c0_108 = arith.constant 0 : index
    %398 = vector.load %arg14[%397, %c0_107, %c0_108] : memref<10x8x512xf32, #tpu.memory_space<vmem>>, vector<1x8x512xf32>
    %399 = vector.shape_cast %398 : vector<1x8x512xf32> to vector<8x512xf32>
    %400 = arith.truncf %365 : vector<8x128xf32> to vector<8x128xbf16>
    %c0_109 = arith.constant 0 : index
    %c0_110 = arith.constant 0 : index
    %401 = vector.load %arg3[%c0_109, %c0_110] : memref<128x512xbf16, #tpu.memory_space<vmem>>, vector<128x512xbf16>
    %cst_111 = arith.constant dense<0.000000e+00> : vector<8x512xf32>
    %402 = tpu.matmul %400, %401, %cst_111 {dimension_numbers = #tpu.dot_dimension_numbers<[1], [0], [0], [1], [0, 0, 1, 1], [], []>} : vector<8x128xbf16>, vector<128x512xbf16>, vector<8x512xf32> -> vector<8x512xf32>
    %403 = arith.addf %399, %402 : vector<8x512xf32>
    %404 = vector.extract_strided_slice %403 {offsets = [0, 0], sizes = [8, 128], strides = [1, 1]} : vector<8x512xf32> to vector<8x128xf32>
    %405 = arith.negf %404 : vector<8x128xf32>
    %406 = math.exp %405 : vector<8x128xf32>
    %cst_112 = arith.constant 1.000000e+00 : f32
    %407 = vector.broadcast %cst_112 : f32 to vector<8x128xf32>
    %408 = arith.addf %407, %406 : vector<8x128xf32>
    %409 = arith.divf %407, %408 : vector<8x128xf32>
    %410 = vector.extract_strided_slice %403 {offsets = [0, 128], sizes = [8, 128], strides = [1, 1]} : vector<8x512xf32> to vector<8x128xf32>
    %411 = arith.negf %410 : vector<8x128xf32>
    %412 = math.exp %411 : vector<8x128xf32>
    %cst_113 = arith.constant 1.000000e+00 : f32
    %413 = vector.broadcast %cst_113 : f32 to vector<8x128xf32>
    %414 = arith.addf %413, %412 : vector<8x128xf32>
    %415 = arith.divf %413, %414 : vector<8x128xf32>
    %416 = vector.extract_strided_slice %403 {offsets = [0, 256], sizes = [8, 128], strides = [1, 1]} : vector<8x512xf32> to vector<8x128xf32>
    %417 = math.tanh %416 : vector<8x128xf32>
    %418 = vector.extract_strided_slice %403 {offsets = [0, 384], sizes = [8, 128], strides = [1, 1]} : vector<8x512xf32> to vector<8x128xf32>
    %419 = arith.negf %418 : vector<8x128xf32>
    %420 = math.exp %419 : vector<8x128xf32>
    %cst_114 = arith.constant 1.000000e+00 : f32
    %421 = vector.broadcast %cst_114 : f32 to vector<8x128xf32>
    %422 = arith.addf %421, %420 : vector<8x128xf32>
    %423 = arith.divf %421, %422 : vector<8x128xf32>
    %424 = arith.mulf %415, %363 : vector<8x128xf32>
    %425 = arith.mulf %409, %417 : vector<8x128xf32>
    %426 = arith.addf %424, %425 : vector<8x128xf32>
    %427 = math.tanh %426 : vector<8x128xf32>
    %428 = arith.mulf %423, %427 : vector<8x128xf32>
    %c7_i32 = arith.constant 7 : i32
    %429 = arith.truncf %396 : vector<8x128xf32> to vector<8x128xbf16>
    %430 = arith.truncf %428 : vector<8x128xf32> to vector<8x128xbf16>
    %431 = tpu.concatenate %429, %430 in 1 : vector<8x128xbf16>, vector<8x128xbf16> -> vector<8x256xbf16>
    %c0_115 = arith.constant 0 : index
    %c0_116 = arith.constant 0 : index
    %432 = vector.load %arg5[%c0_115, %c0_116] : memref<256x512xbf16, #tpu.memory_space<vmem>>, vector<256x512xbf16>
    %cst_117 = arith.constant dense<0.000000e+00> : vector<8x512xf32>
    %433 = tpu.matmul %431, %432, %cst_117 {dimension_numbers = #tpu.dot_dimension_numbers<[1], [0], [0], [1], [0, 0, 1, 1], [], []>} : vector<8x256xbf16>, vector<256x512xbf16>, vector<8x512xf32> -> vector<8x512xf32>
    %434 = arith.addf %433, %11 : vector<8x512xf32>
    %435 = vector.extract_strided_slice %434 {offsets = [0, 0], sizes = [8, 128], strides = [1, 1]} : vector<8x512xf32> to vector<8x128xf32>
    %436 = arith.negf %435 : vector<8x128xf32>
    %437 = math.exp %436 : vector<8x128xf32>
    %cst_118 = arith.constant 1.000000e+00 : f32
    %438 = vector.broadcast %cst_118 : f32 to vector<8x128xf32>
    %439 = arith.addf %438, %437 : vector<8x128xf32>
    %440 = arith.divf %438, %439 : vector<8x128xf32>
    %441 = vector.extract_strided_slice %434 {offsets = [0, 128], sizes = [8, 128], strides = [1, 1]} : vector<8x512xf32> to vector<8x128xf32>
    %442 = arith.negf %441 : vector<8x128xf32>
    %443 = math.exp %442 : vector<8x128xf32>
    %cst_119 = arith.constant 1.000000e+00 : f32
    %444 = vector.broadcast %cst_119 : f32 to vector<8x128xf32>
    %445 = arith.addf %444, %443 : vector<8x128xf32>
    %446 = arith.divf %444, %445 : vector<8x128xf32>
    %447 = vector.extract_strided_slice %434 {offsets = [0, 256], sizes = [8, 128], strides = [1, 1]} : vector<8x512xf32> to vector<8x128xf32>
    %448 = math.tanh %447 : vector<8x128xf32>
    %449 = vector.extract_strided_slice %434 {offsets = [0, 384], sizes = [8, 128], strides = [1, 1]} : vector<8x512xf32> to vector<8x128xf32>
    %450 = arith.negf %449 : vector<8x128xf32>
    %451 = math.exp %450 : vector<8x128xf32>
    %cst_120 = arith.constant 1.000000e+00 : f32
    %452 = vector.broadcast %cst_120 : f32 to vector<8x128xf32>
    %453 = arith.addf %452, %451 : vector<8x128xf32>
    %454 = arith.divf %452, %453 : vector<8x128xf32>
    %455 = arith.mulf %446, %394 : vector<8x128xf32>
    %456 = arith.mulf %440, %448 : vector<8x128xf32>
    %457 = arith.addf %455, %456 : vector<8x128xf32>
    %458 = math.tanh %457 : vector<8x128xf32>
    %459 = arith.mulf %454, %458 : vector<8x128xf32>
    %460 = arith.index_cast %c7_i32 : i32 to index
    %c0_121 = arith.constant 0 : index
    %c0_122 = arith.constant 0 : index
    %461 = vector.load %arg14[%460, %c0_121, %c0_122] : memref<10x8x512xf32, #tpu.memory_space<vmem>>, vector<1x8x512xf32>
    %462 = vector.shape_cast %461 : vector<1x8x512xf32> to vector<8x512xf32>
    %463 = arith.truncf %428 : vector<8x128xf32> to vector<8x128xbf16>
    %c0_123 = arith.constant 0 : index
    %c0_124 = arith.constant 0 : index
    %464 = vector.load %arg3[%c0_123, %c0_124] : memref<128x512xbf16, #tpu.memory_space<vmem>>, vector<128x512xbf16>
    %cst_125 = arith.constant dense<0.000000e+00> : vector<8x512xf32>
    %465 = tpu.matmul %463, %464, %cst_125 {dimension_numbers = #tpu.dot_dimension_numbers<[1], [0], [0], [1], [0, 0, 1, 1], [], []>} : vector<8x128xbf16>, vector<128x512xbf16>, vector<8x512xf32> -> vector<8x512xf32>
    %466 = arith.addf %462, %465 : vector<8x512xf32>
    %467 = vector.extract_strided_slice %466 {offsets = [0, 0], sizes = [8, 128], strides = [1, 1]} : vector<8x512xf32> to vector<8x128xf32>
    %468 = arith.negf %467 : vector<8x128xf32>
    %469 = math.exp %468 : vector<8x128xf32>
    %cst_126 = arith.constant 1.000000e+00 : f32
    %470 = vector.broadcast %cst_126 : f32 to vector<8x128xf32>
    %471 = arith.addf %470, %469 : vector<8x128xf32>
    %472 = arith.divf %470, %471 : vector<8x128xf32>
    %473 = vector.extract_strided_slice %466 {offsets = [0, 128], sizes = [8, 128], strides = [1, 1]} : vector<8x512xf32> to vector<8x128xf32>
    %474 = arith.negf %473 : vector<8x128xf32>
    %475 = math.exp %474 : vector<8x128xf32>
    %cst_127 = arith.constant 1.000000e+00 : f32
    %476 = vector.broadcast %cst_127 : f32 to vector<8x128xf32>
    %477 = arith.addf %476, %475 : vector<8x128xf32>
    %478 = arith.divf %476, %477 : vector<8x128xf32>
    %479 = vector.extract_strided_slice %466 {offsets = [0, 256], sizes = [8, 128], strides = [1, 1]} : vector<8x512xf32> to vector<8x128xf32>
    %480 = math.tanh %479 : vector<8x128xf32>
    %481 = vector.extract_strided_slice %466 {offsets = [0, 384], sizes = [8, 128], strides = [1, 1]} : vector<8x512xf32> to vector<8x128xf32>
    %482 = arith.negf %481 : vector<8x128xf32>
    %483 = math.exp %482 : vector<8x128xf32>
    %cst_128 = arith.constant 1.000000e+00 : f32
    %484 = vector.broadcast %cst_128 : f32 to vector<8x128xf32>
    %485 = arith.addf %484, %483 : vector<8x128xf32>
    %486 = arith.divf %484, %485 : vector<8x128xf32>
    %487 = arith.mulf %478, %426 : vector<8x128xf32>
    %488 = arith.mulf %472, %480 : vector<8x128xf32>
    %489 = arith.addf %487, %488 : vector<8x128xf32>
    %490 = math.tanh %489 : vector<8x128xf32>
    %491 = arith.mulf %486, %490 : vector<8x128xf32>
    %c8_i32 = arith.constant 8 : i32
    %492 = arith.truncf %459 : vector<8x128xf32> to vector<8x128xbf16>
    %493 = arith.truncf %491 : vector<8x128xf32> to vector<8x128xbf16>
    %494 = tpu.concatenate %492, %493 in 1 : vector<8x128xbf16>, vector<8x128xbf16> -> vector<8x256xbf16>
    %c0_129 = arith.constant 0 : index
    %c0_130 = arith.constant 0 : index
    %495 = vector.load %arg5[%c0_129, %c0_130] : memref<256x512xbf16, #tpu.memory_space<vmem>>, vector<256x512xbf16>
    %cst_131 = arith.constant dense<0.000000e+00> : vector<8x512xf32>
    %496 = tpu.matmul %494, %495, %cst_131 {dimension_numbers = #tpu.dot_dimension_numbers<[1], [0], [0], [1], [0, 0, 1, 1], [], []>} : vector<8x256xbf16>, vector<256x512xbf16>, vector<8x512xf32> -> vector<8x512xf32>
    %497 = arith.addf %496, %11 : vector<8x512xf32>
    %498 = vector.extract_strided_slice %497 {offsets = [0, 0], sizes = [8, 128], strides = [1, 1]} : vector<8x512xf32> to vector<8x128xf32>
    %499 = arith.negf %498 : vector<8x128xf32>
    %500 = math.exp %499 : vector<8x128xf32>
    %cst_132 = arith.constant 1.000000e+00 : f32
    %501 = vector.broadcast %cst_132 : f32 to vector<8x128xf32>
    %502 = arith.addf %501, %500 : vector<8x128xf32>
    %503 = arith.divf %501, %502 : vector<8x128xf32>
    %504 = vector.extract_strided_slice %497 {offsets = [0, 128], sizes = [8, 128], strides = [1, 1]} : vector<8x512xf32> to vector<8x128xf32>
    %505 = arith.negf %504 : vector<8x128xf32>
    %506 = math.exp %505 : vector<8x128xf32>
    %cst_133 = arith.constant 1.000000e+00 : f32
    %507 = vector.broadcast %cst_133 : f32 to vector<8x128xf32>
    %508 = arith.addf %507, %506 : vector<8x128xf32>
    %509 = arith.divf %507, %508 : vector<8x128xf32>
    %510 = vector.extract_strided_slice %497 {offsets = [0, 256], sizes = [8, 128], strides = [1, 1]} : vector<8x512xf32> to vector<8x128xf32>
    %511 = math.tanh %510 : vector<8x128xf32>
    %512 = vector.extract_strided_slice %497 {offsets = [0, 384], sizes = [8, 128], strides = [1, 1]} : vector<8x512xf32> to vector<8x128xf32>
    %513 = arith.negf %512 : vector<8x128xf32>
    %514 = math.exp %513 : vector<8x128xf32>
    %cst_134 = arith.constant 1.000000e+00 : f32
    %515 = vector.broadcast %cst_134 : f32 to vector<8x128xf32>
    %516 = arith.addf %515, %514 : vector<8x128xf32>
    %517 = arith.divf %515, %516 : vector<8x128xf32>
    %518 = arith.mulf %509, %457 : vector<8x128xf32>
    %519 = arith.mulf %503, %511 : vector<8x128xf32>
    %520 = arith.addf %518, %519 : vector<8x128xf32>
    %521 = math.tanh %520 : vector<8x128xf32>
    %522 = arith.mulf %517, %521 : vector<8x128xf32>
    %523 = arith.index_cast %c8_i32 : i32 to index
    %c0_135 = arith.constant 0 : index
    %c0_136 = arith.constant 0 : index
    %524 = vector.load %arg14[%523, %c0_135, %c0_136] : memref<10x8x512xf32, #tpu.memory_space<vmem>>, vector<1x8x512xf32>
    %525 = vector.shape_cast %524 : vector<1x8x512xf32> to vector<8x512xf32>
    %526 = arith.truncf %491 : vector<8x128xf32> to vector<8x128xbf16>
    %c0_137 = arith.constant 0 : index
    %c0_138 = arith.constant 0 : index
    %527 = vector.load %arg3[%c0_137, %c0_138] : memref<128x512xbf16, #tpu.memory_space<vmem>>, vector<128x512xbf16>
    %cst_139 = arith.constant dense<0.000000e+00> : vector<8x512xf32>
    %528 = tpu.matmul %526, %527, %cst_139 {dimension_numbers = #tpu.dot_dimension_numbers<[1], [0], [0], [1], [0, 0, 1, 1], [], []>} : vector<8x128xbf16>, vector<128x512xbf16>, vector<8x512xf32> -> vector<8x512xf32>
    %529 = arith.addf %525, %528 : vector<8x512xf32>
    %530 = vector.extract_strided_slice %529 {offsets = [0, 0], sizes = [8, 128], strides = [1, 1]} : vector<8x512xf32> to vector<8x128xf32>
    %531 = arith.negf %530 : vector<8x128xf32>
    %532 = math.exp %531 : vector<8x128xf32>
    %cst_140 = arith.constant 1.000000e+00 : f32
    %533 = vector.broadcast %cst_140 : f32 to vector<8x128xf32>
    %534 = arith.addf %533, %532 : vector<8x128xf32>
    %535 = arith.divf %533, %534 : vector<8x128xf32>
    %536 = vector.extract_strided_slice %529 {offsets = [0, 128], sizes = [8, 128], strides = [1, 1]} : vector<8x512xf32> to vector<8x128xf32>
    %537 = arith.negf %536 : vector<8x128xf32>
    %538 = math.exp %537 : vector<8x128xf32>
    %cst_141 = arith.constant 1.000000e+00 : f32
    %539 = vector.broadcast %cst_141 : f32 to vector<8x128xf32>
    %540 = arith.addf %539, %538 : vector<8x128xf32>
    %541 = arith.divf %539, %540 : vector<8x128xf32>
    %542 = vector.extract_strided_slice %529 {offsets = [0, 256], sizes = [8, 128], strides = [1, 1]} : vector<8x512xf32> to vector<8x128xf32>
    %543 = math.tanh %542 : vector<8x128xf32>
    %544 = vector.extract_strided_slice %529 {offsets = [0, 384], sizes = [8, 128], strides = [1, 1]} : vector<8x512xf32> to vector<8x128xf32>
    %545 = arith.negf %544 : vector<8x128xf32>
    %546 = math.exp %545 : vector<8x128xf32>
    %cst_142 = arith.constant 1.000000e+00 : f32
    %547 = vector.broadcast %cst_142 : f32 to vector<8x128xf32>
    %548 = arith.addf %547, %546 : vector<8x128xf32>
    %549 = arith.divf %547, %548 : vector<8x128xf32>
    %550 = arith.mulf %541, %489 : vector<8x128xf32>
    %551 = arith.mulf %535, %543 : vector<8x128xf32>
    %552 = arith.addf %550, %551 : vector<8x128xf32>
    %553 = math.tanh %552 : vector<8x128xf32>
    %554 = arith.mulf %549, %553 : vector<8x128xf32>
    %c9_i32 = arith.constant 9 : i32
    %555 = arith.truncf %522 : vector<8x128xf32> to vector<8x128xbf16>
    %556 = arith.truncf %554 : vector<8x128xf32> to vector<8x128xbf16>
    %557 = tpu.concatenate %555, %556 in 1 : vector<8x128xbf16>, vector<8x128xbf16> -> vector<8x256xbf16>
    %c0_143 = arith.constant 0 : index
    %c0_144 = arith.constant 0 : index
    %558 = vector.load %arg5[%c0_143, %c0_144] : memref<256x512xbf16, #tpu.memory_space<vmem>>, vector<256x512xbf16>
    %cst_145 = arith.constant dense<0.000000e+00> : vector<8x512xf32>
    %559 = tpu.matmul %557, %558, %cst_145 {dimension_numbers = #tpu.dot_dimension_numbers<[1], [0], [0], [1], [0, 0, 1, 1], [], []>} : vector<8x256xbf16>, vector<256x512xbf16>, vector<8x512xf32> -> vector<8x512xf32>
    %560 = arith.addf %559, %11 : vector<8x512xf32>
    %561 = vector.extract_strided_slice %560 {offsets = [0, 0], sizes = [8, 128], strides = [1, 1]} : vector<8x512xf32> to vector<8x128xf32>
    %562 = arith.negf %561 : vector<8x128xf32>
    %563 = math.exp %562 : vector<8x128xf32>
    %cst_146 = arith.constant 1.000000e+00 : f32
    %564 = vector.broadcast %cst_146 : f32 to vector<8x128xf32>
    %565 = arith.addf %564, %563 : vector<8x128xf32>
    %566 = arith.divf %564, %565 : vector<8x128xf32>
    %567 = vector.extract_strided_slice %560 {offsets = [0, 128], sizes = [8, 128], strides = [1, 1]} : vector<8x512xf32> to vector<8x128xf32>
    %568 = arith.negf %567 : vector<8x128xf32>
    %569 = math.exp %568 : vector<8x128xf32>
    %cst_147 = arith.constant 1.000000e+00 : f32
    %570 = vector.broadcast %cst_147 : f32 to vector<8x128xf32>
    %571 = arith.addf %570, %569 : vector<8x128xf32>
    %572 = arith.divf %570, %571 : vector<8x128xf32>
    %573 = vector.extract_strided_slice %560 {offsets = [0, 256], sizes = [8, 128], strides = [1, 1]} : vector<8x512xf32> to vector<8x128xf32>
    %574 = math.tanh %573 : vector<8x128xf32>
    %575 = vector.extract_strided_slice %560 {offsets = [0, 384], sizes = [8, 128], strides = [1, 1]} : vector<8x512xf32> to vector<8x128xf32>
    %576 = arith.negf %575 : vector<8x128xf32>
    %577 = math.exp %576 : vector<8x128xf32>
    %cst_148 = arith.constant 1.000000e+00 : f32
    %578 = vector.broadcast %cst_148 : f32 to vector<8x128xf32>
    %579 = arith.addf %578, %577 : vector<8x128xf32>
    %580 = arith.divf %578, %579 : vector<8x128xf32>
    %581 = arith.mulf %572, %520 : vector<8x128xf32>
    %582 = arith.mulf %566, %574 : vector<8x128xf32>
    %583 = arith.addf %581, %582 : vector<8x128xf32>
    %584 = math.tanh %583 : vector<8x128xf32>
    %585 = arith.mulf %580, %584 : vector<8x128xf32>
    %586 = arith.index_cast %c9_i32 : i32 to index
    %c0_149 = arith.constant 0 : index
    %c0_150 = arith.constant 0 : index
    %587 = vector.load %arg14[%586, %c0_149, %c0_150] : memref<10x8x512xf32, #tpu.memory_space<vmem>>, vector<1x8x512xf32>
    %588 = vector.shape_cast %587 : vector<1x8x512xf32> to vector<8x512xf32>
    %589 = arith.truncf %554 : vector<8x128xf32> to vector<8x128xbf16>
    %c0_151 = arith.constant 0 : index
    %c0_152 = arith.constant 0 : index
    %590 = vector.load %arg3[%c0_151, %c0_152] : memref<128x512xbf16, #tpu.memory_space<vmem>>, vector<128x512xbf16>
    %cst_153 = arith.constant dense<0.000000e+00> : vector<8x512xf32>
    %591 = tpu.matmul %589, %590, %cst_153 {dimension_numbers = #tpu.dot_dimension_numbers<[1], [0], [0], [1], [0, 0, 1, 1], [], []>} : vector<8x128xbf16>, vector<128x512xbf16>, vector<8x512xf32> -> vector<8x512xf32>
    %592 = arith.addf %588, %591 : vector<8x512xf32>
    %593 = vector.extract_strided_slice %592 {offsets = [0, 0], sizes = [8, 128], strides = [1, 1]} : vector<8x512xf32> to vector<8x128xf32>
    %594 = arith.negf %593 : vector<8x128xf32>
    %595 = math.exp %594 : vector<8x128xf32>
    %cst_154 = arith.constant 1.000000e+00 : f32
    %596 = vector.broadcast %cst_154 : f32 to vector<8x128xf32>
    %597 = arith.addf %596, %595 : vector<8x128xf32>
    %598 = arith.divf %596, %597 : vector<8x128xf32>
    %599 = vector.extract_strided_slice %592 {offsets = [0, 128], sizes = [8, 128], strides = [1, 1]} : vector<8x512xf32> to vector<8x128xf32>
    %600 = arith.negf %599 : vector<8x128xf32>
    %601 = math.exp %600 : vector<8x128xf32>
    %cst_155 = arith.constant 1.000000e+00 : f32
    %602 = vector.broadcast %cst_155 : f32 to vector<8x128xf32>
    %603 = arith.addf %602, %601 : vector<8x128xf32>
    %604 = arith.divf %602, %603 : vector<8x128xf32>
    %605 = vector.extract_strided_slice %592 {offsets = [0, 256], sizes = [8, 128], strides = [1, 1]} : vector<8x512xf32> to vector<8x128xf32>
    %606 = math.tanh %605 : vector<8x128xf32>
    %607 = vector.extract_strided_slice %592 {offsets = [0, 384], sizes = [8, 128], strides = [1, 1]} : vector<8x512xf32> to vector<8x128xf32>
    %608 = arith.negf %607 : vector<8x128xf32>
    %609 = math.exp %608 : vector<8x128xf32>
    %cst_156 = arith.constant 1.000000e+00 : f32
    %610 = vector.broadcast %cst_156 : f32 to vector<8x128xf32>
    %611 = arith.addf %610, %609 : vector<8x128xf32>
    %612 = arith.divf %610, %611 : vector<8x128xf32>
    %613 = arith.mulf %604, %552 : vector<8x128xf32>
    %614 = arith.mulf %598, %606 : vector<8x128xf32>
    %615 = arith.addf %613, %614 : vector<8x128xf32>
    %616 = math.tanh %615 : vector<8x128xf32>
    %617 = arith.mulf %612, %616 : vector<8x128xf32>
    %c9_i32_157 = arith.constant 9 : i32
    %618 = arith.truncf %585 : vector<8x128xf32> to vector<8x128xbf16>
    %619 = arith.truncf %617 : vector<8x128xf32> to vector<8x128xbf16>
    %620 = tpu.concatenate %618, %619 in 1 : vector<8x128xbf16>, vector<8x128xbf16> -> vector<8x256xbf16>
    %c0_158 = arith.constant 0 : index
    %c0_159 = arith.constant 0 : index
    %621 = vector.load %arg5[%c0_158, %c0_159] : memref<256x512xbf16, #tpu.memory_space<vmem>>, vector<256x512xbf16>
    %cst_160 = arith.constant dense<0.000000e+00> : vector<8x512xf32>
    %622 = tpu.matmul %620, %621, %cst_160 {dimension_numbers = #tpu.dot_dimension_numbers<[1], [0], [0], [1], [0, 0, 1, 1], [], []>} : vector<8x256xbf16>, vector<256x512xbf16>, vector<8x512xf32> -> vector<8x512xf32>
    %623 = arith.addf %622, %11 : vector<8x512xf32>
    %624 = vector.extract_strided_slice %623 {offsets = [0, 0], sizes = [8, 128], strides = [1, 1]} : vector<8x512xf32> to vector<8x128xf32>
    %625 = arith.negf %624 : vector<8x128xf32>
    %626 = math.exp %625 : vector<8x128xf32>
    %cst_161 = arith.constant 1.000000e+00 : f32
    %627 = vector.broadcast %cst_161 : f32 to vector<8x128xf32>
    %628 = arith.addf %627, %626 : vector<8x128xf32>
    %629 = arith.divf %627, %628 : vector<8x128xf32>
    %630 = vector.extract_strided_slice %623 {offsets = [0, 128], sizes = [8, 128], strides = [1, 1]} : vector<8x512xf32> to vector<8x128xf32>
    %631 = arith.negf %630 : vector<8x128xf32>
    %632 = math.exp %631 : vector<8x128xf32>
    %cst_162 = arith.constant 1.000000e+00 : f32
    %633 = vector.broadcast %cst_162 : f32 to vector<8x128xf32>
    %634 = arith.addf %633, %632 : vector<8x128xf32>
    %635 = arith.divf %633, %634 : vector<8x128xf32>
    %636 = vector.extract_strided_slice %623 {offsets = [0, 256], sizes = [8, 128], strides = [1, 1]} : vector<8x512xf32> to vector<8x128xf32>
    %637 = math.tanh %636 : vector<8x128xf32>
    %638 = vector.extract_strided_slice %623 {offsets = [0, 384], sizes = [8, 128], strides = [1, 1]} : vector<8x512xf32> to vector<8x128xf32>
    %639 = arith.negf %638 : vector<8x128xf32>
    %640 = math.exp %639 : vector<8x128xf32>
    %cst_163 = arith.constant 1.000000e+00 : f32
    %641 = vector.broadcast %cst_163 : f32 to vector<8x128xf32>
    %642 = arith.addf %641, %640 : vector<8x128xf32>
    %643 = arith.divf %641, %642 : vector<8x128xf32>
    %644 = arith.mulf %635, %583 : vector<8x128xf32>
    %645 = arith.mulf %629, %637 : vector<8x128xf32>
    %646 = arith.addf %644, %645 : vector<8x128xf32>
    %647 = math.tanh %646 : vector<8x128xf32>
    %648 = arith.mulf %643, %647 : vector<8x128xf32>
    %c0_164 = arith.constant 0 : index
    %c0_165 = arith.constant 0 : index
    %c0_166 = arith.constant 0 : index
    %649 = vector.load %arg12[%c0_164, %c0_165, %c0_166] : memref<2x8x128xf32, #tpu.memory_space<vmem>>, vector<1x8x128xf32>
    %650 = vector.shape_cast %649 : vector<1x8x128xf32> to vector<8x128xf32>
    %651 = vector.shape_cast %617 : vector<8x128xf32> to vector<1x8x128xf32>
    tpu.vector_store %arg12[%c0_164, %c0_165, %c0_166], %651 {strides = array<i32>} : memref<2x8x128xf32, #tpu.memory_space<vmem>>, vector<1x8x128xf32>,
    %c0_167 = arith.constant 0 : index
    %c0_168 = arith.constant 0 : index
    %c0_169 = arith.constant 0 : index
    %652 = vector.load %arg13[%c0_167, %c0_168, %c0_169] : memref<2x8x128xf32, #tpu.memory_space<vmem>>, vector<1x8x128xf32>
    %653 = vector.shape_cast %652 : vector<1x8x128xf32> to vector<8x128xf32>
    %654 = vector.shape_cast %615 : vector<8x128xf32> to vector<1x8x128xf32>
    tpu.vector_store %arg13[%c0_167, %c0_168, %c0_169], %654 {strides = array<i32>} : memref<2x8x128xf32, #tpu.memory_space<vmem>>, vector<1x8x128xf32>,
    %c1_170 = arith.constant 1 : index
    %c0_171 = arith.constant 0 : index
    %c0_172 = arith.constant 0 : index
    %655 = vector.load %arg12[%c1_170, %c0_171, %c0_172] : memref<2x8x128xf32, #tpu.memory_space<vmem>>, vector<1x8x128xf32>
    %656 = vector.shape_cast %655 : vector<1x8x128xf32> to vector<8x128xf32>
    %657 = vector.shape_cast %648 : vector<8x128xf32> to vector<1x8x128xf32>
    tpu.vector_store %arg12[%c1_170, %c0_171, %c0_172], %657 {strides = array<i32>} : memref<2x8x128xf32, #tpu.memory_space<vmem>>, vector<1x8x128xf32>,
    %c1_173 = arith.constant 1 : index
    %c0_174 = arith.constant 0 : index
    %c0_175 = arith.constant 0 : index
    %658 = vector.load %arg13[%c1_173, %c0_174, %c0_175] : memref<2x8x128xf32, #tpu.memory_space<vmem>>, vector<1x8x128xf32>
    %659 = vector.shape_cast %658 : vector<1x8x128xf32> to vector<8x128xf32>
    %660 = vector.shape_cast %646 : vector<8x128xf32> to vector<1x8x128xf32>
    tpu.vector_store %arg13[%c1_173, %c0_174, %c0_175], %660 {strides = array<i32>} : memref<2x8x128xf32, #tpu.memory_space<vmem>>, vector<1x8x128xf32>,
    %c0_176 = arith.constant 0 : index
    %c0_177 = arith.constant 0 : index
    %661 = vector.load %arg9[%c0_176, %c0_177] : memref<1x128xf32, #tpu.memory_space<vmem>>, vector<1x128xf32>
    %662 = vector.broadcast %661 : vector<1x128xf32> to vector<8x128xf32>
    %663 = arith.mulf %648, %662 : vector<8x128xf32>
    %cst_178 = arith.constant dense<0.000000e+00> : vector<8xf32>
    %664 = vector.multi_reduction <add>, %663, %cst_178 [1] : vector<8x128xf32> to vector<8xf32>
    %665 = vector.shape_cast %664 : vector<8xf32> to vector<8x1xf32>
    %c0_179 = arith.constant 0 : index
    %c0_180 = arith.constant 0 : index
    %666 = vector.load %arg10[%c0_179, %c0_180] : memref<1x1xf32, #tpu.memory_space<vmem>>, vector<1x1xf32>
    %667 = vector.broadcast %666 : vector<1x1xf32> to vector<8x1xf32>
    %668 = arith.addf %665, %667 : vector<8x1xf32>
    %669 = arith.negf %668 : vector<8x1xf32>
    %670 = math.exp %669 : vector<8x1xf32>
    %cst_181 = arith.constant 1.000000e+00 : f32
    %671 = vector.broadcast %cst_181 : f32 to vector<8x1xf32>
    %672 = arith.addf %671, %670 : vector<8x1xf32>
    %673 = arith.divf %671, %672 : vector<8x1xf32>
    %c0_182 = arith.constant 0 : index
    %c0_183 = arith.constant 0 : index
    %674 = vector.load %arg11[%c0_182, %c0_183] : memref<8x1xf32, #tpu.memory_space<vmem>>, vector<8x1xf32>
    tpu.vector_store %arg11[%c0_182, %c0_183], %673 {strides = array<i32>} : memref<8x1xf32, #tpu.memory_space<vmem>>, vector<8x1xf32>,
    return
  }
  func.func @transform_0(%arg0: i32) -> (i32, i32, i32) {
    %c0_i32 = arith.constant 0 : i32
    %c0_i32_0 = arith.constant 0 : i32
    %c0_i32_1 = arith.constant 0 : i32
    return %c0_i32, %arg0, %c0_i32_0 : i32, i32, i32
  }
  func.func @transform_1(%arg0: i32) -> (i32, i32) {
    %c0_i32 = arith.constant 0 : i32
    %c0_i32_0 = arith.constant 0 : i32
    %c0_i32_1 = arith.constant 0 : i32
    return %c0_i32, %c0_i32_0 : i32, i32
  }
  func.func @transform_2(%arg0: i32) -> (i32, i32) {
    %c0_i32 = arith.constant 0 : i32
    %c0_i32_0 = arith.constant 0 : i32
    %c0_i32_1 = arith.constant 0 : i32
    return %c0_i32, %c0_i32_0 : i32, i32
  }
  func.func @transform_3(%arg0: i32) -> (i32, i32) {
    %c0_i32 = arith.constant 0 : i32
    %c0_i32_0 = arith.constant 0 : i32
    %c0_i32_1 = arith.constant 0 : i32
    return %c0_i32, %c0_i32_0 : i32, i32
  }
  func.func @transform_4(%arg0: i32) -> (i32, i32) {
    %c0_i32 = arith.constant 0 : i32
    %c0_i32_0 = arith.constant 0 : i32
    %c0_i32_1 = arith.constant 0 : i32
    return %c0_i32, %c0_i32_0 : i32, i32
  }
  func.func @transform_5(%arg0: i32) -> (i32, i32) {
    %c0_i32 = arith.constant 0 : i32
    %c0_i32_0 = arith.constant 0 : i32
    %c0_i32_1 = arith.constant 0 : i32
    return %c0_i32, %c0_i32_0 : i32, i32
  }
  func.func @transform_6(%arg0: i32) -> (i32, i32, i32) {
    %c0_i32 = arith.constant 0 : i32
    %c0_i32_0 = arith.constant 0 : i32
    %c0_i32_1 = arith.constant 0 : i32
    return %c0_i32, %arg0, %c0_i32_0 : i32, i32, i32
  }
  func.func @transform_7(%arg0: i32) -> (i32, i32, i32) {
    %c0_i32 = arith.constant 0 : i32
    %c0_i32_0 = arith.constant 0 : i32
    %c0_i32_1 = arith.constant 0 : i32
    return %c0_i32, %arg0, %c0_i32_0 : i32, i32, i32
  }
  func.func @transform_8(%arg0: i32) -> (i32, i32) {
    %c0_i32 = arith.constant 0 : i32
    %c0_i32_0 = arith.constant 0 : i32
    %c0_i32_1 = arith.constant 0 : i32
    return %c0_i32, %c0_i32_0 : i32, i32
  }
  func.func @transform_9(%arg0: i32) -> (i32, i32) {
    %c0_i32 = arith.constant 0 : i32
    %c0_i32_0 = arith.constant 0 : i32
    %c0_i32_1 = arith.constant 0 : i32
    return %c0_i32, %c0_i32_0 : i32, i32
  }
  func.func @transform_10(%arg0: i32) -> (i32, i32) {
    %c0_i32 = arith.constant 0 : i32
    %c0_i32_0 = arith.constant 0 : i32
    return %arg0, %c0_i32 : i32, i32
  }
  func.func @transform_11(%arg0: i32) -> (i32, i32, i32) {
    %c0_i32 = arith.constant 0 : i32
    %c0_i32_0 = arith.constant 0 : i32
    %c0_i32_1 = arith.constant 0 : i32
    return %c0_i32, %arg0, %c0_i32_0 : i32, i32, i32
  }
  func.func @transform_12(%arg0: i32) -> (i32, i32, i32) {
    %c0_i32 = arith.constant 0 : i32
    %c0_i32_0 = arith.constant 0 : i32
    %c0_i32_1 = arith.constant 0 : i32
    return %c0_i32, %arg0, %c0_i32_0 : i32, i32, i32
  }
}

</mosaic_0001>

<bundles_post_ra>
// kernel: sentiment_rnn_forward.1
= control target key start
LH: loop header
LB: loop body
LE: loop exit
PB: predicated region body
PF: predicated region fallthrough
CT: control target
= control target key end

     0   :  { %s7431_s0 = inlined_call_operand.vmem [shape: bf16[10,8,128], index: 0, kind: input, shape index: {}]   ;;  %s7432_s1 = inlined_call_operand.hbm [shape: bf16[128,512], index: 1, kind: input, shape index: {}]   ;;  %s7433_s2 = inlined_call_operand.hbm [shape: bf16[128,512], index: 2, kind: input, shape index: {}]   ;;  %s7434_s3 = inlined_call_operand.vmem [shape: f32[1,512], index: 3, kind: input, shape index: {}]   ;;  %s7435_s4 = inlined_call_operand.vmem [shape: bf16[256,512], index: 4, kind: input, shape index: {}]   ;;  %s7436_s5 = inlined_call_operand.vmem [shape: f32[1,512], index: 5, kind: input, shape index: {}]   ;;  %s7437_s6 = inlined_call_operand.vmem [shape: f32[2,8,128], index: 6, kind: input, shape index: {}]   ;;  %s7438_s7 = inlined_call_operand.vmem [shape: f32[2,8,128], index: 7, kind: input, shape index: {}]   ;;  %s7439_s8 = inlined_call_operand.hbm [shape: f32[1,128], index: 8, kind: input, shape index: {}]   ;;  %s7440_s9 = inlined_call_operand.<no memory space> [shape: f32[1,1], index: 9, kind: input, shape index: {}]   ;;  %s7441_s10 = inlined_call_operand.vmem [shape: f32[8,1], index: 10, kind: output, shape index: {0}]   ;;  %s7442_s11 = inlined_call_operand.hbm [shape: f32[2,8,128], index: 11, kind: output, shape index: {1}]   ;;  %s7443_s12 = inlined_call_operand.hbm [shape: f32[2,8,128], index: 12, kind: output, shape index: {2}]  }
   0x1   :  { %v18_v0 = vstv %s7440_s9 }
   0x2   :  { %19 = vst [vmem:[#allocation3] sm:$0x1] %v18_v0 }
   0x3   :  { %20 = vsyncpa [#allocation5], 0 }
   0x4   :  { %21 = vsyncpa [#allocation8], 0 }
   0x5   :  { %22 = vsyncpa [#allocation6], 0 }
   0x6   :  { %23 = vsyncpa [#allocation12], 0  ;;  %s4581_s23 = smov [#allocation7]   ;;  %s4582_s25 = smov [#allocation4]  }
   0x7   :  { %s43_s24 = sshll.u32 %s4581_s23, 4  ;;  %s31_s26 = sshll.u32 %s4582_s25, 4  ;;  %s44_s24 = int_to_ptr.vmem [resolvable:$true] %s43_s24  ;;  %s4659_s26 = int_to_ptr.vmem [resolvable:$true] %s31_s26 }
   0x8   :  { %s4463_s29 = scalar_lea.hbm %s7433_s2, 4096 }
   0x9   :  { %p4464_p0 = scmp.ne.s32.totalorder %s7433_s2, %s4463_s29  ;;  %p4467_p1 = scmp.lt.u32.totalorder %s4463_s29, %s7433_s2 }
   0xb   :  { %p4469_p2 = pnand %p4467_p1, %p4464_p0 }
   0xd   :  { %4472 = shalt.err (!%p4469_p2)
}
   0xe   :  { %s4473_s15 = scalar_lea.vmem %s44_s24, 4096  ;;  %p4478_p4 = scmp.lt.s32.totalorder %s44_s24, %s44_s24 }
   0xf   :  { %p4474_p3 = scmp.ne.s32.totalorder %s44_s24, %s4473_s15  ;;  %p4479_p5 = scmp.lt.s32.totalorder %s4473_s15, %s4473_s15 }
  0x11   :  { %p4480_p6 = por %p4479_p5, %p4478_p4 }
  0x13   :  { %p4481_p7 = pnand %p4480_p6, %p4474_p3 }
  0x15   :  { %4484 = shalt.err (!%p4481_p7)
}
  0x16   :  { %s4583_s16 = smov 256   ;;  %s4584_s17 = smov 16  }
  0x17   :  { %49 = dma.hbm_to_vmem [thread:$0]  %s7433_s2, 4096, %s44_s24, [#allocation8], %s4583_s16, %s4583_s16, %s4584_s17  }
  0x18   :  { %s4485_s22 = scalar_lea.hbm %s7432_s1, 4096 }
  0x19   :  { %p4486_p8 = scmp.ne.s32.totalorder %s7432_s1, %s4485_s22  ;;  %p4489_p9 = scmp.lt.u32.totalorder %s4485_s22, %s7432_s1 }
  0x1b   :  { %p4491_p10 = pnand %p4489_p9, %p4486_p8 }
  0x1d   :  { %4494 = shalt.err (!%p4491_p10)
}
  0x1e   :  { %s4495_s29 = scalar_lea.vmem %s4659_s26, 4096  ;;  %p4500_p12 = scmp.lt.s32.totalorder %s4659_s26, %s4659_s26 }
  0x1f   :  { %p4496_p11 = scmp.ne.s32.totalorder %s4659_s26, %s4495_s29  ;;  %p4501_p13 = scmp.lt.s32.totalorder %s4495_s29, %s4495_s29 }
  0x21   :  { %p4502_p0 = por %p4501_p13, %p4500_p12 }
  0x23   :  { %p4503_p1 = pnand %p4502_p0, %p4496_p11 }
  0x25   :  { %4506 = shalt.err (!%p4503_p1)
}
  0x26   :  { %37 = dma.hbm_to_vmem [thread:$0]  %s7432_s1, 4096, %s4659_s26, [#allocation5], %s4583_s16, %s4583_s16, %s4584_s17  }
  0x27   :  { %s4585_s30 = smov [#allocation9]   ;;  %s4507_s15 = scalar_lea.hbm %s7439_s8, 16 }
  0x28   :  { %s66_s13 = sshll.u32 %s4585_s30, 4  ;;  %p4508_p2 = scmp.ne.s32.totalorder %s7439_s8, %s4507_s15  ;;  %s67_s13 = int_to_ptr.vmem [resolvable:$true] %s66_s13 }
  0x29   :  { %p4511_p3 = scmp.lt.u32.totalorder %s4507_s15, %s7439_s8 }
  0x2b   :  { %p4513_p4 = pnand %p4511_p3, %p4508_p2 }
  0x2d   :  { %4516 = shalt.err (!%p4513_p4)
}
  0x2e   :  { %s4517_s22 = scalar_lea.vmem %s67_s13, 16  ;;  %s4521_s1 = scalar_lea.vmem %s67_s13, 32 }
  0x2f   :  { %p4518_p5 = scmp.ne.s32.totalorder %s67_s13, %s4517_s22  ;;  %p4522_p6 = scmp.lt.s32.totalorder %s67_s13, %s67_s13 }
  0x30   :  { %p4523_p7 = scmp.lt.s32.totalorder %s4521_s1, %s4517_s22 }
  0x32   :  { %p4524_p8 = por %p4523_p7, %p4522_p6 }
  0x34   :  { %p4525_p9 = pnand %p4524_p8, %p4518_p5 }
  0x36   :  { %4528 = shalt.err (!%p4525_p9)
}
  0x37   :  { %69 = dma.hbm_to_vmem [thread:$0]  %s7439_s8, 16, %s67_s13, [#allocation8]  }
  0x38   :  { %4573 = dma.done.wait [#allocation5], 4096  }
  0x39   :  { %4574 = vsyncadd [#allocation5], 4294963200 }
  0x3a   :  { %4575 = dma.done.wait [#allocation8], 4112  }
  0x3b   :  { %4576 = vsyncadd [#allocation8], 4294963184  ;;  %v7444_v1 = vmov 0   ;;  %v3654_v2 = vld [vmem:[#allocation4 + $0x4] ss:$16 sps:$4 sm:$0xff]   ;;  %s4588_s18 = smov [#allocation11]  }
  0x3c   :  { %368 = vmatprep.mubr.bf16.mxu0 %v7444_v1  ;;  %451 = vmatprep.mubr.bf16.mxu1 %v7444_v1  ;;  %v3656_v3 = vld [vmem:[#allocation4 + $0xc] ss:$16 sps:$4 sm:$0xff]   ;;  %v3658_v4 = vld [vmem:[#allocation4] ss:$16 sps:$4 sm:$0xff]   ;;  %v3659_v5 = vld [vmem:[#allocation4 + $0x8] ss:$16 sps:$4 sm:$0xff]  }
  0x3d   :  { %336 = vmatprep.subr.bf16.mxu0 %v3654_v2  ;;  %419 = vmatprep.subr.bf16.mxu1 %v3656_v3  ;;  %v3660_v6 = vld [vmem:[#allocation4 + $0x24] ss:$16 sps:$4 sm:$0xff]   ;;  %v3662_v7 = vld [vmem:[#allocation4 + $0x2c] ss:$16 sps:$4 sm:$0xff]   ;;  %v3664_v8 = vld [vmem:[#allocation4 + $0x20] ss:$16 sps:$4 sm:$0xff]  }
  0x3e   :  { %337 = vmatpush1.bf16.msra.mxu0 %v3658_v4  ;;  %420 = vmatpush1.bf16.msra.mxu1 %v3659_v5  ;;  %v3665_v9 = vld [vmem:[#allocation4 + $0x28] ss:$16 sps:$4 sm:$0xff]   ;;  %v3666_v10 = vld [vmem:[#allocation4 + $0x44] ss:$16 sps:$4 sm:$0xff]   ;;  %v3668_v11 = vld [vmem:[#allocation4 + $0x4c] ss:$16 sps:$4 sm:$0xff]  }
  0x3f   :  { %338 = vmatprep.subr.bf16.mxu0 %v3660_v6  ;;  %421 = vmatprep.subr.bf16.mxu1 %v3662_v7  ;;  %v3670_v12 = vld [vmem:[#allocation4 + $0x40] ss:$16 sps:$4 sm:$0xff]   ;;  %v3671_v13 = vld [vmem:[#allocation4 + $0x48] ss:$16 sps:$4 sm:$0xff]   ;;  %v3672_v14 = vld [vmem:[#allocation4 + $0x64] ss:$16 sps:$4 sm:$0xff]  }
  0x40   :  { %v3674_v15 = vld [vmem:[#allocation4 + $0x6c] ss:$16 sps:$4 sm:$0xff]   ;;  %v3676_v16 = vld [vmem:[#allocation4 + $0x60] ss:$16 sps:$4 sm:$0xff]   ;;  %v3677_v17 = vld [vmem:[#allocation4 + $0x68] ss:$16 sps:$4 sm:$0xff]  }
  0x41   :  { %v3678_v18 = vld [vmem:[#allocation4 + $0x84] ss:$16 sps:$4 sm:$0xff]   ;;  %v3680_v19 = vld [vmem:[#allocation4 + $0x8c] ss:$16 sps:$4 sm:$0xff]   ;;  %v3682_v20 = vld [vmem:[#allocation4 + $0x80] ss:$16 sps:$4 sm:$0xff]  }
  0x42   :  { %339 = vmatpush1.bf16.msra.mxu0 %v3664_v8  ;;  %422 = vmatpush1.bf16.msra.mxu1 %v3665_v9  ;;  %v3683_v21 = vld [vmem:[#allocation4 + $0x88] ss:$16 sps:$4 sm:$0xff]   ;;  %v3684_v22 = vld [vmem:[#allocation4 + $0xa4] ss:$16 sps:$4 sm:$0xff]   ;;  %v3686_v23 = vld [vmem:[#allocation4 + $0xac] ss:$16 sps:$4 sm:$0xff]  }
  0x43   :  { %340 = vmatprep.subr.bf16.mxu0 %v3666_v10  ;;  %423 = vmatprep.subr.bf16.mxu1 %v3668_v11  ;;  %v3688_v24 = vld [vmem:[#allocation4 + $0xa0] ss:$16 sps:$4 sm:$0xff]   ;;  %v3689_v25 = vld [vmem:[#allocation4 + $0xa8] ss:$16 sps:$4 sm:$0xff]   ;;  %v3690_v26 = vld [vmem:[#allocation4 + $0xc4] ss:$16 sps:$4 sm:$0xff]  }
  0x44   :  { %v3692_v27 = vld [vmem:[#allocation4 + $0xcc] ss:$16 sps:$4 sm:$0xff]   ;;  %v3694_v28 = vld [vmem:[#allocation4 + $0xc0] ss:$16 sps:$4 sm:$0xff]   ;;  %v3695_v29 = vld [vmem:[#allocation4 + $0xc8] ss:$16 sps:$4 sm:$0xff]  }
  0x45   :  { %v3696_v30 = vld [vmem:[#allocation4 + $0xe4] ss:$16 sps:$4 sm:$0xff]   ;;  %v3698_v31 = vld [vmem:[#allocation4 + $0xec] ss:$16 sps:$4 sm:$0xff]   ;;  %v3700_v32 = vld [vmem:[#allocation4 + $0xe0] ss:$16 sps:$4 sm:$0xff]  }
  0x46   :  { %341 = vmatpush1.bf16.msra.mxu0 %v3670_v12  ;;  %424 = vmatpush1.bf16.msra.mxu1 %v3671_v13  ;;  %v3701_v33 = vld [vmem:[#allocation4 + $0xe8] ss:$16 sps:$4 sm:$0xff]   ;;  %v4704_v34 = vld [vmem:[#allocation7 + $0x4] ss:$16 sps:$4 sm:$0xff]   ;;  %v4706_v35 = vld [vmem:[#allocation7 + $0xc] ss:$16 sps:$4 sm:$0xff]  }
  0x47   :  { %342 = vmatprep.subr.bf16.mxu0 %v3672_v14  ;;  %425 = vmatprep.subr.bf16.mxu1 %v3674_v15  ;;  %v3702_v36 = vld [vmem:[%s7431_s0] sm:$0xff]   ;;  %v4717_v39 = vld [vmem:[#allocation7 + $0x8] ss:$16 sps:$4 sm:$0xff]   ;;  %v3721_v52 = vld [vmem:[%s7431_s0 + $0x10] sm:$0xff]   ;;  %s3427_s19 = sshll.u32 %s4588_s18, 4  ;;  %s7397_s19 = int_to_ptr.vmem [resolvable:$true] %s3427_s19 }
  0x48   :  { %v4711_v37 = vld [vmem:[#allocation7] ss:$16 sps:$4 sm:$0xff]   ;;  %v4714_v38 = vld [vmem:[#allocation7 + $0x24] ss:$16 sps:$4 sm:$0xff]   ;;  %v4719_v40 = vld [vmem:[#allocation7 + $0x2c] ss:$16 sps:$4 sm:$0xff]  }
  0x49   :  { %v4722_v41 = vld [vmem:[#allocation7 + $0x20] ss:$16 sps:$4 sm:$0xff]   ;;  %v4727_v42 = vld [vmem:[#allocation7 + $0x44] ss:$16 sps:$4 sm:$0xff]   ;;  %v4730_v43 = vld [vmem:[#allocation7 + $0x28] ss:$16 sps:$4 sm:$0xff]  }
  0x4a   :  { %343 = vmatpush1.bf16.msra.mxu0 %v3676_v16  ;;  %426 = vmatpush1.bf16.msra.mxu1 %v3677_v17  ;;  %v3709_v44 = vld [vmem:[%s7431_s0 + $0x8] sm:$0xff]   ;;  %v4737_v45 = vld [vmem:[#allocation7 + $0x40] ss:$16 sps:$4 sm:$0xff]   ;;  %v3732_v61 = vld [vmem:[%s7431_s0 + $0x18] sm:$0xff]  }
  0x4b   :  { %344 = vmatprep.subr.bf16.mxu0 %v3678_v18  ;;  %427 = vmatprep.subr.bf16.mxu1 %v3680_v19  ;;  %v4740_v46 = vld [vmem:[#allocation7 + $0x64] ss:$16 sps:$4 sm:$0xff]   ;;  %v4743_v47 = vld [vmem:[#allocation7 + $0x4c] ss:$16 sps:$4 sm:$0xff]   ;;  %v4745_v48 = vld [vmem:[#allocation7 + $0x48] ss:$16 sps:$4 sm:$0xff]  }
  0x4c   :  { %v4749_v49 = vld [vmem:[#allocation7 + $0x60] ss:$16 sps:$4 sm:$0xff]   ;;  %v4751_v50 = vld [vmem:[#allocation7 + $0x6c] ss:$16 sps:$4 sm:$0xff]   ;;  %v4755_v51 = vld [vmem:[#allocation7 + $0x84] ss:$16 sps:$4 sm:$0xff]  }
  0x4d   :  { %v4762_v53 = vld [vmem:[#allocation7 + $0x80] ss:$16 sps:$4 sm:$0xff]   ;;  %v4764_v54 = vld [vmem:[#allocation7 + $0x68] ss:$16 sps:$4 sm:$0xff]   ;;  %v4768_v55 = vld [vmem:[#allocation7 + $0x8c] ss:$16 sps:$4 sm:$0xff]  }
  0x4e   :  { %345 = vmatpush1.bf16.msra.mxu0 %v3682_v20  ;;  %428 = vmatpush1.bf16.msra.mxu1 %v3683_v21  ;;  %v4770_v56 = vld [vmem:[#allocation7 + $0xa4] ss:$16 sps:$4 sm:$0xff]   ;;  %v4773_v57 = vld [vmem:[#allocation7 + $0x88] ss:$16 sps:$4 sm:$0xff]   ;;  %v4775_v58 = vld [vmem:[#allocation7 + $0xa0] ss:$16 sps:$4 sm:$0xff]  }
  0x4f   :  { %346 = vmatprep.subr.bf16.mxu0 %v3684_v22  ;;  %429 = vmatprep.subr.bf16.mxu1 %v3686_v23  ;;  %v4777_v59 = vld [vmem:[#allocation7 + $0xac] ss:$16 sps:$4 sm:$0xff]   ;;  %v4779_v60 = vld [vmem:[#allocation7 + $0xc4] ss:$16 sps:$4 sm:$0xff]   ;;  %v4790_v62 = vld [vmem:[#allocation7 + $0xa8] ss:$16 sps:$4 sm:$0xff]  }
  0x50   :  { %v4792_v63 = vld [vmem:[#allocation7 + $0xc0] ss:$16 sps:$4 sm:$0xff]   ;;  %v4796_v0 = vld [vmem:[#allocation7 + $0xcc] ss:$16 sps:$4 sm:$0xff]   ;;  %v4798_v2 = vld [vmem:[#allocation7 + $0xe4] ss:$16 sps:$4 sm:$0xff]  }
  0x51   :  { %v4802_v3 = vld [vmem:[#allocation7 + $0xc8] ss:$16 sps:$4 sm:$0xff]   ;;  %v4804_v4 = vld [vmem:[#allocation7 + $0xe0] ss:$16 sps:$4 sm:$0xff]   ;;  %v4806_v5 = vld [vmem:[#allocation7 + $0xec] ss:$16 sps:$4 sm:$0xff]  }
  0x52   :  { %347 = vmatpush1.bf16.msra.mxu0 %v3688_v24  ;;  %430 = vmatpush1.bf16.msra.mxu1 %v3689_v25  ;;  %v3745_v6 = vld [vmem:[%s7431_s0 + $0x20] sm:$0xff]   ;;  %v4817_v7 = vld [vmem:[#allocation7 + $0xe8] ss:$16 sps:$4 sm:$0xff]  }
  0x53   :  { %348 = vmatprep.subr.bf16.mxu0 %v3690_v26  ;;  %431 = vmatprep.subr.bf16.mxu1 %v3692_v27  ;;  %v564_v8 = vld [vmem:[%s7437_s6] sm:$0xff]  ;;  %v4836_v11 = vld [vmem:[%s7435_s4 + $0xc] ss:$16 sps:$4 sm:$0xff]   ;;  %v4846_v13 = vld [vmem:[%s7435_s4 + $0x8] ss:$16 sps:$4 sm:$0xff]  }
  0x54   :  { %v574_v9 = vpack.c.bf16 %v564_v8, %v564_v8  ;;  %v4831_v10 = vld [vmem:[%s7435_s4 + $0x4] ss:$16 sps:$4 sm:$0xff]   ;;  %v4841_v12 = vld [vmem:[%s7435_s4] ss:$16 sps:$4 sm:$0xff]   ;;  %v4860_v15 = vld [vmem:[%s7435_s4 + $0x2c] ss:$16 sps:$4 sm:$0xff]  }
  0x55   :  { %v4855_v14 = vld [vmem:[%s7435_s4 + $0x24] ss:$16 sps:$4 sm:$0xff]   ;;  %v4865_v16 = vld [vmem:[%s7435_s4 + $0x20] ss:$16 sps:$4 sm:$0xff]   ;;  %v4870_v17 = vld [vmem:[%s7435_s4 + $0x28] ss:$16 sps:$4 sm:$0xff]  }
  0x56   :  { %349 = vmatpush1.bf16.msra.mxu0 %v3694_v28  ;;  %432 = vmatpush1.bf16.msra.mxu1 %v3695_v29  ;;  %v4879_v18 = vld [vmem:[%s7435_s4 + $0x44] ss:$16 sps:$4 sm:$0xff]   ;;  %v4884_v19 = vld [vmem:[%s7435_s4 + $0x4c] ss:$16 sps:$4 sm:$0xff]   ;;  %v4889_v20 = vld [vmem:[%s7435_s4 + $0x40] ss:$16 sps:$4 sm:$0xff]  }
  0x57   :  { %350 = vmatprep.subr.bf16.mxu0 %v3696_v30  ;;  %433 = vmatprep.subr.bf16.mxu1 %v3698_v31  ;;  %v4894_v21 = vld [vmem:[%s7435_s4 + $0x48] ss:$16 sps:$4 sm:$0xff]   ;;  %v4903_v22 = vld [vmem:[%s7435_s4 + $0x64] ss:$16 sps:$4 sm:$0xff]   ;;  %v4908_v23 = vld [vmem:[%s7435_s4 + $0x6c] ss:$16 sps:$4 sm:$0xff]  }
  0x58   :  { %7849 = vst [vmem:[#allocation17_spill] sm:$0xff] %v4894_v21  ;;  %7850 = vst [vmem:[#allocation18_spill] sm:$0xff] %v4903_v22  ;;  %v4913_v24 = vld [vmem:[%s7435_s4 + $0x60] ss:$16 sps:$4 sm:$0xff]   ;;  %v4918_v25 = vld [vmem:[%s7435_s4 + $0x68] ss:$16 sps:$4 sm:$0xff]  }
  0x59   :  { %7851 = vst [vmem:[#allocation19_spill] sm:$0xff] %v4908_v23  ;;  %7852 = vst [vmem:[#allocation20_spill] sm:$0xff] %v4913_v24  ;;  %v4927_v26 = vld [vmem:[%s7435_s4 + $0x84] ss:$16 sps:$4 sm:$0xff]   ;;  %v4932_v27 = vld [vmem:[%s7435_s4 + $0x8c] ss:$16 sps:$4 sm:$0xff]  }
  0x5a   :  { %351 = vmatpush1.bf16.msra.mxu0 %v3700_v32  ;;  %434 = vmatpush1.bf16.msra.mxu1 %v3701_v33  ;;  %7853 = vst [vmem:[#allocation21_spill] sm:$0xff] %v4918_v25  ;;  %7854 = vst [vmem:[#allocation22_spill] sm:$0xff] %v4927_v26  ;;  %v4937_v28 = vld [vmem:[%s7435_s4 + $0x80] ss:$16 sps:$4 sm:$0xff]   ;;  %v4942_v29 = vld [vmem:[%s7435_s4 + $0x88] ss:$16 sps:$4 sm:$0xff]  }
  0x5b   :  { %767 = vmatprep.subr.bf16.mxu0 %v4704_v34  ;;  %808 = vmatprep.subr.bf16.mxu1 %v4706_v35  ;;  %7855 = vst [vmem:[#allocation23_spill] sm:$0xff] %v4932_v27  ;;  %7856 = vst [vmem:[#allocation24_spill] sm:$0xff] %v4937_v28  ;;  %v4951_v30 = vld [vmem:[%s7435_s4 + $0xa4] ss:$16 sps:$4 sm:$0xff]   ;;  %v4956_v31 = vld [vmem:[%s7435_s4 + $0xac] ss:$16 sps:$4 sm:$0xff]  }
  0x5c   :  { %7857 = vst [vmem:[#allocation25_spill] sm:$0xff] %v4942_v29  ;;  %7858 = vst [vmem:[#allocation26_spill] sm:$0xff] %v4951_v30  ;;  %v4961_v32 = vld [vmem:[%s7435_s4 + $0xa0] ss:$16 sps:$4 sm:$0xff]   ;;  %v4966_v33 = vld [vmem:[%s7435_s4 + $0xa8] ss:$16 sps:$4 sm:$0xff]  }
  0x5d   :  { %369 = vmatmul.mubr.bf16.vlgmr.msra.gmra.mrb[0].mxu0 %v3702_v36  ;;  %452 = vmatmul.mubr.bf16.vlgmr.msra.gmra.mrb[0].mxu1 %v3702_v36  ;;  %7859 = vst [vmem:[#allocation27_spill] sm:$0xff] %v4956_v31  ;;  %7860 = vst [vmem:[#allocation28_spill] sm:$0xff] %v4961_v32  ;;  %v4975_v36 = vld [vmem:[%s7435_s4 + $0xc4] ss:$16 sps:$4 sm:$0xff]   ;;  %v5004_v8 = vld [vmem:[%s7435_s4 + $0xec] ss:$16 sps:$4 sm:$0xff]  }
  0x5e   :  { %768 = vmatpush1.bf16.msra.mxu0 %v4711_v37  ;;  %378 = vmatprep.mubr.bf16.mxu0 %v7444_v1  ;;  %7861 = vst [vmem:[#allocation29_spill] sm:$0xff] %v4966_v33  ;;  %7862 = vst [vmem:[#allocation30_spill] sm:$0xff] %v4975_v36 }
  0x5f   :  { %769 = vmatprep.subr.bf16.mxu0 %v4714_v38  ;;  %461 = vmatprep.mubr.bf16.mxu1 %v7444_v1  ;;  %7867 = vst [vmem:[#allocation35_spill] sm:$0xff] %v5004_v8 }
  0x60   :  { %809 = vmatpush1.bf16.msra.mxu1 %v4717_v39 }
  0x61   :  { %810 = vmatprep.subr.bf16.mxu1 %v4719_v40 }
  0x62   :  { %770 = vmatpush1.bf16.msra.mxu0 %v4722_v41 }
  0x63   :  { %771 = vmatprep.subr.bf16.mxu0 %v4727_v42 }
  0x64   :  { %811 = vmatpush1.bf16.msra.mxu1 %v4730_v43 }
  0x65   :  { %379 = vmatmul.mubr.bf16.gmra.mrb[4].mxu0 %v3709_v44  ;;  %462 = vmatmul.mubr.bf16.gmra.mrb[4].mxu1 %v3709_v44  ;;  %v4980_v44 = vld [vmem:[%s7435_s4 + $0xcc] ss:$16 sps:$4 sm:$0xff]  }
  0x66   :  { %772 = vmatpush1.bf16.msra.mxu0 %v4737_v45  ;;  %388 = vmatprep.mubr.bf16.mxu0 %v7444_v1  ;;  %7863 = vst [vmem:[#allocation31_spill] sm:$0xff] %v4980_v44 }
  0x67   :  { %471 = vmatprep.mubr.bf16.mxu1 %v7444_v1  ;;  %773 = vmatprep.subr.bf16.mxu0 %v4740_v46 }
  0x68   :  { %812 = vmatprep.subr.bf16.mxu1 %v4743_v47 }
  0x69   :  { %813 = vmatpush1.bf16.msra.mxu1 %v4745_v48 }
  0x6a   :  { %774 = vmatpush1.bf16.msra.mxu0 %v4749_v49  ;;  %814 = vmatprep.subr.bf16.mxu1 %v4751_v50 }
  0x6b   :  { %775 = vmatprep.subr.bf16.mxu0 %v4755_v51 }
  0x6d   :  { %389 = vmatmul.mubr.bf16.gmra.mrb[8].mxu0 %v3721_v52  ;;  %472 = vmatmul.mubr.bf16.gmra.mrb[8].mxu1 %v3721_v52  ;;  %v4985_v52 = vld [vmem:[%s7435_s4 + $0xc0] ss:$16 sps:$4 sm:$0xff]  }
  0x6e   :  { %776 = vmatpush1.bf16.msra.mxu0 %v4762_v53  ;;  %815 = vmatpush1.bf16.msra.mxu1 %v4764_v54  ;;  %7864 = vst [vmem:[#allocation32_spill] sm:$0xff] %v4985_v52 }
  0x6f   :  { %398 = vmatprep.mubr.bf16.mxu0 %v7444_v1  ;;  %481 = vmatprep.mubr.bf16.mxu1 %v7444_v1 }
  0x70   :  { %816 = vmatprep.subr.bf16.mxu1 %v4768_v55  ;;  %777 = vmatprep.subr.bf16.mxu0 %v4770_v56 }
  0x72   :  { %817 = vmatpush1.bf16.msra.mxu1 %v4773_v57  ;;  %778 = vmatpush1.bf16.msra.mxu0 %v4775_v58 }
  0x73   :  { %818 = vmatprep.subr.bf16.mxu1 %v4777_v59  ;;  %779 = vmatprep.subr.bf16.mxu0 %v4779_v60 }
  0x75   :  { %399 = vmatmul.mubr.bf16.gmra.mrb[12].mxu0 %v3732_v61  ;;  %482 = vmatmul.mubr.bf16.gmra.mrb[12].mxu1 %v3732_v61  ;;  %v4990_v61 = vld [vmem:[%s7435_s4 + $0xc8] ss:$16 sps:$4 sm:$0xff]  }
  0x76   :  { %819 = vmatpush1.bf16.msra.mxu1 %v4790_v62  ;;  %408 = vmatprep.mubr.bf16.mxu0 %v7444_v1  ;;  %7865 = vst [vmem:[#allocation33_spill] sm:$0xff] %v4990_v61 }
  0x77   :  { %491 = vmatprep.mubr.bf16.mxu1 %v7444_v1  ;;  %780 = vmatpush1.bf16.msra.mxu0 %v4792_v63 }
  0x78   :  { %820 = vmatprep.subr.bf16.mxu1 %v4796_v0  ;;  %781 = vmatprep.subr.bf16.mxu0 %v4798_v2 }
  0x7a   :  { %821 = vmatpush1.bf16.msra.mxu1 %v4802_v3 }
  0x7b   :  { %782 = vmatpush1.bf16.msra.mxu0 %v4804_v4  ;;  %822 = vmatprep.subr.bf16.mxu1 %v4806_v5 }
  0x7c   :  { %1263 = vmatprep.subr.bf16.mxu0 %v4831_v10 }
  0x7d   :  { %409 = vmatmul.mubr.bf16.gmra.mrb[16].mxu0 %v3745_v6  ;;  %492 = vmatmul.mubr.bf16.gmra.mrb[16].mxu1 %v3745_v6  ;;  %v4999_v6 = vld [vmem:[%s7435_s4 + $0xe4] ss:$16 sps:$4 sm:$0xff]  }
  0x7e   :  { %823 = vmatpush1.bf16.msra.mxu1 %v4817_v7  ;;  %799 = vmatprep.mubr.bf16.mxu0 %v7444_v1  ;;  %7866 = vst [vmem:[#allocation34_spill] sm:$0xff] %v4999_v6 }
  0x7f   :  { %840 = vmatprep.mubr.bf16.mxu1 %v7444_v1  ;;  %1304 = vmatprep.subr.bf16.mxu1 %v4836_v11  ;;  %v5014_v1 = vld [vmem:[%s7435_s4 + $0xe8] ss:$16 sps:$4 sm:$0xff]  }
  0x80   :  { %7869 = vst [vmem:[#allocation37_spill] sm:$0xff] %v5014_v1 }
  0x85   :  { %800 = vmatmul.mubr.bf16.vlgmr.msra.gmra.mrb[20].mxu0 %v574_v9  ;;  %841 = vmatmul.mubr.bf16.vlgmr.msra.gmra.mrb[20].mxu1 %v574_v9  ;;  %v5009_v9 = vld [vmem:[%s7435_s4 + $0xe0] ss:$16 sps:$4 sm:$0xff]  }
  0x86   :  { %1264 = vmatpush1.bf16.msra.mxu0 %v4841_v12  ;;  %1305 = vmatpush1.bf16.msra.mxu1 %v4846_v13  ;;  %7868 = vst [vmem:[#allocation36_spill] sm:$0xff] %v5009_v9 }
  0x87   :  { %1265 = vmatprep.subr.bf16.mxu0 %v4855_v14  ;;  %1306 = vmatprep.subr.bf16.mxu1 %v4860_v15 }
  0x8a   :  { %1266 = vmatpush1.bf16.msra.mxu0 %v4865_v16  ;;  %1307 = vmatpush1.bf16.msra.mxu1 %v4870_v17 }
  0x8b   :  { %1267 = vmatprep.subr.bf16.mxu0 %v4879_v18  ;;  %1308 = vmatprep.subr.bf16.mxu1 %v4884_v19 }
  0x8e   :  { %1268 = vmatpush1.bf16.msra.mxu0 %v4889_v20  ;;  %1309 = vmatpush1.bf16.msra.mxu1 %v4894_v21 }
  0x8f   :  { %1269 = vmatprep.subr.bf16.mxu0 %v4903_v22  ;;  %1310 = vmatprep.subr.bf16.mxu1 %v4908_v23 }
  0x92   :  { %1270 = vmatpush1.bf16.msra.mxu0 %v4913_v24  ;;  %1311 = vmatpush1.bf16.msra.mxu1 %v4918_v25 }
  0x93   :  { %1271 = vmatprep.subr.bf16.mxu0 %v4927_v26  ;;  %1312 = vmatprep.subr.bf16.mxu1 %v4932_v27 }
  0x96   :  { %1272 = vmatpush1.bf16.msra.mxu0 %v4937_v28  ;;  %1313 = vmatpush1.bf16.msra.mxu1 %v4942_v29 }
  0x97   :  { %1273 = vmatprep.subr.bf16.mxu0 %v4951_v30  ;;  %1314 = vmatprep.subr.bf16.mxu1 %v4956_v31 }
  0x9a   :  { %1274 = vmatpush1.bf16.msra.mxu0 %v4961_v32  ;;  %1315 = vmatpush1.bf16.msra.mxu1 %v4966_v33 }
  0x9b   :  { %1275 = vmatprep.subr.bf16.mxu0 %v4975_v36  ;;  %1316 = vmatprep.subr.bf16.mxu1 %v4980_v44  ;;  %v5153_v44 = vld [vmem:[%s7435_s4 + $0x1a0] ss:$16 sps:$4 sm:$0xff]   ;;  %v5158_v36 = vld [vmem:[%s7435_s4 + $0x1a8] ss:$16 sps:$4 sm:$0xff]  }
  0x9c   :  { %7892 = vst [vmem:[#allocation60_spill] sm:$0xff] %v5153_v44  ;;  %7893 = vst [vmem:[#allocation61_spill] sm:$0xff] %v5158_v36 }
  0x9e   :  { %1276 = vmatpush1.bf16.msra.mxu0 %v4985_v52  ;;  %1317 = vmatpush1.bf16.msra.mxu1 %v4990_v61  ;;  %v5023_v61 = vld [vmem:[%s7435_s4 + $0x104] ss:$16 sps:$4 sm:$0xff]   ;;  %v5028_v52 = vld [vmem:[%s7435_s4 + $0x10c] ss:$16 sps:$4 sm:$0xff]  }
  0x9f   :  { %1277 = vmatprep.subr.bf16.mxu0 %v4999_v6  ;;  %1318 = vmatprep.subr.bf16.mxu1 %v5004_v8  ;;  %7870 = vst [vmem:[#allocation38_spill] sm:$0xff] %v5023_v61  ;;  %7871 = vst [vmem:[#allocation39_spill] sm:$0xff] %v5028_v52  ;;  %v5033_v6 = vld [vmem:[%s7435_s4 + $0x100] ss:$16 sps:$4 sm:$0xff]   ;;  %v5052_v8 = vld [vmem:[%s7435_s4 + $0x12c] ss:$16 sps:$4 sm:$0xff]  }
  0xa0   :  { %7872 = vst [vmem:[#allocation40_spill] sm:$0xff] %v5033_v6  ;;  %7875 = vst [vmem:[#allocation43_spill] sm:$0xff] %v5052_v8 }
  0xa2   :  { %1278 = vmatpush1.bf16.msra.mxu0 %v5009_v9  ;;  %1319 = vmatpush1.bf16.msra.mxu1 %v5014_v1  ;;  %v5038_v9 = vld [vmem:[%s7435_s4 + $0x108] ss:$16 sps:$4 sm:$0xff]   ;;  %v5047_v1 = vld [vmem:[%s7435_s4 + $0x124] ss:$16 sps:$4 sm:$0xff]  }
  0xa3   :  { %7873 = vst [vmem:[#allocation41_spill] sm:$0xff] %v5038_v9  ;;  %1279 = vmatprep.subr.bf16.mxu0 %v5023_v61  ;;  %1320 = vmatprep.subr.bf16.mxu1 %v5028_v52  ;;  %7874 = vst [vmem:[#allocation42_spill] sm:$0xff] %v5047_v1  ;;  %v5057_v61 = vld [vmem:[%s7435_s4 + $0x120] ss:$16 sps:$4 sm:$0xff]   ;;  %v5076_v52 = vld [vmem:[%s7435_s4 + $0x14c] ss:$16 sps:$4 sm:$0xff]  }
  0xa4   :  { %7876 = vst [vmem:[#allocation44_spill] sm:$0xff] %v5057_v61  ;;  %7879 = vst [vmem:[#allocation47_spill] sm:$0xff] %v5076_v52 }
  0xa6   :  { %1280 = vmatpush1.bf16.msra.mxu0 %v5033_v6  ;;  %1321 = vmatpush1.bf16.msra.mxu1 %v5038_v9  ;;  %v5062_v6 = vld [vmem:[%s7435_s4 + $0x128] ss:$16 sps:$4 sm:$0xff]   ;;  %v5071_v9 = vld [vmem:[%s7435_s4 + $0x144] ss:$16 sps:$4 sm:$0xff]  }
  0xa7   :  { %7877 = vst [vmem:[#allocation45_spill] sm:$0xff] %v5062_v6  ;;  %1281 = vmatprep.subr.bf16.mxu0 %v5047_v1  ;;  %1322 = vmatprep.subr.bf16.mxu1 %v5052_v8  ;;  %7878 = vst [vmem:[#allocation46_spill] sm:$0xff] %v5071_v9  ;;  %v5081_v1 = vld [vmem:[%s7435_s4 + $0x140] ss:$16 sps:$4 sm:$0xff]   ;;  %v5100_v8 = vld [vmem:[%s7435_s4 + $0x16c] ss:$16 sps:$4 sm:$0xff]  }
  0xa8   :  { %7880 = vst [vmem:[#allocation48_spill] sm:$0xff] %v5081_v1  ;;  %7883 = vst [vmem:[#allocation51_spill] sm:$0xff] %v5100_v8 }
  0xaa   :  { %1282 = vmatpush1.bf16.msra.mxu0 %v5057_v61  ;;  %1323 = vmatpush1.bf16.msra.mxu1 %v5062_v6  ;;  %v5086_v61 = vld [vmem:[%s7435_s4 + $0x148] ss:$16 sps:$4 sm:$0xff]   ;;  %v5095_v6 = vld [vmem:[%s7435_s4 + $0x164] ss:$16 sps:$4 sm:$0xff]  }
  0xab   :  { %7881 = vst [vmem:[#allocation49_spill] sm:$0xff] %v5086_v61  ;;  %1283 = vmatprep.subr.bf16.mxu0 %v5071_v9  ;;  %1324 = vmatprep.subr.bf16.mxu1 %v5076_v52  ;;  %7882 = vst [vmem:[#allocation50_spill] sm:$0xff] %v5095_v6  ;;  %v5105_v9 = vld [vmem:[%s7435_s4 + $0x160] ss:$16 sps:$4 sm:$0xff]   ;;  %v5124_v52 = vld [vmem:[%s7435_s4 + $0x18c] ss:$16 sps:$4 sm:$0xff]  }
  0xac   :  { %7884 = vst [vmem:[#allocation52_spill] sm:$0xff] %v5105_v9  ;;  %7887 = vst [vmem:[#allocation55_spill] sm:$0xff] %v5124_v52 }
  0xae   :  { %1284 = vmatpush1.bf16.msra.mxu0 %v5081_v1  ;;  %1325 = vmatpush1.bf16.msra.mxu1 %v5086_v61  ;;  %v5110_v1 = vld [vmem:[%s7435_s4 + $0x168] ss:$16 sps:$4 sm:$0xff]   ;;  %v5119_v61 = vld [vmem:[%s7435_s4 + $0x184] ss:$16 sps:$4 sm:$0xff]  }
  0xaf   :  { %7885 = vst [vmem:[#allocation53_spill] sm:$0xff] %v5110_v1  ;;  %1285 = vmatprep.subr.bf16.mxu0 %v5095_v6  ;;  %1326 = vmatprep.subr.bf16.mxu1 %v5100_v8  ;;  %7886 = vst [vmem:[#allocation54_spill] sm:$0xff] %v5119_v61  ;;  %v5129_v6 = vld [vmem:[%s7435_s4 + $0x180] ss:$16 sps:$4 sm:$0xff]   ;;  %v5144_v8 = vld [vmem:[%s7435_s4 + $0x1ac] ss:$16 sps:$4 sm:$0xff]  }
  0xb0   :  { %7888 = vst [vmem:[#allocation56_spill] sm:$0xff] %v5129_v6  ;;  %7891 = vst [vmem:[#allocation59_spill] sm:$0xff] %v5144_v8 }
  0xb2   :  { %1286 = vmatpush1.bf16.msra.mxu0 %v5105_v9  ;;  %1327 = vmatpush1.bf16.msra.mxu1 %v5110_v1  ;;  %v5134_v9 = vld [vmem:[%s7435_s4 + $0x188] ss:$16 sps:$4 sm:$0xff]   ;;  %v5139_v1 = vld [vmem:[%s7435_s4 + $0x1a4] ss:$16 sps:$4 sm:$0xff]  }
  0xb3   :  { %7889 = vst [vmem:[#allocation57_spill] sm:$0xff] %v5134_v9  ;;  %7890 = vst [vmem:[#allocation58_spill] sm:$0xff] %v5139_v1  ;;  %1287 = vmatprep.subr.bf16.mxu0 %v5119_v61  ;;  %1328 = vmatprep.subr.bf16.mxu1 %v5124_v52 }
  0xb6   :  { %1288 = vmatpush1.bf16.msra.mxu0 %v5129_v6  ;;  %1329 = vmatpush1.bf16.msra.mxu1 %v5134_v9  ;;  %v5165_v6 = vld [vmem:[%s7435_s4 + $0x1c4] ss:$16 sps:$4 sm:$0xff]   ;;  %v5170_v9 = vld [vmem:[%s7435_s4 + $0x1cc] ss:$16 sps:$4 sm:$0xff]  }
  0xb7   :  { %1289 = vmatprep.subr.bf16.mxu0 %v5139_v1  ;;  %1330 = vmatprep.subr.bf16.mxu1 %v5144_v8  ;;  %7894 = vst [vmem:[#allocation62_spill] sm:$0xff] %v5165_v6  ;;  %7895 = vst [vmem:[#allocation63_spill] sm:$0xff] %v5170_v9  ;;  %v5177_v1 = vld [vmem:[%s7435_s4 + $0x1c0] ss:$16 sps:$4 sm:$0xff]   ;;  %v5182_v8 = vld [vmem:[%s7435_s4 + $0x1c8] ss:$16 sps:$4 sm:$0xff]  }
  0xb8   :  { %7896 = vst [vmem:[#allocation64_spill] sm:$0xff] %v5177_v1  ;;  %7897 = vst [vmem:[#allocation65_spill] sm:$0xff] %v5182_v8 }
  0xba   :  { %1290 = vmatpush1.bf16.msra.mxu0 %v5153_v44  ;;  %1331 = vmatpush1.bf16.msra.mxu1 %v5158_v36  ;;  %v5189_v44 = vld [vmem:[%s7435_s4 + $0x1e4] ss:$16 sps:$4 sm:$0xff]   ;;  %v5194_v36 = vld [vmem:[%s7435_s4 + $0x1ec] ss:$16 sps:$4 sm:$0xff]  }
  0xbb   :  { %1291 = vmatprep.subr.bf16.mxu0 %v5165_v6  ;;  %1332 = vmatprep.subr.bf16.mxu1 %v5170_v9  ;;  %7898 = vst [vmem:[#allocation66_spill] sm:$0xff] %v5189_v44  ;;  %7899 = vst [vmem:[#allocation67_spill] sm:$0xff] %v5194_v36  ;;  %v5201_v6 = vld [vmem:[%s7435_s4 + $0x1e0] ss:$16 sps:$4 sm:$0xff]   ;;  %v5206_v9 = vld [vmem:[%s7435_s4 + $0x1e8] ss:$16 sps:$4 sm:$0xff]  }
  0xbc   :  { %7900 = vst [vmem:[#allocation68_spill] sm:$0xff] %v5201_v6  ;;  %7901 = vst [vmem:[#allocation69_spill] sm:$0xff] %v5206_v9 }
  0xbe   :  { %1292 = vmatpush1.bf16.msra.mxu0 %v5177_v1  ;;  %1333 = vmatpush1.bf16.msra.mxu1 %v5182_v8  ;;  %v126_v8 = vlaneseq }
  0xbf   :  { %1293 = vmatprep.subr.bf16.mxu0 %v5189_v44  ;;  %1334 = vmatprep.subr.bf16.mxu1 %v5194_v36  ;;  %v124_v36 = vld [vmem:[%s7434_s3] sm:$0xf] }
  0xc0   :  { %v5214_v1 = vshrl.u32 %v126_v8, 7 }
  0xc2   :  { %1294 = vmatpush1.bf16.msra.mxu0 %v5201_v6  ;;  %1335 = vmatpush1.bf16.msra.mxu1 %v5206_v9  ;;  %7902 = vst [vmem:[#allocation70_spill] sm:$0xff] %v5214_v1  ;;  %v7532_v52 = vsub.s32 2, %v5214_v1  ;;  %v7541_v61 = vsub.s32 3, %v5214_v1  ;;  %v7544_v33 = vsub.s32 0, %v5214_v1  ;;  %v7551_v6 = vsub.s32 1, %v5214_v1 }
  0xc3   :  { %1374 = vmatprep.subr.bf16.mxu0 %v4704_v34  ;;  %1415 = vmatprep.subr.bf16.mxu1 %v4706_v35 }
  0xc4   :  { %v5225_v34 = vrot.slane %v124_v36, %v7532_v52  ;;  %v5233_v9 = vrot.slane %v124_v36, %v7541_v61  ;;  %v5237_v44 = vrot.slane %v124_v36, %v7544_v33  ;;  %v5245_v52 = vrot.slane %v124_v36, %v7551_v6 }
 0x130   :  { %v5227_v35 = vpop.f32.mrb[0].mxu0  ;;  %v5229_v8 = vpop.f32.mrb[0].mxu1 }
 0x131   :  { %v5239_v32 = vpop.f32.mrb[1].mxu0  ;;  %v5241_v31 = vpop.f32.mrb[1].mxu1 }
 0x132   :  { %v374_v30 = vpop.f32.mrb[2].mxu0  ;;  %v457_v29 = vpop.f32.mrb[2].mxu1 }
 0x133   :  { %v5248_v28 = vadd.f32 %v374_v30, %v5237_v44  ;;  %v376_v27 = vpop.f32.mrb[3].mxu0  ;;  %v5251_v61 = vadd.f32 %v457_v29, %v5225_v34  ;;  %v459_v26 = vpop.f32.mrb[3].mxu1 }
 0x134   :  { %v5254_v33 = vadd.f32 %v376_v27, %v5245_v52  ;;  %v5257_v25 = vadd.f32 %v459_v26, %v5233_v9 }
 0x135   :  { %7903 = vst [vmem:[#allocation71_spill] sm:$0xff] %v5248_v28  ;;  %7904 = vst [vmem:[#allocation72_spill] sm:$0xff] %v5251_v61 }
 0x136   :  { %7905 = vst [vmem:[#allocation73_spill] sm:$0xff] %v5254_v33  ;;  %7906 = vst [vmem:[#allocation74_spill] sm:$0xff] %v5257_v25 }
 0x138   :  { %v380_v24 = vpop.f32.mrb[4].mxu0  ;;  %v463_v1 = vpop.f32.mrb[4].mxu1 }
 0x139   :  { %v5260_v36 = vadd.f32 %v380_v24, %v5237_v44  ;;  %v382_v6 = vpop.f32.mrb[5].mxu0  ;;  %v5263_v30 = vadd.f32 %v463_v1, %v5225_v34  ;;  %v465_v28 = vpop.f32.mrb[5].mxu1 }
 0x13a   :  { %v5266_v29 = vadd.f32 %v382_v6, %v5245_v52  ;;  %v384_v61 = vpop.f32.mrb[6].mxu0  ;;  %v5269_v27 = vadd.f32 %v465_v28, %v5233_v9  ;;  %v467_v33 = vpop.f32.mrb[6].mxu1 }
 0x13b   :  { %7907 = vst [vmem:[#allocation75_spill] sm:$0xff] %v5260_v36  ;;  %7908 = vst [vmem:[#allocation76_spill] sm:$0xff] %v5263_v30  ;;  %v5272_v26 = vadd.f32 %v384_v61, %v5237_v44  ;;  %v386_v25 = vpop.f32.mrb[7].mxu0  ;;  %v5275_v24 = vadd.f32 %v467_v33, %v5225_v34  ;;  %v469_v36 = vpop.f32.mrb[7].mxu1 }
 0x13c   :  { %7909 = vst [vmem:[#allocation77_spill] sm:$0xff] %v5266_v29  ;;  %7910 = vst [vmem:[#allocation78_spill] sm:$0xff] %v5269_v27  ;;  %v5278_v1 = vadd.f32 %v386_v25, %v5245_v52  ;;  %v5281_v30 = vadd.f32 %v469_v36, %v5233_v9 }
 0x13d   :  { %7911 = vst [vmem:[#allocation79_spill] sm:$0xff] %v5272_v26  ;;  %7912 = vst [vmem:[#allocation80_spill] sm:$0xff] %v5275_v24 }
 0x13e   :  { %7913 = vst [vmem:[#allocation81_spill] sm:$0xff] %v5278_v1  ;;  %7914 = vst [vmem:[#allocation82_spill] sm:$0xff] %v5281_v30 }
 0x140   :  { %v390_v6 = vpop.f32.mrb[8].mxu0  ;;  %v473_v29 = vpop.f32.mrb[8].mxu1 }
 0x141   :  { %v5284_v28 = vadd.f32 %v390_v6, %v5237_v44  ;;  %v392_v27 = vpop.f32.mrb[9].mxu0  ;;  %v5287_v61 = vadd.f32 %v473_v29, %v5225_v34  ;;  %v475_v26 = vpop.f32.mrb[9].mxu1 }
 0x142   :  { %v5290_v33 = vadd.f32 %v392_v27, %v5245_v52  ;;  %v394_v24 = vpop.f32.mrb[10].mxu0  ;;  %v5293_v25 = vadd.f32 %v475_v26, %v5233_v9  ;;  %v477_v1 = vpop.f32.mrb[10].mxu1 }
 0x143   :  { %7915 = vst [vmem:[#allocation83_spill] sm:$0xff] %v5284_v28  ;;  %7916 = vst [vmem:[#allocation84_spill] sm:$0xff] %v5287_v61  ;;  %v5296_v36 = vadd.f32 %v394_v24, %v5237_v44  ;;  %v396_v30 = vpop.f32.mrb[11].mxu0  ;;  %v5299_v6 = vadd.f32 %v477_v1, %v5225_v34  ;;  %v479_v28 = vpop.f32.mrb[11].mxu1 }
 0x144   :  { %7917 = vst [vmem:[#allocation85_spill] sm:$0xff] %v5290_v33  ;;  %7918 = vst [vmem:[#allocation86_spill] sm:$0xff] %v5293_v25  ;;  %v5302_v29 = vadd.f32 %v396_v30, %v5245_v52  ;;  %v5305_v61 = vadd.f32 %v479_v28, %v5233_v9 }
 0x145   :  { %7919 = vst [vmem:[#allocation87_spill] sm:$0xff] %v5296_v36  ;;  %7920 = vst [vmem:[#allocation88_spill] sm:$0xff] %v5299_v6 }
 0x146   :  { %7921 = vst [vmem:[#allocation89_spill] sm:$0xff] %v5302_v29  ;;  %7922 = vst [vmem:[#allocation90_spill] sm:$0xff] %v5305_v61 }
 0x148   :  { %v400_v27 = vpop.f32.mrb[12].mxu0  ;;  %v483_v33 = vpop.f32.mrb[12].mxu1 }
 0x149   :  { %v5308_v26 = vadd.f32 %v400_v27, %v5237_v44  ;;  %v402_v25 = vpop.f32.mrb[13].mxu0  ;;  %v5311_v24 = vadd.f32 %v483_v33, %v5225_v34  ;;  %v485_v36 = vpop.f32.mrb[13].mxu1 }
 0x14a   :  { %v5314_v1 = vadd.f32 %v402_v25, %v5245_v52  ;;  %v404_v6 = vpop.f32.mrb[14].mxu0  ;;  %v5317_v30 = vadd.f32 %v485_v36, %v5233_v9  ;;  %v487_v29 = vpop.f32.mrb[14].mxu1 }
 0x14b   :  { %7923 = vst [vmem:[#allocation91_spill] sm:$0xff] %v5308_v26  ;;  %7924 = vst [vmem:[#allocation92_spill] sm:$0xff] %v5311_v24  ;;  %v5320_v28 = vadd.f32 %v404_v6, %v5237_v44  ;;  %v406_v61 = vpop.f32.mrb[15].mxu0  ;;  %v5323_v27 = vadd.f32 %v487_v29, %v5225_v34  ;;  %v489_v26 = vpop.f32.mrb[15].mxu1 }
 0x14c   :  { %7925 = vst [vmem:[#allocation93_spill] sm:$0xff] %v5314_v1  ;;  %7926 = vst [vmem:[#allocation94_spill] sm:$0xff] %v5317_v30  ;;  %v5326_v33 = vadd.f32 %v406_v61, %v5245_v52  ;;  %v5329_v24 = vadd.f32 %v489_v26, %v5233_v9 }
 0x14d   :  { %7927 = vst [vmem:[#allocation95_spill] sm:$0xff] %v5320_v28  ;;  %7928 = vst [vmem:[#allocation96_spill] sm:$0xff] %v5323_v27 }
 0x14e   :  { %7929 = vst [vmem:[#allocation97_spill] sm:$0xff] %v5326_v33  ;;  %7930 = vst [vmem:[#allocation98_spill] sm:$0xff] %v5329_v24 }
 0x150   :  { %v410_v25 = vpop.f32.mrb[16].mxu0  ;;  %v493_v1 = vpop.f32.mrb[16].mxu1 }
 0x151   :  { %v5332_v36 = vadd.f32 %v410_v25, %v5237_v44  ;;  %v412_v30 = vpop.f32.mrb[17].mxu0  ;;  %v5335_v6 = vadd.f32 %v493_v1, %v5225_v34  ;;  %v495_v28 = vpop.f32.mrb[17].mxu1 }
 0x152   :  { %v5338_v29 = vadd.f32 %v412_v30, %v5245_v52  ;;  %v414_v27 = vpop.f32.mrb[18].mxu0  ;;  %v5341_v61 = vadd.f32 %v495_v28, %v5233_v9  ;;  %v497_v33 = vpop.f32.mrb[18].mxu1  ;;  %v371_v30 = vadd.f32 %v5227_v35, %v5237_v44  ;;  %v454_v28 = vadd.f32 %v5229_v8, %v5225_v34 }
 0x153   :  { %7931 = vst [vmem:[#allocation99_spill] sm:$0xff] %v5332_v36  ;;  %7932 = vst [vmem:[#allocation100_spill] sm:$0xff] %v5335_v6  ;;  %v5344_v26 = vadd.f32 %v414_v27, %v5237_v44  ;;  %v416_v24 = vpop.f32.mrb[19].mxu0  ;;  %v5347_v25 = vadd.f32 %v497_v33, %v5225_v34  ;;  %v499_v36 = vpop.f32.mrb[19].mxu1  ;;  %v373_v27 = vadd.f32 %v5239_v32, %v5245_v52 }
 0x154   :  { %7933 = vst [vmem:[#allocation101_spill] sm:$0xff] %v5338_v29  ;;  %7934 = vst [vmem:[#allocation102_spill] sm:$0xff] %v5341_v61  ;;  %v5350_v1 = vadd.f32 %v416_v24, %v5245_v52  ;;  %v5353_v6 = vadd.f32 %v499_v36, %v5233_v9  ;;  %v456_v33 = vadd.f32 %v5241_v31, %v5233_v9 }
 0x155   :  { %7935 = vst [vmem:[#allocation103_spill] sm:$0xff] %v5344_v26  ;;  %7936 = vst [vmem:[#allocation104_spill] sm:$0xff] %v5347_v25 }
 0x156   :  { %7937 = vst [vmem:[#allocation105_spill] sm:$0xff] %v5350_v1  ;;  %7938 = vst [vmem:[#allocation106_spill] sm:$0xff] %v5353_v6 }
 0x158   :  { %v801_v25 = vpop.f32.mrb[20].mxu0  ;;  %v842_v26 = vpop.f32.mrb[20].mxu1 }
 0x159   :  { %v849_v61 = vadd.f32 %v801_v25, %v371_v30  ;;  %v851_v24 = vadd.f32 %v842_v26, %v454_v28  ;;  %v803_v1 = vpop.f32.mrb[21].mxu0  ;;  %v844_v29 = vpop.f32.mrb[21].mxu1  ;;  %v3483_v28 = vld [vmem:[%s7437_s6 + $0x8] sm:$0xff] }
 0x15a   :  { %v850_v36 = vadd.f32 %v803_v1, %v373_v27  ;;  %v852_v6 = vadd.f32 %v844_v29, %v456_v33  ;;  %v805_v23 = vpop.f32.mrb[22].mxu0  ;;  %v846_v22 = vpop.f32.mrb[22].mxu1 }
 0x15b   :  { %v3517_v44 = vmul.f32 -1.442695, %v849_v61  ;;  %v806_v35 = vpop.f32.mrb[23].mxu0  ;;  %v847_v21 = vpop.f32.mrb[23].mxu1  ;;  %v565_v22 = vld [vmem:[%s7438_s7] sm:$0xff] }
 0x15c   :  { %v3518_v34 = vmul.f32 -1.442695, %v850_v36  ;;  %v3519_v32 = vmul.f32 -1.442695, %v852_v6  ;;  %v7970_v35 = vld [vmem:[#allocation47_spill] sm:$0xff] }
 0x15d   :  { %3851 = vpow2.f32 %v3517_v44  ;;  %v7939_v44 = vmov 0  }
 0x15e   :  { %3853 = vpow2.f32 %v3518_v34  ;;  %v7971_v34 = vld [vmem:[#allocation48_spill] sm:$0xff] }
 0x15f   :  { %3855 = vpow2.f32 %v3519_v32  ;;  %v7972_v32 = vld [vmem:[#allocation49_spill] sm:$0xff] }
 0x160   :  { %3857 = vtanh.f32 %v851_v24  ;;  %v877_v24 = vpack.c.bf16 %v3483_v28, %v3483_v28  ;;  %v7986_v28 = vld [vmem:[#allocation63_spill] sm:$0xff] }
 0x167   :  { %v3852_v52 = vpop.eup %3851 }
 0x168   :  { %v3854_v8 = vpop.eup %3853  ;;  %v856_v31 = vadd.f32 1.0, %v3852_v52  ;;  %v7973_v52 = vld [vmem:[#allocation50_spill] sm:$0xff] }
 0x169   :  { %v862_v9 = vadd.f32 1.0, %v3854_v8  ;;  %v3856_v26 = vpop.eup %3855  ;;  %v7974_v8 = vld [vmem:[#allocation51_spill] sm:$0xff] }
 0x16a   :  { %3859 = vrcp.f32 %v856_v31  ;;  %v3858_v25 = vpop.eup %3857  ;;  %v869_v61 = vadd.f32 1.0, %v3856_v26  ;;  %v7975_v31 = vld [vmem:[#allocation52_spill] sm:$0xff]  ;;  %v7977_v26 = vld [vmem:[#allocation54_spill] sm:$0xff] }
 0x16b   :  { %3861 = vrcp.f32 %v862_v9  ;;  %v7976_v9 = vld [vmem:[#allocation53_spill] sm:$0xff] }
 0x16c   :  { %3863 = vrcp.f32 %v869_v61  ;;  %v7983_v61 = vld [vmem:[#allocation60_spill] sm:$0xff] }
 0x174   :  { %v3860_v23 = vpop.eup %3859 }
 0x175   :  { %v3862_v21 = vpop.eup %3861  ;;  %v873_v29 = vmul.f32 %v3860_v23, %v3858_v25  ;;  %v7978_v25 = vld [vmem:[#allocation55_spill] sm:$0xff]  ;;  %v7980_v23 = vld [vmem:[#allocation57_spill] sm:$0xff] }
 0x176   :  { %v872_v1 = vmul.f32 %v3862_v21, %v565_v22  ;;  %v3864_v30 = vpop.eup %3863  ;;  %v7979_v22 = vld [vmem:[#allocation56_spill] sm:$0xff]  ;;  %v7981_v21 = vld [vmem:[#allocation58_spill] sm:$0xff] }
 0x178   :  { %v5366_v6 = vadd.f32 %v873_v29, %v872_v1  ;;  %v7982_v29 = vld [vmem:[#allocation59_spill] sm:$0xff]  ;;  %v7984_v1 = vld [vmem:[#allocation61_spill] sm:$0xff] }
 0x17a   :  { %3865 = vtanh.f32 %v5366_v6 }
 0x184   :  { %v3866_v27 = vpop.eup %3865 }
 0x185   :  { %v876_v33 = vmul.f32 %v3866_v27, %v3864_v30  ;;  %v7985_v30 = vld [vmem:[#allocation62_spill] sm:$0xff]  ;;  %v7987_v27 = vld [vmem:[#allocation64_spill] sm:$0xff] }
 0x187   :  { %v878_v36 = vpack.c.bf16 %v876_v33, %v876_v33  ;;  %v7988_v33 = vld [vmem:[#allocation65_spill] sm:$0xff] }
 0x189   :  { %1295 = vmatprep.mubr.bf16.mxu0 %v878_v36  ;;  %1336 = vmatprep.mubr.bf16.mxu1 %v878_v36 }
 0x18a   :  { %1296 = vmatmul.mubr.bf16.vlgmr.msra.gmra.mrb[24].mxu0 %v877_v24  ;;  %1337 = vmatmul.mubr.bf16.vlgmr.msra.gmra.mrb[24].mxu1 %v877_v24  ;;  %v7989_v24 = vld [vmem:[#allocation66_spill] sm:$0xff] }
 0x18b   :  { %1375 = vmatpush1.bf16.msra.mxu0 %v4711_v37  ;;  %1416 = vmatpush1.bf16.msra.mxu1 %v4717_v39  ;;  %v7940_v37 = vld [vmem:[#allocation17_spill] sm:$0xff]  ;;  %v7942_v39 = vld [vmem:[#allocation19_spill] sm:$0xff] }
 0x18c   :  { %1376 = vmatprep.subr.bf16.mxu0 %v4714_v38  ;;  %1417 = vmatprep.subr.bf16.mxu1 %v4719_v40  ;;  %v7941_v38 = vld [vmem:[#allocation18_spill] sm:$0xff]  ;;  %v7943_v40 = vld [vmem:[#allocation20_spill] sm:$0xff] }
 0x18d   :  { %1406 = vmatprep.mubr.bf16.mxu0 %v7939_v44  ;;  %1447 = vmatprep.mubr.bf16.mxu1 %v7939_v44 }
 0x18f   :  { %1377 = vmatpush1.bf16.msra.mxu0 %v4722_v41  ;;  %1418 = vmatpush1.bf16.msra.mxu1 %v4730_v43  ;;  %v7944_v41 = vld [vmem:[#allocation21_spill] sm:$0xff]  ;;  %v7946_v43 = vld [vmem:[#allocation23_spill] sm:$0xff] }
 0x190   :  { %1378 = vmatprep.subr.bf16.mxu0 %v4727_v42  ;;  %1419 = vmatprep.subr.bf16.mxu1 %v4743_v47  ;;  %v7945_v42 = vld [vmem:[#allocation22_spill] sm:$0xff] }
 0x191   :  { %v7949_v47 = vld [vmem:[#allocation26_spill] sm:$0xff] }
 0x193   :  { %1379 = vmatpush1.bf16.msra.mxu0 %v4737_v45  ;;  %1420 = vmatpush1.bf16.msra.mxu1 %v4745_v48  ;;  %v7947_v45 = vld [vmem:[#allocation24_spill] sm:$0xff]  ;;  %v7950_v48 = vld [vmem:[#allocation27_spill] sm:$0xff] }
 0x194   :  { %1380 = vmatprep.subr.bf16.mxu0 %v4740_v46  ;;  %1421 = vmatprep.subr.bf16.mxu1 %v4751_v50  ;;  %v7948_v46 = vld [vmem:[#allocation25_spill] sm:$0xff] }
 0x195   :  { %v7952_v50 = vld [vmem:[#allocation29_spill] sm:$0xff] }
 0x197   :  { %1381 = vmatpush1.bf16.msra.mxu0 %v4749_v49  ;;  %1422 = vmatpush1.bf16.msra.mxu1 %v4764_v54  ;;  %v7951_v49 = vld [vmem:[#allocation28_spill] sm:$0xff] }
 0x198   :  { %1382 = vmatprep.subr.bf16.mxu0 %v4755_v51  ;;  %1423 = vmatprep.subr.bf16.mxu1 %v4768_v55  ;;  %v7953_v51 = vld [vmem:[#allocation30_spill] sm:$0xff]  ;;  %v7955_v54 = vld [vmem:[#allocation32_spill] sm:$0xff]  ;;  %v7956_v55 = vld [vmem:[#allocation33_spill] sm:$0xff] }
 0x19b   :  { %1383 = vmatpush1.bf16.msra.mxu0 %v4762_v53  ;;  %1424 = vmatpush1.bf16.msra.mxu1 %v4773_v57  ;;  %v7954_v53 = vld [vmem:[#allocation31_spill] sm:$0xff] }
 0x19c   :  { %1384 = vmatprep.subr.bf16.mxu0 %v4770_v56  ;;  %1425 = vmatprep.subr.bf16.mxu1 %v4777_v59  ;;  %v7957_v56 = vld [vmem:[#allocation34_spill] sm:$0xff]  ;;  %v7958_v57 = vld [vmem:[#allocation35_spill] sm:$0xff]  ;;  %v7960_v59 = vld [vmem:[#allocation37_spill] sm:$0xff] }
 0x19f   :  { %1385 = vmatpush1.bf16.msra.mxu0 %v4775_v58  ;;  %1426 = vmatpush1.bf16.msra.mxu1 %v4790_v62  ;;  %v7959_v58 = vld [vmem:[#allocation36_spill] sm:$0xff]  ;;  %v7962_v62 = vld [vmem:[#allocation39_spill] sm:$0xff] }
 0x1a0   :  { %1386 = vmatprep.subr.bf16.mxu0 %v4779_v60  ;;  %1427 = vmatprep.subr.bf16.mxu1 %v4796_v0  ;;  %v7961_v60 = vld [vmem:[#allocation38_spill] sm:$0xff]  ;;  %v7964_v0 = vld [vmem:[#allocation41_spill] sm:$0xff] }
 0x1a3   :  { %1387 = vmatpush1.bf16.msra.mxu0 %v4792_v63  ;;  %1428 = vmatpush1.bf16.msra.mxu1 %v4802_v3  ;;  %v7963_v63 = vld [vmem:[#allocation40_spill] sm:$0xff]  ;;  %v7966_v3 = vld [vmem:[#allocation43_spill] sm:$0xff] }
 0x1a4   :  { %1388 = vmatprep.subr.bf16.mxu0 %v4798_v2  ;;  %1429 = vmatprep.subr.bf16.mxu1 %v4806_v5  ;;  %v7965_v2 = vld [vmem:[#allocation42_spill] sm:$0xff]  ;;  %v7968_v5 = vld [vmem:[#allocation45_spill] sm:$0xff] }
 0x1a7   :  { %1389 = vmatpush1.bf16.msra.mxu0 %v4804_v4  ;;  %1430 = vmatpush1.bf16.msra.mxu1 %v4817_v7  ;;  %v7967_v4 = vld [vmem:[#allocation44_spill] sm:$0xff]  ;;  %v7969_v7 = vld [vmem:[#allocation46_spill] sm:$0xff] }
 0x1a8   :  { %1486 = vmatprep.subr.bf16.mxu0 %v4831_v10  ;;  %1527 = vmatprep.subr.bf16.mxu1 %v4836_v11 }
 0x1aa   :  { %1407 = vmatmul.mubr.bf16.vlgmr.msra.gmra.mrb[28].mxu0 %v878_v36  ;;  %1448 = vmatmul.mubr.bf16.vlgmr.msra.gmra.mrb[28].mxu1 %v878_v36  ;;  %v7990_v36 = vld [vmem:[#allocation67_spill] sm:$0xff] }
 0x1ab   :  { %1487 = vmatpush1.bf16.msra.mxu0 %v4841_v12  ;;  %1528 = vmatpush1.bf16.msra.mxu1 %v4846_v13 }
 0x1ac   :  { %1488 = vmatprep.subr.bf16.mxu0 %v4855_v14  ;;  %1529 = vmatprep.subr.bf16.mxu1 %v4860_v15 }
 0x1af   :  { %1489 = vmatpush1.bf16.msra.mxu0 %v4865_v16  ;;  %1530 = vmatpush1.bf16.msra.mxu1 %v4870_v17 }
 0x1b0   :  { %1490 = vmatprep.subr.bf16.mxu0 %v4879_v18  ;;  %1531 = vmatprep.subr.bf16.mxu1 %v4884_v19 }
 0x1b3   :  { %1491 = vmatpush1.bf16.msra.mxu0 %v4889_v20  ;;  %1532 = vmatpush1.bf16.msra.mxu1 %v7940_v37 }
 0x1b4   :  { %1492 = vmatprep.subr.bf16.mxu0 %v7941_v38  ;;  %1533 = vmatprep.subr.bf16.mxu1 %v7942_v39 }
 0x1b7   :  { %1493 = vmatpush1.bf16.msra.mxu0 %v7943_v40  ;;  %1534 = vmatpush1.bf16.msra.mxu1 %v7944_v41 }
 0x1b8   :  { %1494 = vmatprep.subr.bf16.mxu0 %v7945_v42  ;;  %1535 = vmatprep.subr.bf16.mxu1 %v7946_v43 }
 0x1bb   :  { %1495 = vmatpush1.bf16.msra.mxu0 %v7947_v45  ;;  %1536 = vmatpush1.bf16.msra.mxu1 %v7948_v46 }
 0x1bc   :  { %1496 = vmatprep.subr.bf16.mxu0 %v7949_v47  ;;  %1537 = vmatprep.subr.bf16.mxu1 %v7950_v48 }
 0x1bf   :  { %1497 = vmatpush1.bf16.msra.mxu0 %v7951_v49  ;;  %1538 = vmatpush1.bf16.msra.mxu1 %v7952_v50 }
 0x1c0   :  { %1498 = vmatprep.subr.bf16.mxu0 %v7953_v51  ;;  %1539 = vmatprep.subr.bf16.mxu1 %v7954_v53 }
 0x1c3   :  { %1499 = vmatpush1.bf16.msra.mxu0 %v7955_v54  ;;  %1540 = vmatpush1.bf16.msra.mxu1 %v7956_v55 }
 0x1c4   :  { %1500 = vmatprep.subr.bf16.mxu0 %v7957_v56  ;;  %1541 = vmatprep.subr.bf16.mxu1 %v7958_v57 }
 0x1c7   :  { %1501 = vmatpush1.bf16.msra.mxu0 %v7959_v58  ;;  %1542 = vmatpush1.bf16.msra.mxu1 %v7960_v59 }
 0x1c8   :  { %1502 = vmatprep.subr.bf16.mxu0 %v7961_v60  ;;  %1543 = vmatprep.subr.bf16.mxu1 %v7962_v62 }
 0x1cb   :  { %1503 = vmatpush1.bf16.msra.mxu0 %v7963_v63  ;;  %1544 = vmatpush1.bf16.msra.mxu1 %v7964_v0 }
 0x1cc   :  { %1504 = vmatprep.subr.bf16.mxu0 %v7965_v2  ;;  %1545 = vmatprep.subr.bf16.mxu1 %v7966_v3 }
 0x1cf   :  { %1505 = vmatpush1.bf16.msra.mxu0 %v7967_v4  ;;  %1546 = vmatpush1.bf16.msra.mxu1 %v7968_v5  ;;  %v8006_v5 = vld [vmem:[#allocation74_spill] sm:$0xff] }
 0x1d0   :  { %1506 = vmatprep.subr.bf16.mxu0 %v7969_v7  ;;  %1547 = vmatprep.subr.bf16.mxu1 %v7970_v35 }
 0x1d3   :  { %1507 = vmatpush1.bf16.msra.mxu0 %v7971_v34  ;;  %1548 = vmatpush1.bf16.msra.mxu1 %v7972_v32 }
 0x1d4   :  { %1508 = vmatprep.subr.bf16.mxu0 %v7973_v52  ;;  %1549 = vmatprep.subr.bf16.mxu1 %v7974_v8 }
 0x1d7   :  { %1509 = vmatpush1.bf16.msra.mxu0 %v7975_v31  ;;  %1550 = vmatpush1.bf16.msra.mxu1 %v7976_v9 }
 0x1d8   :  { %1510 = vmatprep.subr.bf16.mxu0 %v7977_v26  ;;  %1551 = vmatprep.subr.bf16.mxu1 %v7978_v25 }
 0x1db   :  { %1511 = vmatpush1.bf16.msra.mxu0 %v7979_v22  ;;  %1552 = vmatpush1.bf16.msra.mxu1 %v7980_v23  ;;  %v7991_v23 = vld [vmem:[#allocation68_spill] sm:$0xff] }
 0x1dc   :  { %1512 = vmatprep.subr.bf16.mxu0 %v7981_v21  ;;  %1553 = vmatprep.subr.bf16.mxu1 %v7982_v29  ;;  %v7992_v21 = vld [vmem:[#allocation69_spill] sm:$0xff] }
 0x1dd   :  { %v5468_v29 = vld [vmem:[#allocation7 + $0x4] ss:$16 sps:$4 sm:$0xff]  }
 0x1de   :  { %7993 = vst [vmem:[#allocation17_spill] sm:$0xff] %v5468_v29 }
 0x1df   :  { %1513 = vmatpush1.bf16.msra.mxu0 %v7983_v61  ;;  %1554 = vmatpush1.bf16.msra.mxu1 %v7984_v1  ;;  %v5471_v1 = vld [vmem:[#allocation7 + $0xc] ss:$16 sps:$4 sm:$0xff]  }
 0x1e0   :  { %1514 = vmatprep.subr.bf16.mxu0 %v7985_v30  ;;  %1555 = vmatprep.subr.bf16.mxu1 %v7986_v28  ;;  %7994 = vst [vmem:[#allocation18_spill] sm:$0xff] %v5471_v1 }
 0x1e3   :  { %1515 = vmatpush1.bf16.msra.mxu0 %v7987_v27  ;;  %1556 = vmatpush1.bf16.msra.mxu1 %v7988_v33  ;;  %v542_v33 = vld [vmem:[%s7436_s5] sm:$0xf]  ;;  %v7995_v27 = vld [vmem:[#allocation70_spill] sm:$0xff] }
 0x1e4   :  { %1516 = vmatprep.subr.bf16.mxu0 %v7989_v24  ;;  %1557 = vmatprep.subr.bf16.mxu1 %v7990_v36  ;;  %v7996_v24 = vsub.s32 0, %v7995_v27 }
 0x1e6   :  { %v5479_v28 = vrot.slane %v542_v33, %v7996_v24  ;;  %v8000_v24 = vsub.s32 2, %v7995_v27 }
 0x1e7   :  { %1517 = vmatpush1.bf16.msra.mxu0 %v7991_v23  ;;  %1558 = vmatpush1.bf16.msra.mxu1 %v7992_v21  ;;  %v7998_v23 = vsub.s32 1, %v7995_v27 }
 0x1e8   :  { %1597 = vmatprep.subr.bf16.mxu0 %v5468_v29  ;;  %1638 = vmatprep.subr.bf16.mxu1 %v5471_v1  ;;  %7997 = vst [vmem:[#allocation19_spill] sm:$0xff] %v5479_v28 }
 0x1e9   :  { %v5483_v36 = vrot.slane %v542_v33, %v7998_v23  ;;  %v5489_v23 = vrot.slane %v542_v33, %v8000_v24 }
 0x1eb   :  { %7999 = vst [vmem:[#allocation20_spill] sm:$0xff] %v5483_v36  ;;  %8001 = vst [vmem:[#allocation21_spill] sm:$0xff] %v5489_v23 }
 0x25d   :  { %v1297_v21 = vpop.f32.mrb[24].mxu0  ;;  %v1338_v30 = vpop.f32.mrb[24].mxu1 }
 0x25e   :  { %v1298_v29 = vadd.f32 %v1297_v21, %v5479_v28  ;;  %v1299_v61 = vpop.f32.mrb[25].mxu0  ;;  %v1340_v22 = vpop.f32.mrb[25].mxu1  ;;  %v1339_v32 = vadd.f32 %v1338_v30, %v5489_v23  ;;  %v8002_v30 = vsub.s32 3, %v7995_v27 }
 0x25f   :  { %v1300_v1 = vadd.f32 %v1299_v61, %v5483_v36  ;;  %v1301_v25 = vpop.f32.mrb[26].mxu0  ;;  %v1342_v26 = vpop.f32.mrb[26].mxu1  ;;  %v8005_v36 = vld [vmem:[#allocation73_spill] sm:$0xff] }
 0x260   :  { %v3584_v9 = vmul.f32 -1.442695, %v1298_v29  ;;  %v1302_v31 = vpop.f32.mrb[27].mxu0  ;;  %v1343_v8 = vpop.f32.mrb[27].mxu1 }
 0x261   :  { %v3585_v52 = vmul.f32 -1.442695, %v1300_v1  ;;  %v3484_v8 = vld [vmem:[%s7438_s7 + $0x8] sm:$0xff] }
 0x262   :  { %3867 = vpow2.f32 %v3584_v9 }
 0x263   :  { %3869 = vpow2.f32 %v3585_v52 }
 0x264   :  { %3871 = vtanh.f32 %v1339_v32  ;;  %v8003_v32 = vld [vmem:[#allocation71_spill] sm:$0xff] }
 0x26c   :  { %v3868_v34 = vpop.eup %3867 }
 0x26d   :  { %v3870_v21 = vpop.eup %3869  ;;  %v1348_v28 = vadd.f32 1.0, %v3868_v34  ;;  %v5499_v34 = vrot.slane %v542_v33, %v8002_v30 }
 0x26e   :  { %v1354_v35 = vadd.f32 1.0, %v3870_v21  ;;  %v3872_v26 = vpop.eup %3871 }
 0x26f   :  { %3873 = vrcp.f32 %v1348_v28  ;;  %v1341_v27 = vadd.f32 %v1340_v22, %v5499_v34 }
 0x270   :  { %3875 = vrcp.f32 %v1354_v35  ;;  %v8004_v35 = vld [vmem:[#allocation72_spill] sm:$0xff] }
 0x271   :  { %v3586_v33 = vmul.f32 -1.442695, %v1341_v27 }
 0x279   :  { %v3874_v31 = vpop.eup %3873 }
 0x27a   :  { %v3876_v52 = vpop.eup %3875  ;;  %v1365_v9 = vmul.f32 %v3874_v31, %v3872_v26 }
 0x27b   :  { %v1364_v25 = vmul.f32 %v3876_v52, %v3484_v8 }
 0x27d   :  { %v5495_v29 = vadd.f32 %v1365_v9, %v1364_v25  ;;  %v1408_v61 = vpop.f32.mrb[28].mxu0  ;;  %v1449_v1 = vpop.f32.mrb[28].mxu1 }
 0x27e   :  { %v1456_v28 = vadd.f32 %v1408_v61, %v8003_v32  ;;  %v1458_v24 = vadd.f32 %v1449_v1, %v8004_v35  ;;  %v1410_v21 = vpop.f32.mrb[29].mxu0  ;;  %v1451_v23 = vpop.f32.mrb[29].mxu1 }
 0x27f   :  { %v1457_v7 = vadd.f32 %v1410_v21, %v8005_v36  ;;  %v1459_v4 = vadd.f32 %v1451_v23, %v8006_v5  ;;  %v1412_v26 = vpop.f32.mrb[30].mxu0  ;;  %v1453_v8 = vpop.f32.mrb[30].mxu1 }
 0x280   :  { %v3587_v31 = vmul.f32 -1.442695, %v1456_v28  ;;  %v1413_v52 = vpop.f32.mrb[31].mxu0  ;;  %v1454_v9 = vpop.f32.mrb[31].mxu1 }
 0x281   :  { %v3588_v25 = vmul.f32 -1.442695, %v1457_v7  ;;  %v3589_v61 = vmul.f32 -1.442695, %v1459_v4 }
 0x282   :  { %3877 = vpow2.f32 %v3587_v31 }
 0x283   :  { %3879 = vpow2.f32 %v3588_v25 }
 0x284   :  { %3881 = vpow2.f32 %v3586_v33 }
 0x285   :  { %3883 = vpow2.f32 %v3589_v61 }
 0x286   :  { %3885 = vtanh.f32 %v1458_v24 }
 0x28c   :  { %v3878_v1 = vpop.eup %3877 }
 0x28d   :  { %v3880_v30 = vpop.eup %3879  ;;  %v1463_v32 = vadd.f32 1.0, %v3878_v1  ;;  %v5518_v1 = vld [vmem:[#allocation7 + $0x8] ss:$16 sps:$4 sm:$0xff]  }
 0x28e   :  { %v1469_v36 = vadd.f32 1.0, %v3880_v30  ;;  %v3882_v5 = vpop.eup %3881  ;;  %v5521_v30 = vld [vmem:[#allocation7 + $0x24] ss:$16 sps:$4 sm:$0xff]  }
 0x28f   :  { %3887 = vrcp.f32 %v1463_v32  ;;  %v3884_v23 = vpop.eup %3883  ;;  %v1361_v28 = vadd.f32 1.0, %v3882_v5  ;;  %v5524_v32 = vld [vmem:[#allocation7 + $0x2c] ss:$16 sps:$4 sm:$0xff]   ;;  %v5532_v5 = vld [vmem:[#allocation7 + $0x28] ss:$16 sps:$4 sm:$0xff]  }
 0x290   :  { %3889 = vrcp.f32 %v1469_v36  ;;  %v3886_v35 = vpop.eup %3885  ;;  %v1476_v26 = vadd.f32 1.0, %v3884_v23  ;;  %v5529_v36 = vld [vmem:[#allocation7 + $0x20] ss:$16 sps:$4 sm:$0xff]   ;;  %v5535_v23 = vld [vmem:[#allocation7 + $0x44] ss:$16 sps:$4 sm:$0xff]  }
 0x291   :  { %3891 = vrcp.f32 %v1361_v28  ;;  %v5538_v28 = vld [vmem:[#allocation7 + $0x4c] ss:$16 sps:$4 sm:$0xff]  }
 0x292   :  { %3893 = vtanh.f32 %v5495_v29 }
 0x293   :  { %3895 = vrcp.f32 %v1476_v26  ;;  %v5553_v26 = vld [vmem:[#allocation7 + $0x60] ss:$16 sps:$4 sm:$0xff]  }
 0x299   :  { %v3888_v7 = vpop.eup %3887 }
 0x29a   :  { %v3890_v21 = vpop.eup %3889  ;;  %v1480_v22 = vmul.f32 %v3888_v7, %v3886_v35  ;;  %v5541_v35 = vld [vmem:[#allocation7 + $0x40] ss:$16 sps:$4 sm:$0xff]   ;;  %v5544_v7 = vld [vmem:[#allocation7 + $0x48] ss:$16 sps:$4 sm:$0xff]  }
 0x29b   :  { %v1479_v4 = vmul.f32 %v3890_v21, %v5366_v6  ;;  %v3892_v24 = vpop.eup %3891  ;;  %v5515_v6 = vld [vmem:[#allocation7] ss:$16 sps:$4 sm:$0xff]   ;;  %v5547_v21 = vld [vmem:[#allocation7 + $0x64] ss:$16 sps:$4 sm:$0xff]  }
 0x29c   :  { %v3894_v31 = vpop.eup %3893 }
 0x29d   :  { %v5508_v8 = vadd.f32 %v1480_v22, %v1479_v4  ;;  %v3896_v52 = vpop.eup %3895  ;;  %v1368_v25 = vmul.f32 %v3894_v31, %v3892_v24  ;;  %v5550_v22 = vld [vmem:[#allocation7 + $0x6c] ss:$16 sps:$4 sm:$0xff]   ;;  %v5556_v4 = vld [vmem:[#allocation7 + $0x68] ss:$16 sps:$4 sm:$0xff]   ;;  %v5559_v24 = vld [vmem:[#allocation7 + $0x84] ss:$16 sps:$4 sm:$0xff]  }
 0x29e   :  { %v5562_v31 = vld [vmem:[#allocation7 + $0x8c] ss:$16 sps:$4 sm:$0xff]  }
 0x29f   :  { %3897 = vtanh.f32 %v5508_v8  ;;  %v1484_v61 = vpack.c.bf16 %v1368_v25, %v1368_v25  ;;  %8007 = vst [vmem:[#allocation22_spill] sm:$0xff] %v5562_v31  ;;  %v5571_v25 = vld [vmem:[#allocation7 + $0xa4] ss:$16 sps:$4 sm:$0xff]  }
 0x2a0   :  { %8010 = vst [vmem:[#allocation25_spill] sm:$0xff] %v5571_v25 }
 0x2a9   :  { %v3898_v9 = vpop.eup %3897 }
 0x2aa   :  { %v1483_v27 = vmul.f32 %v3898_v9, %v3896_v52  ;;  %v5565_v52 = vld [vmem:[#allocation7 + $0x80] ss:$16 sps:$4 sm:$0xff]   ;;  %v5568_v9 = vld [vmem:[#allocation7 + $0x88] ss:$16 sps:$4 sm:$0xff]  }
 0x2ab   :  { %8008 = vst [vmem:[#allocation23_spill] sm:$0xff] %v5565_v52  ;;  %8009 = vst [vmem:[#allocation24_spill] sm:$0xff] %v5568_v9 }
 0x2ac   :  { %v5511_v33 = vpack.c.bf16 %v1483_v27, %v1483_v27  ;;  %v5574_v27 = vld [vmem:[#allocation7 + $0xac] ss:$16 sps:$4 sm:$0xff]  }
 0x2ad   :  { %8011 = vst [vmem:[#allocation26_spill] sm:$0xff] %v5574_v27 }
 0x2ae   :  { %1518 = vmatprep.mubr.bf16.mxu0 %v5511_v33  ;;  %1559 = vmatprep.mubr.bf16.mxu1 %v5511_v33 }
 0x2af   :  { %1519 = vmatmul.mubr.bf16.vlgmr.msra.gmra.mrb[32].mxu0 %v1484_v61  ;;  %1560 = vmatmul.mubr.bf16.vlgmr.msra.gmra.mrb[32].mxu1 %v1484_v61  ;;  %v5577_v61 = vld [vmem:[#allocation7 + $0xa0] ss:$16 sps:$4 sm:$0xff]  }
 0x2b0   :  { %1598 = vmatpush1.bf16.msra.mxu0 %v5515_v6  ;;  %1639 = vmatpush1.bf16.msra.mxu1 %v5518_v1  ;;  %8012 = vst [vmem:[#allocation27_spill] sm:$0xff] %v5577_v61 }
 0x2b1   :  { %1599 = vmatprep.subr.bf16.mxu0 %v5521_v30  ;;  %1640 = vmatprep.subr.bf16.mxu1 %v5524_v32 }
 0x2b2   :  { %1629 = vmatprep.mubr.bf16.mxu0 %v7939_v44  ;;  %1670 = vmatprep.mubr.bf16.mxu1 %v7939_v44 }
 0x2b4   :  { %1600 = vmatpush1.bf16.msra.mxu0 %v5529_v36  ;;  %1641 = vmatpush1.bf16.msra.mxu1 %v5532_v5 }
 0x2b5   :  { %1601 = vmatprep.subr.bf16.mxu0 %v5535_v23  ;;  %1642 = vmatprep.subr.bf16.mxu1 %v5538_v28 }
 0x2b8   :  { %1602 = vmatpush1.bf16.msra.mxu0 %v5541_v35  ;;  %1643 = vmatpush1.bf16.msra.mxu1 %v5544_v7 }
 0x2b9   :  { %1603 = vmatprep.subr.bf16.mxu0 %v5547_v21  ;;  %1644 = vmatprep.subr.bf16.mxu1 %v5550_v22 }
 0x2bc   :  { %1604 = vmatpush1.bf16.msra.mxu0 %v5553_v26  ;;  %1645 = vmatpush1.bf16.msra.mxu1 %v5556_v4 }
 0x2bd   :  { %1605 = vmatprep.subr.bf16.mxu0 %v5559_v24  ;;  %1646 = vmatprep.subr.bf16.mxu1 %v5562_v31  ;;  %v5580_v31 = vld [vmem:[#allocation7 + $0xa8] ss:$16 sps:$4 sm:$0xff]  }
 0x2be   :  { %8013 = vst [vmem:[#allocation28_spill] sm:$0xff] %v5580_v31 }
 0x2c0   :  { %1606 = vmatpush1.bf16.msra.mxu0 %v5565_v52  ;;  %1647 = vmatpush1.bf16.msra.mxu1 %v5568_v9  ;;  %v5583_v52 = vld [vmem:[#allocation7 + $0xc4] ss:$16 sps:$4 sm:$0xff]   ;;  %v5586_v9 = vld [vmem:[#allocation7 + $0xcc] ss:$16 sps:$4 sm:$0xff]  }
 0x2c1   :  { %1607 = vmatprep.subr.bf16.mxu0 %v5571_v25  ;;  %1648 = vmatprep.subr.bf16.mxu1 %v5574_v27  ;;  %8014 = vst [vmem:[#allocation29_spill] sm:$0xff] %v5583_v52  ;;  %8015 = vst [vmem:[#allocation30_spill] sm:$0xff] %v5586_v9  ;;  %v5589_v25 = vld [vmem:[#allocation7 + $0xc0] ss:$16 sps:$4 sm:$0xff]   ;;  %v5592_v27 = vld [vmem:[#allocation7 + $0xc8] ss:$16 sps:$4 sm:$0xff]  }
 0x2c4   :  { %1608 = vmatpush1.bf16.msra.mxu0 %v5577_v61  ;;  %1649 = vmatpush1.bf16.msra.mxu1 %v5580_v31  ;;  %v5595_v61 = vld [vmem:[#allocation7 + $0xe4] ss:$16 sps:$4 sm:$0xff]   ;;  %v5598_v31 = vld [vmem:[#allocation7 + $0xec] ss:$16 sps:$4 sm:$0xff]  }
 0x2c5   :  { %1609 = vmatprep.subr.bf16.mxu0 %v5583_v52  ;;  %1650 = vmatprep.subr.bf16.mxu1 %v5586_v9  ;;  %v5601_v52 = vld [vmem:[#allocation7 + $0xe0] ss:$16 sps:$4 sm:$0xff]   ;;  %v5604_v9 = vld [vmem:[#allocation7 + $0xe8] ss:$16 sps:$4 sm:$0xff]  }
 0x2c8   :  { %1610 = vmatpush1.bf16.msra.mxu0 %v5589_v25  ;;  %1651 = vmatpush1.bf16.msra.mxu1 %v5592_v27 }
 0x2c9   :  { %1611 = vmatprep.subr.bf16.mxu0 %v5595_v61  ;;  %1652 = vmatprep.subr.bf16.mxu1 %v5598_v31 }
 0x2cc   :  { %1612 = vmatpush1.bf16.msra.mxu0 %v5601_v52  ;;  %1653 = vmatpush1.bf16.msra.mxu1 %v5604_v9 }
 0x2cd   :  { %1709 = vmatprep.subr.bf16.mxu0 %v4831_v10  ;;  %1750 = vmatprep.subr.bf16.mxu1 %v4836_v11  ;;  %v8016_v10 = vld [vmem:[#allocation44_spill] sm:$0xff]  ;;  %v8017_v11 = vld [vmem:[#allocation45_spill] sm:$0xff] }
 0x2cf   :  { %1630 = vmatmul.mubr.bf16.vlgmr.msra.gmra.mrb[36].mxu0 %v5511_v33  ;;  %1671 = vmatmul.mubr.bf16.vlgmr.msra.gmra.mrb[36].mxu1 %v5511_v33 }
 0x2d0   :  { %1710 = vmatpush1.bf16.msra.mxu0 %v4841_v12  ;;  %1751 = vmatpush1.bf16.msra.mxu1 %v4846_v13  ;;  %v8018_v12 = vld [vmem:[#allocation46_spill] sm:$0xff]  ;;  %v8019_v13 = vld [vmem:[#allocation47_spill] sm:$0xff] }
 0x2d1   :  { %1711 = vmatprep.subr.bf16.mxu0 %v4855_v14  ;;  %1752 = vmatprep.subr.bf16.mxu1 %v4860_v15  ;;  %v8020_v14 = vld [vmem:[#allocation48_spill] sm:$0xff]  ;;  %v8021_v15 = vld [vmem:[#allocation49_spill] sm:$0xff] }
 0x2d4   :  { %1712 = vmatpush1.bf16.msra.mxu0 %v4865_v16  ;;  %1753 = vmatpush1.bf16.msra.mxu1 %v4870_v17  ;;  %v8022_v16 = vld [vmem:[#allocation50_spill] sm:$0xff]  ;;  %v8023_v17 = vld [vmem:[#allocation51_spill] sm:$0xff] }
 0x2d5   :  { %1713 = vmatprep.subr.bf16.mxu0 %v4879_v18  ;;  %1754 = vmatprep.subr.bf16.mxu1 %v4884_v19  ;;  %v8024_v18 = vld [vmem:[#allocation52_spill] sm:$0xff]  ;;  %v8025_v19 = vld [vmem:[#allocation53_spill] sm:$0xff] }
 0x2d8   :  { %1714 = vmatpush1.bf16.msra.mxu0 %v4889_v20  ;;  %1755 = vmatpush1.bf16.msra.mxu1 %v7940_v37  ;;  %v8026_v20 = vld [vmem:[#allocation54_spill] sm:$0xff]  ;;  %v8027_v37 = vld [vmem:[#allocation55_spill] sm:$0xff] }
 0x2d9   :  { %1715 = vmatprep.subr.bf16.mxu0 %v7941_v38  ;;  %1756 = vmatprep.subr.bf16.mxu1 %v7942_v39  ;;  %v8028_v38 = vld [vmem:[#allocation56_spill] sm:$0xff]  ;;  %v8029_v39 = vld [vmem:[#allocation57_spill] sm:$0xff] }
 0x2dc   :  { %1716 = vmatpush1.bf16.msra.mxu0 %v7943_v40  ;;  %1757 = vmatpush1.bf16.msra.mxu1 %v7944_v41  ;;  %v8030_v40 = vld [vmem:[#allocation58_spill] sm:$0xff]  ;;  %v8031_v41 = vld [vmem:[#allocation59_spill] sm:$0xff] }
 0x2dd   :  { %1717 = vmatprep.subr.bf16.mxu0 %v7945_v42  ;;  %1758 = vmatprep.subr.bf16.mxu1 %v7946_v43  ;;  %v8032_v42 = vld [vmem:[#allocation60_spill] sm:$0xff]  ;;  %v8033_v43 = vld [vmem:[#allocation61_spill] sm:$0xff] }
 0x2e0   :  { %1718 = vmatpush1.bf16.msra.mxu0 %v7947_v45  ;;  %1759 = vmatpush1.bf16.msra.mxu1 %v7948_v46  ;;  %v8034_v45 = vld [vmem:[#allocation62_spill] sm:$0xff]  ;;  %v8035_v46 = vld [vmem:[#allocation63_spill] sm:$0xff] }
 0x2e1   :  { %1719 = vmatprep.subr.bf16.mxu0 %v7949_v47  ;;  %1760 = vmatprep.subr.bf16.mxu1 %v7950_v48  ;;  %v8036_v47 = vld [vmem:[#allocation64_spill] sm:$0xff]  ;;  %v8037_v48 = vld [vmem:[#allocation65_spill] sm:$0xff] }
 0x2e4   :  { %1720 = vmatpush1.bf16.msra.mxu0 %v7951_v49  ;;  %1761 = vmatpush1.bf16.msra.mxu1 %v7952_v50  ;;  %v8038_v49 = vld [vmem:[#allocation66_spill] sm:$0xff]  ;;  %v8039_v50 = vld [vmem:[#allocation67_spill] sm:$0xff] }
 0x2e5   :  { %1721 = vmatprep.subr.bf16.mxu0 %v7953_v51  ;;  %1762 = vmatprep.subr.bf16.mxu1 %v7954_v53  ;;  %v8040_v51 = vld [vmem:[#allocation68_spill] sm:$0xff]  ;;  %v8041_v53 = vld [vmem:[#allocation69_spill] sm:$0xff] }
 0x2e8   :  { %1722 = vmatpush1.bf16.msra.mxu0 %v7955_v54  ;;  %1763 = vmatpush1.bf16.msra.mxu1 %v7956_v55  ;;  %v8042_v54 = vld [vmem:[#allocation17_spill] sm:$0xff]  ;;  %v8043_v55 = vld [vmem:[#allocation18_spill] sm:$0xff] }
 0x2e9   :  { %1723 = vmatprep.subr.bf16.mxu0 %v7957_v56  ;;  %1764 = vmatprep.subr.bf16.mxu1 %v7958_v57 }
 0x2ec   :  { %1724 = vmatpush1.bf16.msra.mxu0 %v7959_v58  ;;  %1765 = vmatpush1.bf16.msra.mxu1 %v7960_v59  ;;  %v8044_v58 = vld [vmem:[#allocation19_spill] sm:$0xff] }
 0x2ed   :  { %1725 = vmatprep.subr.bf16.mxu0 %v7961_v60  ;;  %1766 = vmatprep.subr.bf16.mxu1 %v7962_v62 }
 0x2f0   :  { %1726 = vmatpush1.bf16.msra.mxu0 %v7963_v63  ;;  %1767 = vmatpush1.bf16.msra.mxu1 %v7964_v0  ;;  %v8045_v63 = vld [vmem:[#allocation20_spill] sm:$0xff] }
 0x2f1   :  { %1727 = vmatprep.subr.bf16.mxu0 %v7965_v2  ;;  %1768 = vmatprep.subr.bf16.mxu1 %v7966_v3 }
 0x2f4   :  { %1728 = vmatpush1.bf16.msra.mxu0 %v8016_v10  ;;  %1769 = vmatpush1.bf16.msra.mxu1 %v8017_v11 }
 0x2f5   :  { %1729 = vmatprep.subr.bf16.mxu0 %v8018_v12  ;;  %1770 = vmatprep.subr.bf16.mxu1 %v8019_v13  ;;  %v8046_v13 = vld [vmem:[#allocation21_spill] sm:$0xff] }
 0x2f8   :  { %1730 = vmatpush1.bf16.msra.mxu0 %v8020_v14  ;;  %1771 = vmatpush1.bf16.msra.mxu1 %v8021_v15 }
 0x2f9   :  { %1731 = vmatprep.subr.bf16.mxu0 %v8022_v16  ;;  %1772 = vmatprep.subr.bf16.mxu1 %v8023_v17 }
 0x2fc   :  { %1732 = vmatpush1.bf16.msra.mxu0 %v8024_v18  ;;  %1773 = vmatpush1.bf16.msra.mxu1 %v8025_v19 }
 0x2fd   :  { %1733 = vmatprep.subr.bf16.mxu0 %v8026_v20  ;;  %1774 = vmatprep.subr.bf16.mxu1 %v8027_v37 }
 0x300   :  { %1734 = vmatpush1.bf16.msra.mxu0 %v8028_v38  ;;  %1775 = vmatpush1.bf16.msra.mxu1 %v8029_v39 }
 0x301   :  { %1735 = vmatprep.subr.bf16.mxu0 %v8030_v40  ;;  %1776 = vmatprep.subr.bf16.mxu1 %v8031_v41 }
 0x304   :  { %1736 = vmatpush1.bf16.msra.mxu0 %v8032_v42  ;;  %1777 = vmatpush1.bf16.msra.mxu1 %v8033_v43  ;;  %v8047_v43 = vld [vmem:[#allocation75_spill] sm:$0xff] }
 0x305   :  { %1737 = vmatprep.subr.bf16.mxu0 %v8034_v45  ;;  %1778 = vmatprep.subr.bf16.mxu1 %v8035_v46  ;;  %v8048_v46 = vld [vmem:[#allocation76_spill] sm:$0xff] }
 0x308   :  { %1738 = vmatpush1.bf16.msra.mxu0 %v8036_v47  ;;  %1779 = vmatpush1.bf16.msra.mxu1 %v8037_v48 }
 0x309   :  { %1739 = vmatprep.subr.bf16.mxu0 %v8038_v49  ;;  %1780 = vmatprep.subr.bf16.mxu1 %v8039_v50  ;;  %v8049_v50 = vld [vmem:[#allocation77_spill] sm:$0xff] }
 0x30c   :  { %1740 = vmatpush1.bf16.msra.mxu0 %v8040_v51  ;;  %1781 = vmatpush1.bf16.msra.mxu1 %v8041_v53  ;;  %v8050_v53 = vld [vmem:[#allocation78_spill] sm:$0xff] }
 0x30d   :  { %1820 = vmatprep.subr.bf16.mxu0 %v8042_v54  ;;  %1861 = vmatprep.subr.bf16.mxu1 %v8043_v55 }
 0x382   :  { %v1520_v56 = vpop.f32.mrb[32].mxu0  ;;  %v1561_v57 = vpop.f32.mrb[32].mxu1 }
 0x383   :  { %v1521_v59 = vadd.f32 %v1520_v56, %v8044_v58  ;;  %v1522_v60 = vpop.f32.mrb[33].mxu0  ;;  %v1563_v62 = vpop.f32.mrb[33].mxu1  ;;  %v1562_v14 = vadd.f32 %v1561_v57, %v8046_v13 }
 0x384   :  { %v1523_v0 = vadd.f32 %v1522_v60, %v8045_v63  ;;  %v1524_v2 = vpop.f32.mrb[34].mxu0  ;;  %v1565_v3 = vpop.f32.mrb[34].mxu1 }
 0x385   :  { %v3590_v33 = vmul.f32 -1.442695, %v1521_v59  ;;  %v1525_v10 = vpop.f32.mrb[35].mxu0  ;;  %v1566_v11 = vpop.f32.mrb[35].mxu1  ;;  %v1564_v3 = vadd.f32 %v1563_v62, %v5499_v34 }
 0x386   :  { %v3591_v12 = vmul.f32 -1.442695, %v1523_v0 }
 0x387   :  { %3899 = vpow2.f32 %v3590_v33  ;;  %v3592_v33 = vmul.f32 -1.442695, %v1564_v3  ;;  %v5732_v3 = vld [vmem:[%s7435_s4 + $0xc] ss:$16 sps:$4 sm:$0xff]  }
 0x388   :  { %3901 = vpow2.f32 %v3591_v12 }
 0x389   :  { %3903 = vtanh.f32 %v1562_v14 }
 0x391   :  { %v3900_v15 = vpop.eup %3899 }
 0x392   :  { %v3902_v16 = vpop.eup %3901  ;;  %v1571_v17 = vadd.f32 1.0, %v3900_v15 }
 0x393   :  { %v1577_v18 = vadd.f32 1.0, %v3902_v16  ;;  %v3904_v19 = vpop.eup %3903 }
 0x394   :  { %3905 = vrcp.f32 %v1571_v17 }
 0x395   :  { %3907 = vrcp.f32 %v1577_v18 }
 0x39e   :  { %v3906_v20 = vpop.eup %3905 }
 0x39f   :  { %v3908_v37 = vpop.eup %3907  ;;  %v1588_v38 = vmul.f32 %v3906_v20, %v3904_v19 }
 0x3a0   :  { %v1587_v39 = vmul.f32 %v3908_v37, %v5495_v29 }
 0x3a2   :  { %v5679_v40 = vadd.f32 %v1588_v38, %v1587_v39  ;;  %v1631_v41 = vpop.f32.mrb[36].mxu0  ;;  %v1672_v42 = vpop.f32.mrb[36].mxu1 }
 0x3a3   :  { %v1679_v45 = vadd.f32 %v1631_v41, %v8047_v43  ;;  %v1681_v47 = vadd.f32 %v1672_v42, %v8048_v46  ;;  %v1633_v48 = vpop.f32.mrb[37].mxu0  ;;  %v1674_v49 = vpop.f32.mrb[37].mxu1 }
 0x3a4   :  { %v1680_v51 = vadd.f32 %v1633_v48, %v8049_v50  ;;  %v1682_v56 = vadd.f32 %v1674_v49, %v8050_v53  ;;  %v1635_v57 = vpop.f32.mrb[38].mxu0  ;;  %v1676_v59 = vpop.f32.mrb[38].mxu1  ;;  %v8053_v53 = vld [vmem:[#allocation24_spill] sm:$0xff] }
 0x3a5   :  { %v3593_v60 = vmul.f32 -1.442695, %v1679_v45  ;;  %v1636_v0 = vpop.f32.mrb[39].mxu0  ;;  %v1677_v2 = vpop.f32.mrb[39].mxu1  ;;  %v8055_v57 = vld [vmem:[#allocation26_spill] sm:$0xff]  ;;  %v8056_v59 = vld [vmem:[#allocation27_spill] sm:$0xff] }
 0x3a6   :  { %v3594_v29 = vmul.f32 -1.442695, %v1680_v51  ;;  %v3595_v10 = vmul.f32 -1.442695, %v1682_v56  ;;  %v8052_v51 = vld [vmem:[#allocation23_spill] sm:$0xff]  ;;  %v8054_v56 = vld [vmem:[#allocation25_spill] sm:$0xff] }
 0x3a7   :  { %3909 = vpow2.f32 %v3593_v60  ;;  %v8057_v60 = vld [vmem:[#allocation28_spill] sm:$0xff]  ;;  %v8058_v0 = vld [vmem:[#allocation29_spill] sm:$0xff]  ;;  %v8059_v2 = vld [vmem:[#allocation30_spill] sm:$0xff] }
 0x3a8   :  { %3911 = vpow2.f32 %v3594_v29  ;;  %v5726_v29 = vld [vmem:[%s7435_s4 + $0x4] ss:$16 sps:$4 sm:$0xff]  }
 0x3a9   :  { %3913 = vpow2.f32 %v3592_v33  ;;  %v5738_v33 = vld [vmem:[%s7435_s4] ss:$16 sps:$4 sm:$0xff]  }
 0x3aa   :  { %3915 = vpow2.f32 %v3595_v10  ;;  %v5744_v10 = vld [vmem:[%s7435_s4 + $0x8] ss:$16 sps:$4 sm:$0xff]  }
 0x3ab   :  { %3917 = vtanh.f32 %v1681_v47 }
 0x3b1   :  { %v3910_v11 = vpop.eup %3909 }
 0x3b2   :  { %v3912_v12 = vpop.eup %3911  ;;  %v1686_v14 = vadd.f32 1.0, %v3910_v11  ;;  %v5750_v11 = vld [vmem:[%s7435_s4 + $0x24] ss:$16 sps:$4 sm:$0xff]  }
 0x3b3   :  { %v1692_v15 = vadd.f32 1.0, %v3912_v12  ;;  %v3914_v16 = vpop.eup %3913  ;;  %v5756_v12 = vld [vmem:[%s7435_s4 + $0x2c] ss:$16 sps:$4 sm:$0xff]  }
 0x3b4   :  { %3919 = vrcp.f32 %v1686_v14  ;;  %v3916_v17 = vpop.eup %3915  ;;  %v1584_v20 = vadd.f32 1.0, %v3914_v16  ;;  %v5762_v14 = vld [vmem:[%s7435_s4 + $0x20] ss:$16 sps:$4 sm:$0xff]   ;;  %v5774_v16 = vld [vmem:[%s7435_s4 + $0x44] ss:$16 sps:$4 sm:$0xff]  }
 0x3b5   :  { %3921 = vrcp.f32 %v1692_v15  ;;  %v3918_v18 = vpop.eup %3917  ;;  %v1699_v39 = vadd.f32 1.0, %v3916_v17  ;;  %v5768_v15 = vld [vmem:[%s7435_s4 + $0x28] ss:$16 sps:$4 sm:$0xff]   ;;  %8060 = vst [vmem:[#allocation31_spill] sm:$0xff] %v5774_v16  ;;  %v5780_v17 = vld [vmem:[%s7435_s4 + $0x4c] ss:$16 sps:$4 sm:$0xff]  }
 0x3b6   :  { %3923 = vtanh.f32 %v5679_v40  ;;  %8061 = vst [vmem:[#allocation32_spill] sm:$0xff] %v5780_v17 }
 0x3b7   :  { %3925 = vrcp.f32 %v1584_v20  ;;  %v5798_v20 = vld [vmem:[%s7435_s4 + $0x64] ss:$16 sps:$4 sm:$0xff]  }
 0x3b8   :  { %3927 = vrcp.f32 %v1699_v39  ;;  %8064 = vst [vmem:[#allocation35_spill] sm:$0xff] %v5798_v20  ;;  %v5816_v39 = vld [vmem:[%s7435_s4 + $0x68] ss:$16 sps:$4 sm:$0xff]  }
 0x3b9   :  { %8067 = vst [vmem:[#allocation38_spill] sm:$0xff] %v5816_v39 }
 0x3be   :  { %v3920_v19 = vpop.eup %3919 }
 0x3bf   :  { %v3922_v37 = vpop.eup %3921  ;;  %v1703_v38 = vmul.f32 %v3920_v19, %v3918_v18  ;;  %v5786_v18 = vld [vmem:[%s7435_s4 + $0x40] ss:$16 sps:$4 sm:$0xff]   ;;  %v5792_v19 = vld [vmem:[%s7435_s4 + $0x48] ss:$16 sps:$4 sm:$0xff]  }
 0x3c0   :  { %v1702_v62 = vmul.f32 %v3922_v37, %v5508_v8  ;;  %v3924_v42 = vpop.eup %3923  ;;  %v8051_v8 = vld [vmem:[#allocation22_spill] sm:$0xff]  ;;  %8062 = vst [vmem:[#allocation33_spill] sm:$0xff] %v5786_v18  ;;  %8063 = vst [vmem:[#allocation34_spill] sm:$0xff] %v5792_v19 }
 0x3c1   :  { %v3926_v43 = vpop.eup %3925  ;;  %v5804_v37 = vld [vmem:[%s7435_s4 + $0x6c] ss:$16 sps:$4 sm:$0xff]  }
 0x3c2   :  { %v5688_v41 = vadd.f32 %v1703_v38, %v1702_v62  ;;  %v3928_v45 = vpop.eup %3927  ;;  %v1591_v47 = vmul.f32 %v3926_v43, %v3924_v42  ;;  %8065 = vst [vmem:[#allocation36_spill] sm:$0xff] %v5804_v37  ;;  %v5810_v38 = vld [vmem:[%s7435_s4 + $0x60] ss:$16 sps:$4 sm:$0xff]   ;;  %v5822_v62 = vld [vmem:[%s7435_s4 + $0x84] ss:$16 sps:$4 sm:$0xff]  }
 0x3c3   :  { %8066 = vst [vmem:[#allocation37_spill] sm:$0xff] %v5810_v38  ;;  %8068 = vst [vmem:[#allocation39_spill] sm:$0xff] %v5822_v62  ;;  %v5828_v42 = vld [vmem:[%s7435_s4 + $0x8c] ss:$16 sps:$4 sm:$0xff]   ;;  %v5834_v43 = vld [vmem:[%s7435_s4 + $0x80] ss:$16 sps:$4 sm:$0xff]  }
 0x3c4   :  { %3929 = vtanh.f32 %v5688_v41  ;;  %v1707_v50 = vpack.c.bf16 %v1591_v47, %v1591_v47  ;;  %8069 = vst [vmem:[#allocation40_spill] sm:$0xff] %v5828_v42  ;;  %8070 = vst [vmem:[#allocation41_spill] sm:$0xff] %v5834_v43  ;;  %v5852_v47 = vld [vmem:[%s7435_s4 + $0xac] ss:$16 sps:$4 sm:$0xff]  }
 0x3c5   :  { %8073 = vst [vmem:[#allocation70_spill] sm:$0xff] %v5852_v47 }
 0x3ce   :  { %v3930_v46 = vpop.eup %3929 }
 0x3cf   :  { %v1706_v48 = vmul.f32 %v3930_v46, %v3928_v45  ;;  %v5840_v45 = vld [vmem:[%s7435_s4 + $0x88] ss:$16 sps:$4 sm:$0xff]   ;;  %v5846_v46 = vld [vmem:[%s7435_s4 + $0xa4] ss:$16 sps:$4 sm:$0xff]  }
 0x3d0   :  { %8071 = vst [vmem:[#allocation42_spill] sm:$0xff] %v5840_v45  ;;  %8072 = vst [vmem:[#allocation43_spill] sm:$0xff] %v5846_v46 }
 0x3d1   :  { %v1708_v49 = vpack.c.bf16 %v1706_v48, %v1706_v48  ;;  %v5858_v48 = vld [vmem:[%s7435_s4 + $0xa0] ss:$16 sps:$4 sm:$0xff]  }
 0x3d2   :  { %8074 = vst [vmem:[#allocation71_spill] sm:$0xff] %v5858_v48 }
 0x3d3   :  { %1741 = vmatprep.mubr.bf16.mxu0 %v1708_v49  ;;  %1782 = vmatprep.mubr.bf16.mxu1 %v1708_v49 }
 0x3d4   :  { %1742 = vmatmul.mubr.bf16.vlgmr.msra.gmra.mrb[40].mxu0 %v1707_v50  ;;  %1783 = vmatmul.mubr.bf16.vlgmr.msra.gmra.mrb[40].mxu1 %v1707_v50  ;;  %v5870_v50 = vld [vmem:[%s7435_s4 + $0xc4] ss:$16 sps:$4 sm:$0xff]  }
 0x3d5   :  { %1821 = vmatpush1.bf16.msra.mxu0 %v5515_v6  ;;  %1862 = vmatpush1.bf16.msra.mxu1 %v5518_v1  ;;  %8076 = vst [vmem:[#allocation73_spill] sm:$0xff] %v5870_v50 }
 0x3d6   :  { %1822 = vmatprep.subr.bf16.mxu0 %v5521_v30  ;;  %1863 = vmatprep.subr.bf16.mxu1 %v5524_v32 }
 0x3d7   :  { %1852 = vmatprep.mubr.bf16.mxu0 %v7939_v44  ;;  %1893 = vmatprep.mubr.bf16.mxu1 %v7939_v44 }
 0x3d9   :  { %1823 = vmatpush1.bf16.msra.mxu0 %v5529_v36  ;;  %1864 = vmatpush1.bf16.msra.mxu1 %v5532_v5 }
 0x3da   :  { %1824 = vmatprep.subr.bf16.mxu0 %v5535_v23  ;;  %1865 = vmatprep.subr.bf16.mxu1 %v5538_v28 }
 0x3dd   :  { %1825 = vmatpush1.bf16.msra.mxu0 %v5541_v35  ;;  %1866 = vmatpush1.bf16.msra.mxu1 %v5544_v7 }
 0x3de   :  { %1826 = vmatprep.subr.bf16.mxu0 %v5547_v21  ;;  %1867 = vmatprep.subr.bf16.mxu1 %v5550_v22 }
 0x3e1   :  { %1827 = vmatpush1.bf16.msra.mxu0 %v5553_v26  ;;  %1868 = vmatpush1.bf16.msra.mxu1 %v5556_v4 }
 0x3e2   :  { %1828 = vmatprep.subr.bf16.mxu0 %v5559_v24  ;;  %1869 = vmatprep.subr.bf16.mxu1 %v8051_v8 }
 0x3e5   :  { %1829 = vmatpush1.bf16.msra.mxu0 %v8052_v51  ;;  %1870 = vmatpush1.bf16.msra.mxu1 %v8053_v53 }
 0x3e6   :  { %1830 = vmatprep.subr.bf16.mxu0 %v8054_v56  ;;  %1871 = vmatprep.subr.bf16.mxu1 %v8055_v57 }
 0x3e9   :  { %1831 = vmatpush1.bf16.msra.mxu0 %v8056_v59  ;;  %1872 = vmatpush1.bf16.msra.mxu1 %v8057_v60 }
 0x3ea   :  { %1832 = vmatprep.subr.bf16.mxu0 %v8058_v0  ;;  %1873 = vmatprep.subr.bf16.mxu1 %v8059_v2 }
 0x3ed   :  { %1833 = vmatpush1.bf16.msra.mxu0 %v5589_v25  ;;  %1874 = vmatpush1.bf16.msra.mxu1 %v5592_v27 }
 0x3ee   :  { %1834 = vmatprep.subr.bf16.mxu0 %v5595_v61  ;;  %1875 = vmatprep.subr.bf16.mxu1 %v5598_v31 }
 0x3f1   :  { %1835 = vmatpush1.bf16.msra.mxu0 %v5601_v52  ;;  %1876 = vmatpush1.bf16.msra.mxu1 %v5604_v9 }
 0x3f2   :  { %1932 = vmatprep.subr.bf16.mxu0 %v5726_v29  ;;  %1973 = vmatprep.subr.bf16.mxu1 %v5732_v3 }
 0x3f4   :  { %1853 = vmatmul.mubr.bf16.vlgmr.msra.gmra.mrb[44].mxu0 %v1708_v49  ;;  %1894 = vmatmul.mubr.bf16.vlgmr.msra.gmra.mrb[44].mxu1 %v1708_v49  ;;  %v5864_v49 = vld [vmem:[%s7435_s4 + $0xa8] ss:$16 sps:$4 sm:$0xff]  }
 0x3f5   :  { %1933 = vmatpush1.bf16.msra.mxu0 %v5738_v33  ;;  %1974 = vmatpush1.bf16.msra.mxu1 %v5744_v10  ;;  %8075 = vst [vmem:[#allocation72_spill] sm:$0xff] %v5864_v49 }
 0x3f6   :  { %1934 = vmatprep.subr.bf16.mxu0 %v5750_v11  ;;  %1975 = vmatprep.subr.bf16.mxu1 %v5756_v12 }
 0x3f9   :  { %1935 = vmatpush1.bf16.msra.mxu0 %v5762_v14  ;;  %1976 = vmatpush1.bf16.msra.mxu1 %v5768_v15 }
 0x3fa   :  { %1936 = vmatprep.subr.bf16.mxu0 %v5774_v16  ;;  %1977 = vmatprep.subr.bf16.mxu1 %v5780_v17 }
 0x3fd   :  { %1937 = vmatpush1.bf16.msra.mxu0 %v5786_v18  ;;  %1978 = vmatpush1.bf16.msra.mxu1 %v5792_v19 }
 0x3fe   :  { %1938 = vmatprep.subr.bf16.mxu0 %v5798_v20  ;;  %1979 = vmatprep.subr.bf16.mxu1 %v5804_v37 }
 0x401   :  { %1939 = vmatpush1.bf16.msra.mxu0 %v5810_v38  ;;  %1980 = vmatpush1.bf16.msra.mxu1 %v5816_v39 }
 0x402   :  { %1940 = vmatprep.subr.bf16.mxu0 %v5822_v62  ;;  %1981 = vmatprep.subr.bf16.mxu1 %v5828_v42 }
 0x405   :  { %1941 = vmatpush1.bf16.msra.mxu0 %v5834_v43  ;;  %1982 = vmatpush1.bf16.msra.mxu1 %v5840_v45 }
 0x406   :  { %1942 = vmatprep.subr.bf16.mxu0 %v5846_v46  ;;  %1983 = vmatprep.subr.bf16.mxu1 %v5852_v47  ;;  %v5876_v47 = vld [vmem:[%s7435_s4 + $0xcc] ss:$16 sps:$4 sm:$0xff]  }
 0x407   :  { %8077 = vst [vmem:[#allocation74_spill] sm:$0xff] %v5876_v47 }
 0x409   :  { %1943 = vmatpush1.bf16.msra.mxu0 %v5858_v48  ;;  %1984 = vmatpush1.bf16.msra.mxu1 %v5864_v49  ;;  %v5882_v48 = vld [vmem:[%s7435_s4 + $0xc0] ss:$16 sps:$4 sm:$0xff]   ;;  %v5888_v49 = vld [vmem:[%s7435_s4 + $0xc8] ss:$16 sps:$4 sm:$0xff]  }
 0x40a   :  { %1944 = vmatprep.subr.bf16.mxu0 %v5870_v50  ;;  %1985 = vmatprep.subr.bf16.mxu1 %v5876_v47  ;;  %8078 = vst [vmem:[#allocation44_spill] sm:$0xff] %v5882_v48  ;;  %8079 = vst [vmem:[#allocation45_spill] sm:$0xff] %v5888_v49  ;;  %v5894_v50 = vld [vmem:[%s7435_s4 + $0xe4] ss:$16 sps:$4 sm:$0xff]   ;;  %v5900_v47 = vld [vmem:[%s7435_s4 + $0xec] ss:$16 sps:$4 sm:$0xff]  }
 0x40b   :  { %8080 = vst [vmem:[#allocation46_spill] sm:$0xff] %v5894_v50  ;;  %8081 = vst [vmem:[#allocation47_spill] sm:$0xff] %v5900_v47 }
 0x40d   :  { %1945 = vmatpush1.bf16.msra.mxu0 %v5882_v48  ;;  %1986 = vmatpush1.bf16.msra.mxu1 %v5888_v49  ;;  %v5906_v48 = vld [vmem:[%s7435_s4 + $0xe0] ss:$16 sps:$4 sm:$0xff]   ;;  %v5912_v49 = vld [vmem:[%s7435_s4 + $0xe8] ss:$16 sps:$4 sm:$0xff]  }
 0x40e   :  { %1946 = vmatprep.subr.bf16.mxu0 %v5894_v50  ;;  %1987 = vmatprep.subr.bf16.mxu1 %v5900_v47  ;;  %8082 = vst [vmem:[#allocation48_spill] sm:$0xff] %v5906_v48  ;;  %8083 = vst [vmem:[#allocation49_spill] sm:$0xff] %v5912_v49  ;;  %v5918_v50 = vld [vmem:[%s7435_s4 + $0x104] ss:$16 sps:$4 sm:$0xff]   ;;  %v5924_v47 = vld [vmem:[%s7435_s4 + $0x10c] ss:$16 sps:$4 sm:$0xff]  }
 0x40f   :  { %8084 = vst [vmem:[#allocation50_spill] sm:$0xff] %v5918_v50  ;;  %8085 = vst [vmem:[#allocation51_spill] sm:$0xff] %v5924_v47 }
 0x411   :  { %1947 = vmatpush1.bf16.msra.mxu0 %v5906_v48  ;;  %1988 = vmatpush1.bf16.msra.mxu1 %v5912_v49  ;;  %v5930_v48 = vld [vmem:[%s7435_s4 + $0x100] ss:$16 sps:$4 sm:$0xff]   ;;  %v5936_v49 = vld [vmem:[%s7435_s4 + $0x108] ss:$16 sps:$4 sm:$0xff]  }
 0x412   :  { %1948 = vmatprep.subr.bf16.mxu0 %v5918_v50  ;;  %1989 = vmatprep.subr.bf16.mxu1 %v5924_v47  ;;  %8086 = vst [vmem:[#allocation52_spill] sm:$0xff] %v5930_v48  ;;  %8087 = vst [vmem:[#allocation53_spill] sm:$0xff] %v5936_v49  ;;  %v5942_v50 = vld [vmem:[%s7435_s4 + $0x124] ss:$16 sps:$4 sm:$0xff]   ;;  %v5948_v47 = vld [vmem:[%s7435_s4 + $0x12c] ss:$16 sps:$4 sm:$0xff]  }
 0x413   :  { %8088 = vst [vmem:[#allocation54_spill] sm:$0xff] %v5942_v50  ;;  %8089 = vst [vmem:[#allocation55_spill] sm:$0xff] %v5948_v47 }
 0x415   :  { %1949 = vmatpush1.bf16.msra.mxu0 %v5930_v48  ;;  %1990 = vmatpush1.bf16.msra.mxu1 %v5936_v49  ;;  %v5954_v48 = vld [vmem:[%s7435_s4 + $0x120] ss:$16 sps:$4 sm:$0xff]   ;;  %v5960_v49 = vld [vmem:[%s7435_s4 + $0x128] ss:$16 sps:$4 sm:$0xff]  }
 0x416   :  { %1950 = vmatprep.subr.bf16.mxu0 %v5942_v50  ;;  %1991 = vmatprep.subr.bf16.mxu1 %v5948_v47  ;;  %8090 = vst [vmem:[#allocation56_spill] sm:$0xff] %v5954_v48  ;;  %8091 = vst [vmem:[#allocation57_spill] sm:$0xff] %v5960_v49  ;;  %v5966_v50 = vld [vmem:[%s7435_s4 + $0x144] ss:$16 sps:$4 sm:$0xff]   ;;  %v5972_v47 = vld [vmem:[%s7435_s4 + $0x14c] ss:$16 sps:$4 sm:$0xff]  }
 0x417   :  { %8092 = vst [vmem:[#allocation58_spill] sm:$0xff] %v5966_v50  ;;  %8093 = vst [vmem:[#allocation59_spill] sm:$0xff] %v5972_v47 }
 0x419   :  { %1951 = vmatpush1.bf16.msra.mxu0 %v5954_v48  ;;  %1992 = vmatpush1.bf16.msra.mxu1 %v5960_v49  ;;  %v5978_v48 = vld [vmem:[%s7435_s4 + $0x140] ss:$16 sps:$4 sm:$0xff]   ;;  %v5984_v49 = vld [vmem:[%s7435_s4 + $0x148] ss:$16 sps:$4 sm:$0xff]  }
 0x41a   :  { %1952 = vmatprep.subr.bf16.mxu0 %v5966_v50  ;;  %1993 = vmatprep.subr.bf16.mxu1 %v5972_v47  ;;  %8094 = vst [vmem:[#allocation60_spill] sm:$0xff] %v5978_v48  ;;  %8095 = vst [vmem:[#allocation61_spill] sm:$0xff] %v5984_v49  ;;  %v5990_v50 = vld [vmem:[%s7435_s4 + $0x164] ss:$16 sps:$4 sm:$0xff]   ;;  %v5996_v47 = vld [vmem:[%s7435_s4 + $0x16c] ss:$16 sps:$4 sm:$0xff]  }
 0x41b   :  { %8096 = vst [vmem:[#allocation62_spill] sm:$0xff] %v5990_v50  ;;  %8097 = vst [vmem:[#allocation63_spill] sm:$0xff] %v5996_v47 }
 0x41d   :  { %1953 = vmatpush1.bf16.msra.mxu0 %v5978_v48  ;;  %1994 = vmatpush1.bf16.msra.mxu1 %v5984_v49  ;;  %v6002_v48 = vld [vmem:[%s7435_s4 + $0x160] ss:$16 sps:$4 sm:$0xff]   ;;  %v6008_v49 = vld [vmem:[%s7435_s4 + $0x168] ss:$16 sps:$4 sm:$0xff]  }
 0x41e   :  { %1954 = vmatprep.subr.bf16.mxu0 %v5990_v50  ;;  %1995 = vmatprep.subr.bf16.mxu1 %v5996_v47  ;;  %8098 = vst [vmem:[#allocation64_spill] sm:$0xff] %v6002_v48  ;;  %8099 = vst [vmem:[#allocation65_spill] sm:$0xff] %v6008_v49  ;;  %v6014_v50 = vld [vmem:[%s7435_s4 + $0x184] ss:$16 sps:$4 sm:$0xff]   ;;  %v6020_v47 = vld [vmem:[%s7435_s4 + $0x18c] ss:$16 sps:$4 sm:$0xff]  }
 0x41f   :  { %8100 = vst [vmem:[#allocation66_spill] sm:$0xff] %v6014_v50  ;;  %8101 = vst [vmem:[#allocation67_spill] sm:$0xff] %v6020_v47 }
 0x421   :  { %1955 = vmatpush1.bf16.msra.mxu0 %v6002_v48  ;;  %1996 = vmatpush1.bf16.msra.mxu1 %v6008_v49  ;;  %v6026_v48 = vld [vmem:[%s7435_s4 + $0x180] ss:$16 sps:$4 sm:$0xff]   ;;  %v6032_v49 = vld [vmem:[%s7435_s4 + $0x188] ss:$16 sps:$4 sm:$0xff]  }
 0x422   :  { %1956 = vmatprep.subr.bf16.mxu0 %v6014_v50  ;;  %1997 = vmatprep.subr.bf16.mxu1 %v6020_v47  ;;  %8102 = vst [vmem:[#allocation68_spill] sm:$0xff] %v6026_v48  ;;  %8103 = vst [vmem:[#allocation69_spill] sm:$0xff] %v6032_v49  ;;  %v6038_v50 = vld [vmem:[%s7435_s4 + $0x1a4] ss:$16 sps:$4 sm:$0xff]   ;;  %v6044_v47 = vld [vmem:[%s7435_s4 + $0x1ac] ss:$16 sps:$4 sm:$0xff]  }
 0x423   :  { %8104 = vst [vmem:[#allocation17_spill] sm:$0xff] %v6038_v50  ;;  %8105 = vst [vmem:[#allocation18_spill] sm:$0xff] %v6044_v47 }
 0x425   :  { %1957 = vmatpush1.bf16.msra.mxu0 %v6026_v48  ;;  %1998 = vmatpush1.bf16.msra.mxu1 %v6032_v49  ;;  %v6050_v48 = vld [vmem:[%s7435_s4 + $0x1a0] ss:$16 sps:$4 sm:$0xff]   ;;  %v6056_v49 = vld [vmem:[%s7435_s4 + $0x1a8] ss:$16 sps:$4 sm:$0xff]  }
 0x426   :  { %1958 = vmatprep.subr.bf16.mxu0 %v6038_v50  ;;  %1999 = vmatprep.subr.bf16.mxu1 %v6044_v47  ;;  %8106 = vst [vmem:[#allocation75_spill] sm:$0xff] %v6050_v48  ;;  %8107 = vst [vmem:[#allocation76_spill] sm:$0xff] %v6056_v49  ;;  %v6062_v50 = vld [vmem:[%s7435_s4 + $0x1c4] ss:$16 sps:$4 sm:$0xff]   ;;  %v6068_v47 = vld [vmem:[%s7435_s4 + $0x1cc] ss:$16 sps:$4 sm:$0xff]  }
 0x427   :  { %8108 = vst [vmem:[#allocation77_spill] sm:$0xff] %v6062_v50  ;;  %8109 = vst [vmem:[#allocation78_spill] sm:$0xff] %v6068_v47 }
 0x429   :  { %1959 = vmatpush1.bf16.msra.mxu0 %v6050_v48  ;;  %2000 = vmatpush1.bf16.msra.mxu1 %v6056_v49  ;;  %v6074_v48 = vld [vmem:[%s7435_s4 + $0x1c0] ss:$16 sps:$4 sm:$0xff]   ;;  %v6080_v49 = vld [vmem:[%s7435_s4 + $0x1c8] ss:$16 sps:$4 sm:$0xff]  }
 0x42a   :  { %1960 = vmatprep.subr.bf16.mxu0 %v6062_v50  ;;  %2001 = vmatprep.subr.bf16.mxu1 %v6068_v47  ;;  %8110 = vst [vmem:[#allocation22_spill] sm:$0xff] %v6074_v48  ;;  %8111 = vst [vmem:[#allocation23_spill] sm:$0xff] %v6080_v49  ;;  %v6086_v50 = vld [vmem:[%s7435_s4 + $0x1e4] ss:$16 sps:$4 sm:$0xff]   ;;  %v6092_v47 = vld [vmem:[%s7435_s4 + $0x1ec] ss:$16 sps:$4 sm:$0xff]  }
 0x42b   :  { %8112 = vst [vmem:[#allocation24_spill] sm:$0xff] %v6086_v50  ;;  %8113 = vst [vmem:[#allocation25_spill] sm:$0xff] %v6092_v47 }
 0x42d   :  { %1961 = vmatpush1.bf16.msra.mxu0 %v6074_v48  ;;  %2002 = vmatpush1.bf16.msra.mxu1 %v6080_v49  ;;  %v6098_v48 = vld [vmem:[%s7435_s4 + $0x1e0] ss:$16 sps:$4 sm:$0xff]   ;;  %v6104_v49 = vld [vmem:[%s7435_s4 + $0x1e8] ss:$16 sps:$4 sm:$0xff]  }
 0x42e   :  { %1962 = vmatprep.subr.bf16.mxu0 %v6086_v50  ;;  %2003 = vmatprep.subr.bf16.mxu1 %v6092_v47  ;;  %8114 = vst [vmem:[#allocation26_spill] sm:$0xff] %v6098_v48  ;;  %8115 = vst [vmem:[#allocation27_spill] sm:$0xff] %v6104_v49 }
 0x431   :  { %1963 = vmatpush1.bf16.msra.mxu0 %v6098_v48  ;;  %2004 = vmatpush1.bf16.msra.mxu1 %v6104_v49 }
 0x432   :  { %2043 = vmatprep.subr.bf16.mxu0 %v8042_v54  ;;  %2084 = vmatprep.subr.bf16.mxu1 %v8043_v55 }
 0x4a7   :  { %v1743_v50 = vpop.f32.mrb[40].mxu0  ;;  %v1784_v47 = vpop.f32.mrb[40].mxu1 }
 0x4a8   :  { %v1744_v46 = vadd.f32 %v1743_v50, %v8044_v58  ;;  %v1745_v45 = vpop.f32.mrb[41].mxu0  ;;  %v1786_v43 = vpop.f32.mrb[41].mxu1  ;;  %v1785_v54 = vadd.f32 %v1784_v47, %v8046_v13 }
 0x4a9   :  { %v1746_v42 = vadd.f32 %v1745_v45, %v8045_v63  ;;  %v1747_v48 = vpop.f32.mrb[42].mxu0  ;;  %v1788_v62 = vpop.f32.mrb[42].mxu1 }
 0x4aa   :  { %v3596_v39 = vmul.f32 -1.442695, %v1744_v46  ;;  %v1748_v38 = vpop.f32.mrb[43].mxu0  ;;  %v1789_v37 = vpop.f32.mrb[43].mxu1  ;;  %v8117_v46 = vld [vmem:[#allocation80_spill] sm:$0xff] }
 0x4ab   :  { %v3597_v20 = vmul.f32 -1.442695, %v1746_v42 }
 0x4ac   :  { %3931 = vpow2.f32 %v3596_v39 }
 0x4ad   :  { %3933 = vpow2.f32 %v3597_v20  ;;  %v8116_v20 = vld [vmem:[#allocation79_spill] sm:$0xff] }
 0x4ae   :  { %3935 = vtanh.f32 %v1785_v54  ;;  %v8118_v54 = vld [vmem:[#allocation81_spill] sm:$0xff] }
 0x4b6   :  { %v3932_v49 = vpop.eup %3931 }
 0x4b7   :  { %v3934_v55 = vpop.eup %3933  ;;  %v1794_v19 = vadd.f32 1.0, %v3932_v49 }
 0x4b8   :  { %v1800_v18 = vadd.f32 1.0, %v3934_v55  ;;  %v3936_v50 = vpop.eup %3935 }
 0x4b9   :  { %3937 = vrcp.f32 %v1794_v19  ;;  %v8119_v19 = vld [vmem:[#allocation82_spill] sm:$0xff] }
 0x4ba   :  { %3939 = vrcp.f32 %v1800_v18 }
 0x4c3   :  { %v3938_v58 = vpop.eup %3937 }
 0x4c4   :  { %v3940_v45 = vpop.eup %3939  ;;  %v1811_v48 = vmul.f32 %v3938_v58, %v3936_v50 }
 0x4c5   :  { %v1810_v62 = vmul.f32 %v3940_v45, %v5679_v40  ;;  %v1787_v45 = vadd.f32 %v1786_v43, %v5499_v34 }
 0x4c7   :  { %v6113_v38 = vadd.f32 %v1811_v48, %v1810_v62  ;;  %v1854_v37 = vpop.f32.mrb[44].mxu0  ;;  %v1895_v39 = vpop.f32.mrb[44].mxu1  ;;  %v3598_v48 = vmul.f32 -1.442695, %v1787_v45 }
 0x4c8   :  { %v1902_v42 = vadd.f32 %v1854_v37, %v8116_v20  ;;  %v1904_v47 = vadd.f32 %v1895_v39, %v8117_v46  ;;  %v1856_v13 = vpop.f32.mrb[45].mxu0  ;;  %v1897_v49 = vpop.f32.mrb[45].mxu1 }
 0x4c9   :  { %v1903_v55 = vadd.f32 %v1856_v13, %v8118_v54  ;;  %v1905_v18 = vadd.f32 %v1897_v49, %v8119_v19  ;;  %v1858_v63 = vpop.f32.mrb[46].mxu0  ;;  %v1899_v17 = vpop.f32.mrb[46].mxu1 }
 0x4ca   :  { %v3599_v16 = vmul.f32 -1.442695, %v1902_v42  ;;  %v1859_v58 = vpop.f32.mrb[47].mxu0  ;;  %v1900_v50 = vpop.f32.mrb[47].mxu1 }
 0x4cb   :  { %v3600_v40 = vmul.f32 -1.442695, %v1903_v55  ;;  %v3601_v62 = vmul.f32 -1.442695, %v1905_v18 }
 0x4cc   :  { %3941 = vpow2.f32 %v3599_v16 }
 0x4cd   :  { %3943 = vpow2.f32 %v3600_v40 }
 0x4ce   :  { %3945 = vpow2.f32 %v3598_v48 }
 0x4cf   :  { %3947 = vpow2.f32 %v3601_v62 }
 0x4d0   :  { %3949 = vtanh.f32 %v1904_v47 }
 0x4d6   :  { %v3942_v37 = vpop.eup %3941 }
 0x4d7   :  { %v3944_v39 = vpop.eup %3943  ;;  %v1909_v20 = vadd.f32 1.0, %v3942_v37  ;;  %v8151_v37 = vld [vmem:[#allocation57_spill] sm:$0xff] }
 0x4d8   :  { %v1915_v13 = vadd.f32 1.0, %v3944_v39  ;;  %v3946_v63 = vpop.eup %3945  ;;  %v8152_v39 = vld [vmem:[#allocation58_spill] sm:$0xff] }
 0x4d9   :  { %3951 = vrcp.f32 %v1909_v20  ;;  %v3948_v17 = vpop.eup %3947  ;;  %v1807_v49 = vadd.f32 1.0, %v3946_v63  ;;  %v8153_v20 = vld [vmem:[#allocation59_spill] sm:$0xff]  ;;  %v8155_v63 = vld [vmem:[#allocation61_spill] sm:$0xff] }
 0x4da   :  { %3953 = vrcp.f32 %v1915_v13  ;;  %v3950_v42 = vpop.eup %3949  ;;  %v1922_v55 = vadd.f32 1.0, %v3948_v17  ;;  %v8154_v13 = vld [vmem:[#allocation60_spill] sm:$0xff]  ;;  %v8156_v17 = vld [vmem:[#allocation62_spill] sm:$0xff] }
 0x4db   :  { %3955 = vtanh.f32 %v6113_v38 }
 0x4dc   :  { %3957 = vrcp.f32 %v1807_v49  ;;  %v8159_v49 = vld [vmem:[#allocation65_spill] sm:$0xff] }
 0x4dd   :  { %3959 = vrcp.f32 %v1922_v55  ;;  %v8162_v55 = vld [vmem:[#allocation68_spill] sm:$0xff] }
 0x4e3   :  { %v3952_v46 = vpop.eup %3951 }
 0x4e4   :  { %v3954_v16 = vpop.eup %3953  ;;  %v1926_v54 = vmul.f32 %v3952_v46, %v3950_v42  ;;  %v8157_v42 = vld [vmem:[#allocation63_spill] sm:$0xff]  ;;  %v8158_v46 = vld [vmem:[#allocation64_spill] sm:$0xff] }
 0x4e5   :  { %v1925_v43 = vmul.f32 %v3954_v16, %v5688_v41  ;;  %v3956_v47 = vpop.eup %3955  ;;  %v8141_v41 = vld [vmem:[#allocation47_spill] sm:$0xff]  ;;  %v8160_v16 = vld [vmem:[#allocation66_spill] sm:$0xff] }
 0x4e6   :  { %v3958_v18 = vpop.eup %3957 }
 0x4e7   :  { %v6122_v19 = vadd.f32 %v1926_v54, %v1925_v43  ;;  %v3960_v58 = vpop.eup %3959  ;;  %v1814_v40 = vmul.f32 %v3958_v18, %v3956_v47  ;;  %v8161_v54 = vld [vmem:[#allocation67_spill] sm:$0xff]  ;;  %v8163_v43 = vld [vmem:[#allocation69_spill] sm:$0xff]  ;;  %v8165_v18 = vld [vmem:[#allocation18_spill] sm:$0xff] }
 0x4e8   :  { %v8164_v47 = vld [vmem:[#allocation17_spill] sm:$0xff] }
 0x4e9   :  { %3961 = vtanh.f32 %v6122_v19  ;;  %v1930_v62 = vpack.c.bf16 %v1814_v40, %v1814_v40  ;;  %v8168_v40 = vld [vmem:[#allocation77_spill] sm:$0xff] }
 0x4f3   :  { %v3962_v50 = vpop.eup %3961 }
 0x4f4   :  { %v1929_v45 = vmul.f32 %v3962_v50, %v3960_v58  ;;  %v8166_v58 = vld [vmem:[#allocation75_spill] sm:$0xff]  ;;  %v8167_v50 = vld [vmem:[#allocation76_spill] sm:$0xff] }
 0x4f6   :  { %v1931_v48 = vpack.c.bf16 %v1929_v45, %v1929_v45  ;;  %v8169_v45 = vld [vmem:[#allocation78_spill] sm:$0xff] }
 0x4f8   :  { %1964 = vmatprep.mubr.bf16.mxu0 %v1931_v48  ;;  %2005 = vmatprep.mubr.bf16.mxu1 %v1931_v48 }
 0x4f9   :  { %1965 = vmatmul.mubr.bf16.vlgmr.msra.gmra.mrb[48].mxu0 %v1930_v62  ;;  %2006 = vmatmul.mubr.bf16.vlgmr.msra.gmra.mrb[48].mxu1 %v1930_v62  ;;  %v8171_v62 = vld [vmem:[#allocation23_spill] sm:$0xff] }
 0x4fa   :  { %2044 = vmatpush1.bf16.msra.mxu0 %v5515_v6  ;;  %2085 = vmatpush1.bf16.msra.mxu1 %v5518_v1  ;;  %v8120_v6 = vld [vmem:[#allocation31_spill] sm:$0xff]  ;;  %v8121_v1 = vld [vmem:[#allocation32_spill] sm:$0xff] }
 0x4fb   :  { %2045 = vmatprep.subr.bf16.mxu0 %v5521_v30  ;;  %2086 = vmatprep.subr.bf16.mxu1 %v5524_v32  ;;  %v8122_v30 = vld [vmem:[#allocation33_spill] sm:$0xff]  ;;  %v8123_v32 = vld [vmem:[#allocation34_spill] sm:$0xff] }
 0x4fc   :  { %2075 = vmatprep.mubr.bf16.mxu0 %v7939_v44  ;;  %2116 = vmatprep.mubr.bf16.mxu1 %v7939_v44 }
 0x4fe   :  { %2046 = vmatpush1.bf16.msra.mxu0 %v5529_v36  ;;  %2087 = vmatpush1.bf16.msra.mxu1 %v5532_v5  ;;  %v8124_v36 = vld [vmem:[#allocation35_spill] sm:$0xff]  ;;  %v8125_v5 = vld [vmem:[#allocation36_spill] sm:$0xff] }
 0x4ff   :  { %2047 = vmatprep.subr.bf16.mxu0 %v5535_v23  ;;  %2088 = vmatprep.subr.bf16.mxu1 %v5538_v28  ;;  %v8126_v23 = vld [vmem:[#allocation37_spill] sm:$0xff]  ;;  %v8127_v28 = vld [vmem:[#allocation38_spill] sm:$0xff] }
 0x502   :  { %2048 = vmatpush1.bf16.msra.mxu0 %v5541_v35  ;;  %2089 = vmatpush1.bf16.msra.mxu1 %v5544_v7  ;;  %v8128_v35 = vld [vmem:[#allocation39_spill] sm:$0xff]  ;;  %v8129_v7 = vld [vmem:[#allocation40_spill] sm:$0xff] }
 0x503   :  { %2049 = vmatprep.subr.bf16.mxu0 %v5547_v21  ;;  %2090 = vmatprep.subr.bf16.mxu1 %v5550_v22  ;;  %v8130_v21 = vld [vmem:[#allocation41_spill] sm:$0xff]  ;;  %v8131_v22 = vld [vmem:[#allocation42_spill] sm:$0xff] }
 0x506   :  { %2050 = vmatpush1.bf16.msra.mxu0 %v5553_v26  ;;  %2091 = vmatpush1.bf16.msra.mxu1 %v5556_v4  ;;  %v8132_v26 = vld [vmem:[#allocation43_spill] sm:$0xff]  ;;  %v8133_v4 = vld [vmem:[#allocation70_spill] sm:$0xff] }
 0x507   :  { %2051 = vmatprep.subr.bf16.mxu0 %v5559_v24  ;;  %2092 = vmatprep.subr.bf16.mxu1 %v8051_v8  ;;  %v8134_v24 = vld [vmem:[#allocation71_spill] sm:$0xff]  ;;  %v8142_v8 = vld [vmem:[#allocation48_spill] sm:$0xff] }
 0x50a   :  { %2052 = vmatpush1.bf16.msra.mxu0 %v8052_v51  ;;  %2093 = vmatpush1.bf16.msra.mxu1 %v8053_v53  ;;  %v8143_v51 = vld [vmem:[#allocation49_spill] sm:$0xff]  ;;  %v8144_v53 = vld [vmem:[#allocation50_spill] sm:$0xff] }
 0x50b   :  { %2053 = vmatprep.subr.bf16.mxu0 %v8054_v56  ;;  %2094 = vmatprep.subr.bf16.mxu1 %v8055_v57  ;;  %v8145_v56 = vld [vmem:[#allocation51_spill] sm:$0xff]  ;;  %v8146_v57 = vld [vmem:[#allocation52_spill] sm:$0xff] }
 0x50e   :  { %2054 = vmatpush1.bf16.msra.mxu0 %v8056_v59  ;;  %2095 = vmatpush1.bf16.msra.mxu1 %v8057_v60  ;;  %v8147_v59 = vld [vmem:[#allocation53_spill] sm:$0xff]  ;;  %v8148_v60 = vld [vmem:[#allocation54_spill] sm:$0xff] }
 0x50f   :  { %2055 = vmatprep.subr.bf16.mxu0 %v8058_v0  ;;  %2096 = vmatprep.subr.bf16.mxu1 %v8059_v2  ;;  %v8149_v0 = vld [vmem:[#allocation55_spill] sm:$0xff]  ;;  %v8150_v2 = vld [vmem:[#allocation56_spill] sm:$0xff] }
 0x512   :  { %2056 = vmatpush1.bf16.msra.mxu0 %v5589_v25  ;;  %2097 = vmatpush1.bf16.msra.mxu1 %v5592_v27  ;;  %v8138_v25 = vld [vmem:[#allocation44_spill] sm:$0xff]  ;;  %v8139_v27 = vld [vmem:[#allocation45_spill] sm:$0xff] }
 0x513   :  { %2057 = vmatprep.subr.bf16.mxu0 %v5595_v61  ;;  %2098 = vmatprep.subr.bf16.mxu1 %v5598_v31  ;;  %v8135_v31 = vld [vmem:[#allocation72_spill] sm:$0xff]  ;;  %v8140_v61 = vld [vmem:[#allocation46_spill] sm:$0xff] }
 0x516   :  { %2058 = vmatpush1.bf16.msra.mxu0 %v5601_v52  ;;  %2099 = vmatpush1.bf16.msra.mxu1 %v5604_v9  ;;  %v8136_v52 = vld [vmem:[#allocation73_spill] sm:$0xff]  ;;  %v8137_v9 = vld [vmem:[#allocation74_spill] sm:$0xff] }
 0x517   :  { %2155 = vmatprep.subr.bf16.mxu0 %v5726_v29  ;;  %2196 = vmatprep.subr.bf16.mxu1 %v5732_v3 }
 0x519   :  { %2076 = vmatmul.mubr.bf16.vlgmr.msra.gmra.mrb[52].mxu0 %v1931_v48  ;;  %2117 = vmatmul.mubr.bf16.vlgmr.msra.gmra.mrb[52].mxu1 %v1931_v48  ;;  %v8170_v48 = vld [vmem:[#allocation22_spill] sm:$0xff] }
 0x51a   :  { %2156 = vmatpush1.bf16.msra.mxu0 %v5738_v33  ;;  %2197 = vmatpush1.bf16.msra.mxu1 %v5744_v10 }
 0x51b   :  { %2157 = vmatprep.subr.bf16.mxu0 %v5750_v11  ;;  %2198 = vmatprep.subr.bf16.mxu1 %v5756_v12 }
 0x51e   :  { %2158 = vmatpush1.bf16.msra.mxu0 %v5762_v14  ;;  %2199 = vmatpush1.bf16.msra.mxu1 %v5768_v15 }
 0x51f   :  { %2159 = vmatprep.subr.bf16.mxu0 %v8120_v6  ;;  %2200 = vmatprep.subr.bf16.mxu1 %v8121_v1 }
 0x522   :  { %2160 = vmatpush1.bf16.msra.mxu0 %v8122_v30  ;;  %2201 = vmatpush1.bf16.msra.mxu1 %v8123_v32 }
 0x523   :  { %2161 = vmatprep.subr.bf16.mxu0 %v8124_v36  ;;  %2202 = vmatprep.subr.bf16.mxu1 %v8125_v5 }
 0x526   :  { %2162 = vmatpush1.bf16.msra.mxu0 %v8126_v23  ;;  %2203 = vmatpush1.bf16.msra.mxu1 %v8127_v28 }
 0x527   :  { %2163 = vmatprep.subr.bf16.mxu0 %v8128_v35  ;;  %2204 = vmatprep.subr.bf16.mxu1 %v8129_v7 }
 0x52a   :  { %2164 = vmatpush1.bf16.msra.mxu0 %v8130_v21  ;;  %2205 = vmatpush1.bf16.msra.mxu1 %v8131_v22 }
 0x52b   :  { %2165 = vmatprep.subr.bf16.mxu0 %v8132_v26  ;;  %2206 = vmatprep.subr.bf16.mxu1 %v8133_v4 }
 0x52e   :  { %2166 = vmatpush1.bf16.msra.mxu0 %v8134_v24  ;;  %2207 = vmatpush1.bf16.msra.mxu1 %v8135_v31 }
 0x52f   :  { %2167 = vmatprep.subr.bf16.mxu0 %v8136_v52  ;;  %2208 = vmatprep.subr.bf16.mxu1 %v8137_v9 }
 0x532   :  { %2168 = vmatpush1.bf16.msra.mxu0 %v8138_v25  ;;  %2209 = vmatpush1.bf16.msra.mxu1 %v8139_v27 }
 0x533   :  { %2169 = vmatprep.subr.bf16.mxu0 %v8140_v61  ;;  %2210 = vmatprep.subr.bf16.mxu1 %v8141_v41 }
 0x536   :  { %2170 = vmatpush1.bf16.msra.mxu0 %v8142_v8  ;;  %2211 = vmatpush1.bf16.msra.mxu1 %v8143_v51 }
 0x537   :  { %2171 = vmatprep.subr.bf16.mxu0 %v8144_v53  ;;  %2212 = vmatprep.subr.bf16.mxu1 %v8145_v56 }
 0x53a   :  { %2172 = vmatpush1.bf16.msra.mxu0 %v8146_v57  ;;  %2213 = vmatpush1.bf16.msra.mxu1 %v8147_v59 }
 0x53b   :  { %2173 = vmatprep.subr.bf16.mxu0 %v8148_v60  ;;  %2214 = vmatprep.subr.bf16.mxu1 %v8149_v0 }
 0x53e   :  { %2174 = vmatpush1.bf16.msra.mxu0 %v8150_v2  ;;  %2215 = vmatpush1.bf16.msra.mxu1 %v8151_v37 }
 0x53f   :  { %2175 = vmatprep.subr.bf16.mxu0 %v8152_v39  ;;  %2216 = vmatprep.subr.bf16.mxu1 %v8153_v20 }
 0x542   :  { %2176 = vmatpush1.bf16.msra.mxu0 %v8154_v13  ;;  %2217 = vmatpush1.bf16.msra.mxu1 %v8155_v63 }
 0x543   :  { %2177 = vmatprep.subr.bf16.mxu0 %v8156_v17  ;;  %2218 = vmatprep.subr.bf16.mxu1 %v8157_v42 }
 0x546   :  { %2178 = vmatpush1.bf16.msra.mxu0 %v8158_v46  ;;  %2219 = vmatpush1.bf16.msra.mxu1 %v8159_v49 }
 0x547   :  { %2179 = vmatprep.subr.bf16.mxu0 %v8160_v16  ;;  %2220 = vmatprep.subr.bf16.mxu1 %v8161_v54  ;;  %v8172_v54 = vld [vmem:[#allocation24_spill] sm:$0xff] }
 0x548   :  { %v8179_v16 = vld [vmem:[#allocation20_spill] sm:$0xff] }
 0x54a   :  { %2180 = vmatpush1.bf16.msra.mxu0 %v8162_v55  ;;  %2221 = vmatpush1.bf16.msra.mxu1 %v8163_v43  ;;  %v8173_v55 = vld [vmem:[#allocation25_spill] sm:$0xff]  ;;  %v8174_v43 = vld [vmem:[#allocation26_spill] sm:$0xff] }
 0x54b   :  { %2181 = vmatprep.subr.bf16.mxu0 %v8164_v47  ;;  %2222 = vmatprep.subr.bf16.mxu1 %v8165_v18  ;;  %v8175_v47 = vld [vmem:[#allocation27_spill] sm:$0xff] }
 0x54c   :  { %v6221_v18 = vld [vmem:[#allocation7 + $0x4] ss:$16 sps:$4 sm:$0xff]  }
 0x54d   :  { %8176 = vst [vmem:[#allocation28_spill] sm:$0xff] %v6221_v18 }
 0x54e   :  { %2182 = vmatpush1.bf16.msra.mxu0 %v8166_v58  ;;  %2223 = vmatpush1.bf16.msra.mxu1 %v8167_v50  ;;  %v6224_v50 = vld [vmem:[#allocation7 + $0xc] ss:$16 sps:$4 sm:$0xff]  }
 0x54f   :  { %2183 = vmatprep.subr.bf16.mxu0 %v8168_v40  ;;  %2224 = vmatprep.subr.bf16.mxu1 %v8169_v45  ;;  %8177 = vst [vmem:[#allocation29_spill] sm:$0xff] %v6224_v50  ;;  %v8178_v40 = vld [vmem:[#allocation19_spill] sm:$0xff] }
 0x552   :  { %2184 = vmatpush1.bf16.msra.mxu0 %v8170_v48  ;;  %2225 = vmatpush1.bf16.msra.mxu1 %v8171_v62 }
 0x553   :  { %2185 = vmatprep.subr.bf16.mxu0 %v8172_v54  ;;  %2226 = vmatprep.subr.bf16.mxu1 %v8173_v55 }
 0x556   :  { %2186 = vmatpush1.bf16.msra.mxu0 %v8174_v43  ;;  %2227 = vmatpush1.bf16.msra.mxu1 %v8175_v47 }
 0x557   :  { %2266 = vmatprep.subr.bf16.mxu0 %v6221_v18  ;;  %2307 = vmatprep.subr.bf16.mxu1 %v6224_v50  ;;  %v8180_v18 = vld [vmem:[#allocation21_spill] sm:$0xff] }
 0x5cc   :  { %v1966_v45 = vpop.f32.mrb[48].mxu0  ;;  %v2007_v48 = vpop.f32.mrb[48].mxu1 }
 0x5cd   :  { %v1967_v62 = vadd.f32 %v1966_v45, %v8178_v40  ;;  %v1968_v58 = vpop.f32.mrb[49].mxu0  ;;  %v2009_v54 = vpop.f32.mrb[49].mxu1  ;;  %v2008_v63 = vadd.f32 %v2007_v48, %v8180_v18  ;;  %v8182_v48 = vld [vmem:[#allocation84_spill] sm:$0xff] }
 0x5ce   :  { %v1969_v55 = vadd.f32 %v1968_v58, %v8179_v16  ;;  %v1970_v49 = vpop.f32.mrb[50].mxu0  ;;  %v2011_v43 = vpop.f32.mrb[50].mxu1 }
 0x5cf   :  { %v3602_v46 = vmul.f32 -1.442695, %v1967_v62  ;;  %v1971_v47 = vpop.f32.mrb[51].mxu0  ;;  %v2012_v42 = vpop.f32.mrb[51].mxu1 }
 0x5d0   :  { %v3603_v17 = vmul.f32 -1.442695, %v1969_v55 }
 0x5d1   :  { %3963 = vpow2.f32 %v3602_v46 }
 0x5d2   :  { %3965 = vpow2.f32 %v3603_v17  ;;  %v8181_v17 = vld [vmem:[#allocation83_spill] sm:$0xff] }
 0x5d3   :  { %3967 = vtanh.f32 %v2008_v63  ;;  %v8183_v63 = vld [vmem:[#allocation85_spill] sm:$0xff] }
 0x5db   :  { %v3964_v13 = vpop.eup %3963 }
 0x5dc   :  { %v3966_v50 = vpop.eup %3965  ;;  %v2017_v20 = vadd.f32 1.0, %v3964_v13 }
 0x5dd   :  { %v2023_v39 = vadd.f32 1.0, %v3966_v50  ;;  %v3968_v45 = vpop.eup %3967 }
 0x5de   :  { %3969 = vrcp.f32 %v2017_v20  ;;  %v8184_v20 = vld [vmem:[#allocation86_spill] sm:$0xff] }
 0x5df   :  { %3971 = vrcp.f32 %v2023_v39 }
 0x5e8   :  { %v3970_v40 = vpop.eup %3969 }
 0x5e9   :  { %v3972_v58 = vpop.eup %3971  ;;  %v2034_v49 = vmul.f32 %v3970_v40, %v3968_v45 }
 0x5ea   :  { %v2033_v43 = vmul.f32 %v3972_v58, %v6113_v38  ;;  %v2010_v58 = vadd.f32 %v2009_v54, %v5499_v34 }
 0x5ec   :  { %v6231_v47 = vadd.f32 %v2034_v49, %v2033_v43  ;;  %v2077_v42 = vpop.f32.mrb[52].mxu0  ;;  %v2118_v46 = vpop.f32.mrb[52].mxu1  ;;  %v3604_v49 = vmul.f32 -1.442695, %v2010_v58 }
 0x5ed   :  { %v2125_v55 = vadd.f32 %v2077_v42, %v8181_v17  ;;  %v2127_v62 = vadd.f32 %v2118_v46, %v8182_v48  ;;  %v2079_v18 = vpop.f32.mrb[53].mxu0  ;;  %v2120_v13 = vpop.f32.mrb[53].mxu1 }
 0x5ee   :  { %v2126_v50 = vadd.f32 %v2079_v18, %v8183_v63  ;;  %v2128_v39 = vadd.f32 %v2120_v13, %v8184_v20  ;;  %v2081_v16 = vpop.f32.mrb[54].mxu0  ;;  %v2122_v37 = vpop.f32.mrb[54].mxu1 }
 0x5ef   :  { %v3605_v2 = vmul.f32 -1.442695, %v2125_v55  ;;  %v2082_v40 = vpop.f32.mrb[55].mxu0  ;;  %v2123_v45 = vpop.f32.mrb[55].mxu1 }
 0x5f0   :  { %v3606_v38 = vmul.f32 -1.442695, %v2126_v50  ;;  %v3607_v43 = vmul.f32 -1.442695, %v2128_v39 }
 0x5f1   :  { %3973 = vpow2.f32 %v3605_v2 }
 0x5f2   :  { %3975 = vpow2.f32 %v3606_v38 }
 0x5f3   :  { %3977 = vpow2.f32 %v3604_v49 }
 0x5f4   :  { %3979 = vpow2.f32 %v3607_v43 }
 0x5f5   :  { %3981 = vtanh.f32 %v2127_v62 }
 0x5fb   :  { %v3974_v42 = vpop.eup %3973 }
 0x5fc   :  { %v3976_v46 = vpop.eup %3975  ;;  %v2132_v17 = vadd.f32 1.0, %v3974_v42  ;;  %v6250_v42 = vld [vmem:[#allocation7 + $0x8] ss:$16 sps:$4 sm:$0xff]  }
 0x5fd   :  { %v2138_v18 = vadd.f32 1.0, %v3976_v46  ;;  %v3978_v37 = vpop.eup %3977  ;;  %v6253_v46 = vld [vmem:[#allocation7 + $0x24] ss:$16 sps:$4 sm:$0xff]  }
 0x5fe   :  { %3983 = vrcp.f32 %v2132_v17  ;;  %v3980_v16 = vpop.eup %3979  ;;  %v2030_v13 = vadd.f32 1.0, %v3978_v37  ;;  %v6256_v17 = vld [vmem:[#allocation7 + $0x2c] ss:$16 sps:$4 sm:$0xff]   ;;  %v6264_v37 = vld [vmem:[#allocation7 + $0x28] ss:$16 sps:$4 sm:$0xff]  }
 0x5ff   :  { %3985 = vrcp.f32 %v2138_v18  ;;  %v3982_v55 = vpop.eup %3981  ;;  %v2145_v50 = vadd.f32 1.0, %v3980_v16  ;;  %v6261_v18 = vld [vmem:[#allocation7 + $0x20] ss:$16 sps:$4 sm:$0xff]   ;;  %v6267_v16 = vld [vmem:[#allocation7 + $0x44] ss:$16 sps:$4 sm:$0xff]  }
 0x600   :  { %3987 = vtanh.f32 %v6231_v47 }
 0x601   :  { %3989 = vrcp.f32 %v2030_v13  ;;  %v6276_v13 = vld [vmem:[#allocation7 + $0x48] ss:$16 sps:$4 sm:$0xff]  }
 0x602   :  { %3991 = vrcp.f32 %v2145_v50  ;;  %v6285_v50 = vld [vmem:[#allocation7 + $0x60] ss:$16 sps:$4 sm:$0xff]  }
 0x608   :  { %v3984_v48 = vpop.eup %3983 }
 0x609   :  { %v3986_v2 = vpop.eup %3985  ;;  %v2149_v63 = vmul.f32 %v3984_v48, %v3982_v55  ;;  %v6270_v55 = vld [vmem:[#allocation7 + $0x4c] ss:$16 sps:$4 sm:$0xff]   ;;  %v6273_v48 = vld [vmem:[#allocation7 + $0x40] ss:$16 sps:$4 sm:$0xff]  }
 0x60a   :  { %v2148_v54 = vmul.f32 %v3986_v2, %v6122_v19  ;;  %v3988_v62 = vpop.eup %3987  ;;  %v6247_v19 = vld [vmem:[#allocation7] ss:$16 sps:$4 sm:$0xff]   ;;  %v6279_v2 = vld [vmem:[#allocation7 + $0x64] ss:$16 sps:$4 sm:$0xff]  }
 0x60b   :  { %v3990_v39 = vpop.eup %3989 }
 0x60c   :  { %v6240_v20 = vadd.f32 %v2149_v63, %v2148_v54  ;;  %v3992_v40 = vpop.eup %3991  ;;  %v2037_v38 = vmul.f32 %v3990_v39, %v3988_v62  ;;  %v6282_v63 = vld [vmem:[#allocation7 + $0x6c] ss:$16 sps:$4 sm:$0xff]   ;;  %v6288_v54 = vld [vmem:[#allocation7 + $0x68] ss:$16 sps:$4 sm:$0xff]   ;;  %v6291_v62 = vld [vmem:[#allocation7 + $0x84] ss:$16 sps:$4 sm:$0xff]  }
 0x60d   :  { %v6294_v39 = vld [vmem:[#allocation7 + $0x8c] ss:$16 sps:$4 sm:$0xff]  }
 0x60e   :  { %3993 = vtanh.f32 %v6240_v20  ;;  %v2153_v43 = vpack.c.bf16 %v2037_v38, %v2037_v38  ;;  %8185 = vst [vmem:[#allocation30_spill] sm:$0xff] %v6294_v39  ;;  %v6303_v38 = vld [vmem:[#allocation7 + $0xa4] ss:$16 sps:$4 sm:$0xff]  }
 0x60f   :  { %8188 = vst [vmem:[#allocation81_spill] sm:$0xff] %v6303_v38 }
 0x618   :  { %v3994_v45 = vpop.eup %3993 }
 0x619   :  { %v2152_v58 = vmul.f32 %v3994_v45, %v3992_v40  ;;  %v6297_v40 = vld [vmem:[#allocation7 + $0x80] ss:$16 sps:$4 sm:$0xff]   ;;  %v6300_v45 = vld [vmem:[#allocation7 + $0x88] ss:$16 sps:$4 sm:$0xff]  }
 0x61a   :  { %8186 = vst [vmem:[#allocation79_spill] sm:$0xff] %v6297_v40  ;;  %8187 = vst [vmem:[#allocation80_spill] sm:$0xff] %v6300_v45 }
 0x61b   :  { %v6243_v49 = vpack.c.bf16 %v2152_v58, %v2152_v58  ;;  %v6306_v58 = vld [vmem:[#allocation7 + $0xac] ss:$16 sps:$4 sm:$0xff]  }
 0x61c   :  { %8189 = vst [vmem:[#allocation82_spill] sm:$0xff] %v6306_v58 }
 0x61d   :  { %2187 = vmatprep.mubr.bf16.mxu0 %v6243_v49  ;;  %2228 = vmatprep.mubr.bf16.mxu1 %v6243_v49 }
 0x61e   :  { %2188 = vmatmul.mubr.bf16.vlgmr.msra.gmra.mrb[56].mxu0 %v2153_v43  ;;  %2229 = vmatmul.mubr.bf16.vlgmr.msra.gmra.mrb[56].mxu1 %v2153_v43  ;;  %v6309_v43 = vld [vmem:[#allocation7 + $0xa0] ss:$16 sps:$4 sm:$0xff]  }
 0x61f   :  { %2267 = vmatpush1.bf16.msra.mxu0 %v6247_v19  ;;  %2308 = vmatpush1.bf16.msra.mxu1 %v6250_v42  ;;  %8190 = vst [vmem:[#allocation31_spill] sm:$0xff] %v6309_v43 }
 0x620   :  { %2268 = vmatprep.subr.bf16.mxu0 %v6253_v46  ;;  %2309 = vmatprep.subr.bf16.mxu1 %v6256_v17 }
 0x621   :  { %2298 = vmatprep.mubr.bf16.mxu0 %v7939_v44  ;;  %2339 = vmatprep.mubr.bf16.mxu1 %v7939_v44 }
 0x623   :  { %2269 = vmatpush1.bf16.msra.mxu0 %v6261_v18  ;;  %2310 = vmatpush1.bf16.msra.mxu1 %v6264_v37 }
 0x624   :  { %2270 = vmatprep.subr.bf16.mxu0 %v6267_v16  ;;  %2311 = vmatprep.subr.bf16.mxu1 %v6270_v55 }
 0x627   :  { %2271 = vmatpush1.bf16.msra.mxu0 %v6273_v48  ;;  %2312 = vmatpush1.bf16.msra.mxu1 %v6276_v13 }
 0x628   :  { %2272 = vmatprep.subr.bf16.mxu0 %v6279_v2  ;;  %2313 = vmatprep.subr.bf16.mxu1 %v6282_v63 }
 0x62b   :  { %2273 = vmatpush1.bf16.msra.mxu0 %v6285_v50  ;;  %2314 = vmatpush1.bf16.msra.mxu1 %v6288_v54 }
 0x62c   :  { %2274 = vmatprep.subr.bf16.mxu0 %v6291_v62  ;;  %2315 = vmatprep.subr.bf16.mxu1 %v6294_v39  ;;  %v6312_v39 = vld [vmem:[#allocation7 + $0xa8] ss:$16 sps:$4 sm:$0xff]  }
 0x62d   :  { %8191 = vst [vmem:[#allocation32_spill] sm:$0xff] %v6312_v39 }
 0x62f   :  { %2275 = vmatpush1.bf16.msra.mxu0 %v6297_v40  ;;  %2316 = vmatpush1.bf16.msra.mxu1 %v6300_v45  ;;  %v6315_v40 = vld [vmem:[#allocation7 + $0xc4] ss:$16 sps:$4 sm:$0xff]   ;;  %v6318_v45 = vld [vmem:[#allocation7 + $0xcc] ss:$16 sps:$4 sm:$0xff]  }
 0x630   :  { %2276 = vmatprep.subr.bf16.mxu0 %v6303_v38  ;;  %2317 = vmatprep.subr.bf16.mxu1 %v6306_v58  ;;  %8192 = vst [vmem:[#allocation33_spill] sm:$0xff] %v6315_v40  ;;  %8193 = vst [vmem:[#allocation34_spill] sm:$0xff] %v6318_v45  ;;  %v6321_v38 = vld [vmem:[#allocation7 + $0xc0] ss:$16 sps:$4 sm:$0xff]   ;;  %v6324_v58 = vld [vmem:[#allocation7 + $0xc8] ss:$16 sps:$4 sm:$0xff]  }
 0x633   :  { %2277 = vmatpush1.bf16.msra.mxu0 %v6309_v43  ;;  %2318 = vmatpush1.bf16.msra.mxu1 %v6312_v39  ;;  %v6327_v43 = vld [vmem:[#allocation7 + $0xe4] ss:$16 sps:$4 sm:$0xff]   ;;  %v6330_v39 = vld [vmem:[#allocation7 + $0xec] ss:$16 sps:$4 sm:$0xff]  }
 0x634   :  { %2278 = vmatprep.subr.bf16.mxu0 %v6315_v40  ;;  %2319 = vmatprep.subr.bf16.mxu1 %v6318_v45  ;;  %v6333_v40 = vld [vmem:[#allocation7 + $0xe0] ss:$16 sps:$4 sm:$0xff]   ;;  %v6336_v45 = vld [vmem:[#allocation7 + $0xe8] ss:$16 sps:$4 sm:$0xff]  }
 0x637   :  { %2279 = vmatpush1.bf16.msra.mxu0 %v6321_v38  ;;  %2320 = vmatpush1.bf16.msra.mxu1 %v6324_v58 }
 0x638   :  { %2280 = vmatprep.subr.bf16.mxu0 %v6327_v43  ;;  %2321 = vmatprep.subr.bf16.mxu1 %v6330_v39 }
 0x63b   :  { %2281 = vmatpush1.bf16.msra.mxu0 %v6333_v40  ;;  %2322 = vmatpush1.bf16.msra.mxu1 %v6336_v45 }
 0x63c   :  { %2378 = vmatprep.subr.bf16.mxu0 %v5726_v29  ;;  %2419 = vmatprep.subr.bf16.mxu1 %v5732_v3  ;;  %v8194_v29 = vld [vmem:[#allocation56_spill] sm:$0xff]  ;;  %v8195_v3 = vld [vmem:[#allocation57_spill] sm:$0xff] }
 0x63e   :  { %2299 = vmatmul.mubr.bf16.vlgmr.msra.gmra.mrb[60].mxu0 %v6243_v49  ;;  %2340 = vmatmul.mubr.bf16.vlgmr.msra.gmra.mrb[60].mxu1 %v6243_v49 }
 0x63f   :  { %2379 = vmatpush1.bf16.msra.mxu0 %v5738_v33  ;;  %2420 = vmatpush1.bf16.msra.mxu1 %v5744_v10  ;;  %v8196_v33 = vld [vmem:[#allocation58_spill] sm:$0xff]  ;;  %v8197_v10 = vld [vmem:[#allocation59_spill] sm:$0xff] }
 0x640   :  { %2380 = vmatprep.subr.bf16.mxu0 %v5750_v11  ;;  %2421 = vmatprep.subr.bf16.mxu1 %v5756_v12  ;;  %v8198_v11 = vld [vmem:[#allocation60_spill] sm:$0xff]  ;;  %v8199_v12 = vld [vmem:[#allocation61_spill] sm:$0xff] }
 0x643   :  { %2381 = vmatpush1.bf16.msra.mxu0 %v5762_v14  ;;  %2422 = vmatpush1.bf16.msra.mxu1 %v5768_v15  ;;  %v8200_v14 = vld [vmem:[#allocation62_spill] sm:$0xff]  ;;  %v8201_v15 = vld [vmem:[#allocation63_spill] sm:$0xff] }
 0x644   :  { %2382 = vmatprep.subr.bf16.mxu0 %v8120_v6  ;;  %2423 = vmatprep.subr.bf16.mxu1 %v8121_v1  ;;  %v8202_v6 = vld [vmem:[#allocation64_spill] sm:$0xff]  ;;  %v8203_v1 = vld [vmem:[#allocation65_spill] sm:$0xff] }
 0x647   :  { %2383 = vmatpush1.bf16.msra.mxu0 %v8122_v30  ;;  %2424 = vmatpush1.bf16.msra.mxu1 %v8123_v32  ;;  %v8204_v30 = vld [vmem:[#allocation66_spill] sm:$0xff]  ;;  %v8205_v32 = vld [vmem:[#allocation67_spill] sm:$0xff] }
 0x648   :  { %2384 = vmatprep.subr.bf16.mxu0 %v8124_v36  ;;  %2425 = vmatprep.subr.bf16.mxu1 %v8125_v5  ;;  %v8206_v36 = vld [vmem:[#allocation68_spill] sm:$0xff]  ;;  %v8207_v5 = vld [vmem:[#allocation69_spill] sm:$0xff] }
 0x64b   :  { %2385 = vmatpush1.bf16.msra.mxu0 %v8126_v23  ;;  %2426 = vmatpush1.bf16.msra.mxu1 %v8127_v28  ;;  %v8208_v23 = vld [vmem:[#allocation17_spill] sm:$0xff]  ;;  %v8209_v28 = vld [vmem:[#allocation18_spill] sm:$0xff] }
 0x64c   :  { %2386 = vmatprep.subr.bf16.mxu0 %v8128_v35  ;;  %2427 = vmatprep.subr.bf16.mxu1 %v8129_v7  ;;  %v8210_v35 = vld [vmem:[#allocation75_spill] sm:$0xff]  ;;  %v8211_v7 = vld [vmem:[#allocation76_spill] sm:$0xff] }
 0x64f   :  { %2387 = vmatpush1.bf16.msra.mxu0 %v8130_v21  ;;  %2428 = vmatpush1.bf16.msra.mxu1 %v8131_v22  ;;  %v8212_v21 = vld [vmem:[#allocation77_spill] sm:$0xff]  ;;  %v8213_v22 = vld [vmem:[#allocation78_spill] sm:$0xff] }
 0x650   :  { %2388 = vmatprep.subr.bf16.mxu0 %v8132_v26  ;;  %2429 = vmatprep.subr.bf16.mxu1 %v8133_v4  ;;  %v8214_v26 = vld [vmem:[#allocation22_spill] sm:$0xff]  ;;  %v8215_v4 = vld [vmem:[#allocation23_spill] sm:$0xff] }
 0x653   :  { %2389 = vmatpush1.bf16.msra.mxu0 %v8134_v24  ;;  %2430 = vmatpush1.bf16.msra.mxu1 %v8135_v31  ;;  %v8216_v24 = vld [vmem:[#allocation24_spill] sm:$0xff]  ;;  %v8217_v31 = vld [vmem:[#allocation25_spill] sm:$0xff] }
 0x654   :  { %2390 = vmatprep.subr.bf16.mxu0 %v8136_v52  ;;  %2431 = vmatprep.subr.bf16.mxu1 %v8137_v9  ;;  %v8218_v52 = vld [vmem:[#allocation26_spill] sm:$0xff]  ;;  %v8219_v9 = vld [vmem:[#allocation27_spill] sm:$0xff] }
 0x657   :  { %2391 = vmatpush1.bf16.msra.mxu0 %v8138_v25  ;;  %2432 = vmatpush1.bf16.msra.mxu1 %v8139_v27  ;;  %v8220_v25 = vld [vmem:[#allocation28_spill] sm:$0xff]  ;;  %v8221_v27 = vld [vmem:[#allocation29_spill] sm:$0xff] }
 0x658   :  { %2392 = vmatprep.subr.bf16.mxu0 %v8140_v61  ;;  %2433 = vmatprep.subr.bf16.mxu1 %v8141_v41 }
 0x65b   :  { %2393 = vmatpush1.bf16.msra.mxu0 %v8142_v8  ;;  %2434 = vmatpush1.bf16.msra.mxu1 %v8143_v51  ;;  %v8222_v8 = vld [vmem:[#allocation19_spill] sm:$0xff] }
 0x65c   :  { %2394 = vmatprep.subr.bf16.mxu0 %v8144_v53  ;;  %2435 = vmatprep.subr.bf16.mxu1 %v8145_v56 }
 0x65f   :  { %2395 = vmatpush1.bf16.msra.mxu0 %v8146_v57  ;;  %2436 = vmatpush1.bf16.msra.mxu1 %v8147_v59  ;;  %v8223_v57 = vld [vmem:[#allocation20_spill] sm:$0xff] }
 0x660   :  { %2396 = vmatprep.subr.bf16.mxu0 %v8148_v60  ;;  %2437 = vmatprep.subr.bf16.mxu1 %v8149_v0 }
 0x663   :  { %2397 = vmatpush1.bf16.msra.mxu0 %v8194_v29  ;;  %2438 = vmatpush1.bf16.msra.mxu1 %v8195_v3 }
 0x664   :  { %2398 = vmatprep.subr.bf16.mxu0 %v8196_v33  ;;  %2439 = vmatprep.subr.bf16.mxu1 %v8197_v10  ;;  %v8224_v10 = vld [vmem:[#allocation21_spill] sm:$0xff] }
 0x667   :  { %2399 = vmatpush1.bf16.msra.mxu0 %v8198_v11  ;;  %2440 = vmatpush1.bf16.msra.mxu1 %v8199_v12 }
 0x668   :  { %2400 = vmatprep.subr.bf16.mxu0 %v8200_v14  ;;  %2441 = vmatprep.subr.bf16.mxu1 %v8201_v15 }
 0x66b   :  { %2401 = vmatpush1.bf16.msra.mxu0 %v8202_v6  ;;  %2442 = vmatpush1.bf16.msra.mxu1 %v8203_v1 }
 0x66c   :  { %2402 = vmatprep.subr.bf16.mxu0 %v8204_v30  ;;  %2443 = vmatprep.subr.bf16.mxu1 %v8205_v32 }
 0x66f   :  { %2403 = vmatpush1.bf16.msra.mxu0 %v8206_v36  ;;  %2444 = vmatpush1.bf16.msra.mxu1 %v8207_v5 }
 0x670   :  { %2404 = vmatprep.subr.bf16.mxu0 %v8208_v23  ;;  %2445 = vmatprep.subr.bf16.mxu1 %v8209_v28 }
 0x673   :  { %2405 = vmatpush1.bf16.msra.mxu0 %v8210_v35  ;;  %2446 = vmatpush1.bf16.msra.mxu1 %v8211_v7  ;;  %v8225_v7 = vld [vmem:[#allocation87_spill] sm:$0xff] }
 0x674   :  { %2406 = vmatprep.subr.bf16.mxu0 %v8212_v21  ;;  %2447 = vmatprep.subr.bf16.mxu1 %v8213_v22  ;;  %v8226_v22 = vld [vmem:[#allocation88_spill] sm:$0xff] }
 0x677   :  { %2407 = vmatpush1.bf16.msra.mxu0 %v8214_v26  ;;  %2448 = vmatpush1.bf16.msra.mxu1 %v8215_v4 }
 0x678   :  { %2408 = vmatprep.subr.bf16.mxu0 %v8216_v24  ;;  %2449 = vmatprep.subr.bf16.mxu1 %v8217_v31  ;;  %v8227_v31 = vld [vmem:[#allocation89_spill] sm:$0xff] }
 0x67b   :  { %2409 = vmatpush1.bf16.msra.mxu0 %v8218_v52  ;;  %2450 = vmatpush1.bf16.msra.mxu1 %v8219_v9  ;;  %v8228_v9 = vld [vmem:[#allocation90_spill] sm:$0xff] }
 0x67c   :  { %2489 = vmatprep.subr.bf16.mxu0 %v8220_v25  ;;  %2530 = vmatprep.subr.bf16.mxu1 %v8221_v27 }
 0x6f1   :  { %v2189_v61 = vpop.f32.mrb[56].mxu0  ;;  %v2230_v41 = vpop.f32.mrb[56].mxu1 }
 0x6f2   :  { %v2190_v51 = vadd.f32 %v2189_v61, %v8222_v8  ;;  %v2191_v53 = vpop.f32.mrb[57].mxu0  ;;  %v2232_v56 = vpop.f32.mrb[57].mxu1  ;;  %v2231_v11 = vadd.f32 %v2230_v41, %v8224_v10 }
 0x6f3   :  { %v2192_v59 = vadd.f32 %v2191_v53, %v8223_v57  ;;  %v2193_v60 = vpop.f32.mrb[58].mxu0  ;;  %v2234_v0 = vpop.f32.mrb[58].mxu1 }
 0x6f4   :  { %v3608_v49 = vmul.f32 -1.442695, %v2190_v51  ;;  %v2194_v29 = vpop.f32.mrb[59].mxu0  ;;  %v2235_v3 = vpop.f32.mrb[59].mxu1  ;;  %v2233_v0 = vadd.f32 %v2232_v56, %v5499_v34 }
 0x6f5   :  { %v3609_v33 = vmul.f32 -1.442695, %v2192_v59 }
 0x6f6   :  { %3995 = vpow2.f32 %v3608_v49  ;;  %v3610_v49 = vmul.f32 -1.442695, %v2233_v0  ;;  %v6464_v0 = vld [vmem:[%s7435_s4 + $0xc] ss:$16 sps:$4 sm:$0xff]  }
 0x6f7   :  { %3997 = vpow2.f32 %v3609_v33 }
 0x6f8   :  { %3999 = vtanh.f32 %v2231_v11 }
 0x700   :  { %v3996_v12 = vpop.eup %3995 }
 0x701   :  { %v3998_v14 = vpop.eup %3997  ;;  %v2240_v15 = vadd.f32 1.0, %v3996_v12 }
 0x702   :  { %v2246_v6 = vadd.f32 1.0, %v3998_v14  ;;  %v4000_v1 = vpop.eup %3999 }
 0x703   :  { %4001 = vrcp.f32 %v2240_v15 }
 0x704   :  { %4003 = vrcp.f32 %v2246_v6 }
 0x70d   :  { %v4002_v30 = vpop.eup %4001 }
 0x70e   :  { %v4004_v32 = vpop.eup %4003  ;;  %v2257_v36 = vmul.f32 %v4002_v30, %v4000_v1 }
 0x70f   :  { %v2256_v5 = vmul.f32 %v4004_v32, %v6231_v47 }
 0x711   :  { %v6411_v23 = vadd.f32 %v2257_v36, %v2256_v5  ;;  %v2300_v28 = vpop.f32.mrb[60].mxu0  ;;  %v2341_v35 = vpop.f32.mrb[60].mxu1 }
 0x712   :  { %v2348_v21 = vadd.f32 %v2300_v28, %v8225_v7  ;;  %v2350_v26 = vadd.f32 %v2341_v35, %v8226_v22  ;;  %v2302_v4 = vpop.f32.mrb[61].mxu0  ;;  %v2343_v24 = vpop.f32.mrb[61].mxu1 }
 0x713   :  { %v2349_v52 = vadd.f32 %v2302_v4, %v8227_v31  ;;  %v2351_v61 = vadd.f32 %v2343_v24, %v8228_v9  ;;  %v2304_v41 = vpop.f32.mrb[62].mxu0  ;;  %v2345_v51 = vpop.f32.mrb[62].mxu1  ;;  %v8231_v9 = vld [vmem:[#allocation80_spill] sm:$0xff] }
 0x714   :  { %v3611_v53 = vmul.f32 -1.442695, %v2348_v21  ;;  %v2305_v59 = vpop.f32.mrb[63].mxu0  ;;  %v2346_v60 = vpop.f32.mrb[63].mxu1  ;;  %v8233_v41 = vld [vmem:[#allocation82_spill] sm:$0xff]  ;;  %v8234_v51 = vld [vmem:[#allocation31_spill] sm:$0xff] }
 0x715   :  { %v3612_v47 = vmul.f32 -1.442695, %v2349_v52  ;;  %v3613_v29 = vmul.f32 -1.442695, %v2351_v61  ;;  %v8230_v52 = vld [vmem:[#allocation79_spill] sm:$0xff]  ;;  %v8232_v61 = vld [vmem:[#allocation81_spill] sm:$0xff] }
 0x716   :  { %4005 = vpow2.f32 %v3611_v53  ;;  %v8235_v53 = vld [vmem:[#allocation32_spill] sm:$0xff]  ;;  %v8236_v59 = vld [vmem:[#allocation33_spill] sm:$0xff]  ;;  %v8237_v60 = vld [vmem:[#allocation34_spill] sm:$0xff] }
 0x717   :  { %4007 = vpow2.f32 %v3612_v47  ;;  %v6458_v47 = vld [vmem:[%s7435_s4 + $0x4] ss:$16 sps:$4 sm:$0xff]  }
 0x718   :  { %4009 = vpow2.f32 %v3610_v49  ;;  %v6470_v49 = vld [vmem:[%s7435_s4] ss:$16 sps:$4 sm:$0xff]  }
 0x719   :  { %4011 = vpow2.f32 %v3613_v29  ;;  %v6476_v29 = vld [vmem:[%s7435_s4 + $0x8] ss:$16 sps:$4 sm:$0xff]  }
 0x71a   :  { %4013 = vtanh.f32 %v2350_v26 }
 0x720   :  { %v4006_v3 = vpop.eup %4005 }
 0x721   :  { %v4008_v33 = vpop.eup %4007  ;;  %v2355_v11 = vadd.f32 1.0, %v4006_v3  ;;  %v6482_v3 = vld [vmem:[%s7435_s4 + $0x24] ss:$16 sps:$4 sm:$0xff]  }
 0x722   :  { %v2361_v12 = vadd.f32 1.0, %v4008_v33  ;;  %v4010_v14 = vpop.eup %4009  ;;  %v6488_v33 = vld [vmem:[%s7435_s4 + $0x2c] ss:$16 sps:$4 sm:$0xff]  }
 0x723   :  { %4015 = vrcp.f32 %v2355_v11  ;;  %v4012_v15 = vpop.eup %4011  ;;  %v2253_v30 = vadd.f32 1.0, %v4010_v14  ;;  %v6494_v11 = vld [vmem:[%s7435_s4 + $0x20] ss:$16 sps:$4 sm:$0xff]   ;;  %v6506_v14 = vld [vmem:[%s7435_s4 + $0x44] ss:$16 sps:$4 sm:$0xff]  }
 0x724   :  { %4017 = vrcp.f32 %v2361_v12  ;;  %v4014_v6 = vpop.eup %4013  ;;  %v2368_v5 = vadd.f32 1.0, %v4012_v15  ;;  %v6500_v12 = vld [vmem:[%s7435_s4 + $0x28] ss:$16 sps:$4 sm:$0xff]   ;;  %8238 = vst [vmem:[#allocation35_spill] sm:$0xff] %v6506_v14  ;;  %v6512_v15 = vld [vmem:[%s7435_s4 + $0x4c] ss:$16 sps:$4 sm:$0xff]  }
 0x725   :  { %4019 = vtanh.f32 %v6411_v23  ;;  %8239 = vst [vmem:[#allocation36_spill] sm:$0xff] %v6512_v15 }
 0x726   :  { %4021 = vrcp.f32 %v2253_v30  ;;  %v6530_v30 = vld [vmem:[%s7435_s4 + $0x64] ss:$16 sps:$4 sm:$0xff]  }
 0x727   :  { %4023 = vrcp.f32 %v2368_v5  ;;  %8242 = vst [vmem:[#allocation39_spill] sm:$0xff] %v6530_v30  ;;  %v6548_v5 = vld [vmem:[%s7435_s4 + $0x68] ss:$16 sps:$4 sm:$0xff]  }
 0x728   :  { %8245 = vst [vmem:[#allocation42_spill] sm:$0xff] %v6548_v5 }
 0x72d   :  { %v4016_v1 = vpop.eup %4015 }
 0x72e   :  { %v4018_v32 = vpop.eup %4017  ;;  %v2372_v36 = vmul.f32 %v4016_v1, %v4014_v6  ;;  %v6518_v6 = vld [vmem:[%s7435_s4 + $0x40] ss:$16 sps:$4 sm:$0xff]   ;;  %v6524_v1 = vld [vmem:[%s7435_s4 + $0x48] ss:$16 sps:$4 sm:$0xff]  }
 0x72f   :  { %v2371_v56 = vmul.f32 %v4018_v32, %v6240_v20  ;;  %v4020_v35 = vpop.eup %4019  ;;  %v8229_v20 = vld [vmem:[#allocation30_spill] sm:$0xff]  ;;  %8240 = vst [vmem:[#allocation37_spill] sm:$0xff] %v6518_v6  ;;  %8241 = vst [vmem:[#allocation38_spill] sm:$0xff] %v6524_v1 }
 0x730   :  { %v4022_v7 = vpop.eup %4021  ;;  %v6536_v32 = vld [vmem:[%s7435_s4 + $0x6c] ss:$16 sps:$4 sm:$0xff]  }
 0x731   :  { %v6420_v28 = vadd.f32 %v2372_v36, %v2371_v56  ;;  %v4024_v21 = vpop.eup %4023  ;;  %v2260_v26 = vmul.f32 %v4022_v7, %v4020_v35  ;;  %8243 = vst [vmem:[#allocation40_spill] sm:$0xff] %v6536_v32  ;;  %v6542_v36 = vld [vmem:[%s7435_s4 + $0x60] ss:$16 sps:$4 sm:$0xff]   ;;  %v6554_v56 = vld [vmem:[%s7435_s4 + $0x84] ss:$16 sps:$4 sm:$0xff]  }
 0x732   :  { %8244 = vst [vmem:[#allocation41_spill] sm:$0xff] %v6542_v36  ;;  %8246 = vst [vmem:[#allocation43_spill] sm:$0xff] %v6554_v56  ;;  %v6560_v35 = vld [vmem:[%s7435_s4 + $0x8c] ss:$16 sps:$4 sm:$0xff]   ;;  %v6566_v7 = vld [vmem:[%s7435_s4 + $0x80] ss:$16 sps:$4 sm:$0xff]  }
 0x733   :  { %4025 = vtanh.f32 %v6420_v28  ;;  %v2376_v31 = vpack.c.bf16 %v2260_v26, %v2260_v26  ;;  %8247 = vst [vmem:[#allocation70_spill] sm:$0xff] %v6560_v35  ;;  %8248 = vst [vmem:[#allocation71_spill] sm:$0xff] %v6566_v7  ;;  %v6584_v26 = vld [vmem:[%s7435_s4 + $0xac] ss:$16 sps:$4 sm:$0xff]  }
 0x734   :  { %8251 = vst [vmem:[#allocation74_spill] sm:$0xff] %v6584_v26 }
 0x73d   :  { %v4026_v22 = vpop.eup %4025 }
 0x73e   :  { %v2375_v4 = vmul.f32 %v4026_v22, %v4024_v21  ;;  %v6572_v21 = vld [vmem:[%s7435_s4 + $0x88] ss:$16 sps:$4 sm:$0xff]   ;;  %v6578_v22 = vld [vmem:[%s7435_s4 + $0xa4] ss:$16 sps:$4 sm:$0xff]  }
 0x73f   :  { %8249 = vst [vmem:[#allocation72_spill] sm:$0xff] %v6572_v21  ;;  %8250 = vst [vmem:[#allocation73_spill] sm:$0xff] %v6578_v22 }
 0x740   :  { %v2377_v24 = vpack.c.bf16 %v2375_v4, %v2375_v4  ;;  %v6590_v4 = vld [vmem:[%s7435_s4 + $0xa0] ss:$16 sps:$4 sm:$0xff]  }
 0x741   :  { %8252 = vst [vmem:[#allocation44_spill] sm:$0xff] %v6590_v4 }
 0x742   :  { %2410 = vmatprep.mubr.bf16.mxu0 %v2377_v24  ;;  %2451 = vmatprep.mubr.bf16.mxu1 %v2377_v24 }
 0x743   :  { %2411 = vmatmul.mubr.bf16.vlgmr.msra.gmra.mrb[64].mxu0 %v2376_v31  ;;  %2452 = vmatmul.mubr.bf16.vlgmr.msra.gmra.mrb[64].mxu1 %v2376_v31  ;;  %v6602_v31 = vld [vmem:[%s7435_s4 + $0xc4] ss:$16 sps:$4 sm:$0xff]  }
 0x744   :  { %2490 = vmatpush1.bf16.msra.mxu0 %v6247_v19  ;;  %2531 = vmatpush1.bf16.msra.mxu1 %v6250_v42  ;;  %8254 = vst [vmem:[#allocation46_spill] sm:$0xff] %v6602_v31 }
 0x745   :  { %2491 = vmatprep.subr.bf16.mxu0 %v6253_v46  ;;  %2532 = vmatprep.subr.bf16.mxu1 %v6256_v17 }
 0x746   :  { %2521 = vmatprep.mubr.bf16.mxu0 %v7939_v44  ;;  %2562 = vmatprep.mubr.bf16.mxu1 %v7939_v44 }
 0x748   :  { %2492 = vmatpush1.bf16.msra.mxu0 %v6261_v18  ;;  %2533 = vmatpush1.bf16.msra.mxu1 %v6264_v37 }
 0x749   :  { %2493 = vmatprep.subr.bf16.mxu0 %v6267_v16  ;;  %2534 = vmatprep.subr.bf16.mxu1 %v6270_v55 }
 0x74c   :  { %2494 = vmatpush1.bf16.msra.mxu0 %v6273_v48  ;;  %2535 = vmatpush1.bf16.msra.mxu1 %v6276_v13 }
 0x74d   :  { %2495 = vmatprep.subr.bf16.mxu0 %v6279_v2  ;;  %2536 = vmatprep.subr.bf16.mxu1 %v6282_v63 }
 0x750   :  { %2496 = vmatpush1.bf16.msra.mxu0 %v6285_v50  ;;  %2537 = vmatpush1.bf16.msra.mxu1 %v6288_v54 }
 0x751   :  { %2497 = vmatprep.subr.bf16.mxu0 %v6291_v62  ;;  %2538 = vmatprep.subr.bf16.mxu1 %v8229_v20 }
 0x754   :  { %2498 = vmatpush1.bf16.msra.mxu0 %v8230_v52  ;;  %2539 = vmatpush1.bf16.msra.mxu1 %v8231_v9 }
 0x755   :  { %2499 = vmatprep.subr.bf16.mxu0 %v8232_v61  ;;  %2540 = vmatprep.subr.bf16.mxu1 %v8233_v41 }
 0x758   :  { %2500 = vmatpush1.bf16.msra.mxu0 %v8234_v51  ;;  %2541 = vmatpush1.bf16.msra.mxu1 %v8235_v53 }
 0x759   :  { %2501 = vmatprep.subr.bf16.mxu0 %v8236_v59  ;;  %2542 = vmatprep.subr.bf16.mxu1 %v8237_v60 }
 0x75c   :  { %2502 = vmatpush1.bf16.msra.mxu0 %v6321_v38  ;;  %2543 = vmatpush1.bf16.msra.mxu1 %v6324_v58 }
 0x75d   :  { %2503 = vmatprep.subr.bf16.mxu0 %v6327_v43  ;;  %2544 = vmatprep.subr.bf16.mxu1 %v6330_v39 }
 0x760   :  { %2504 = vmatpush1.bf16.msra.mxu0 %v6333_v40  ;;  %2545 = vmatpush1.bf16.msra.mxu1 %v6336_v45 }
 0x761   :  { %2601 = vmatprep.subr.bf16.mxu0 %v6458_v47  ;;  %2642 = vmatprep.subr.bf16.mxu1 %v6464_v0 }
 0x763   :  { %2522 = vmatmul.mubr.bf16.vlgmr.msra.gmra.mrb[68].mxu0 %v2377_v24  ;;  %2563 = vmatmul.mubr.bf16.vlgmr.msra.gmra.mrb[68].mxu1 %v2377_v24  ;;  %v6596_v24 = vld [vmem:[%s7435_s4 + $0xa8] ss:$16 sps:$4 sm:$0xff]  }
 0x764   :  { %2602 = vmatpush1.bf16.msra.mxu0 %v6470_v49  ;;  %2643 = vmatpush1.bf16.msra.mxu1 %v6476_v29  ;;  %8253 = vst [vmem:[#allocation45_spill] sm:$0xff] %v6596_v24 }
 0x765   :  { %2603 = vmatprep.subr.bf16.mxu0 %v6482_v3  ;;  %2644 = vmatprep.subr.bf16.mxu1 %v6488_v33 }
 0x768   :  { %2604 = vmatpush1.bf16.msra.mxu0 %v6494_v11  ;;  %2645 = vmatpush1.bf16.msra.mxu1 %v6500_v12 }
 0x769   :  { %2605 = vmatprep.subr.bf16.mxu0 %v6506_v14  ;;  %2646 = vmatprep.subr.bf16.mxu1 %v6512_v15 }
 0x76c   :  { %2606 = vmatpush1.bf16.msra.mxu0 %v6518_v6  ;;  %2647 = vmatpush1.bf16.msra.mxu1 %v6524_v1 }
 0x76d   :  { %2607 = vmatprep.subr.bf16.mxu0 %v6530_v30  ;;  %2648 = vmatprep.subr.bf16.mxu1 %v6536_v32 }
 0x770   :  { %2608 = vmatpush1.bf16.msra.mxu0 %v6542_v36  ;;  %2649 = vmatpush1.bf16.msra.mxu1 %v6548_v5 }
 0x771   :  { %2609 = vmatprep.subr.bf16.mxu0 %v6554_v56  ;;  %2650 = vmatprep.subr.bf16.mxu1 %v6560_v35 }
 0x774   :  { %2610 = vmatpush1.bf16.msra.mxu0 %v6566_v7  ;;  %2651 = vmatpush1.bf16.msra.mxu1 %v6572_v21 }
 0x775   :  { %2611 = vmatprep.subr.bf16.mxu0 %v6578_v22  ;;  %2652 = vmatprep.subr.bf16.mxu1 %v6584_v26  ;;  %v6608_v26 = vld [vmem:[%s7435_s4 + $0xcc] ss:$16 sps:$4 sm:$0xff]  }
 0x776   :  { %8255 = vst [vmem:[#allocation47_spill] sm:$0xff] %v6608_v26 }
 0x778   :  { %2612 = vmatpush1.bf16.msra.mxu0 %v6590_v4  ;;  %2653 = vmatpush1.bf16.msra.mxu1 %v6596_v24  ;;  %v6614_v4 = vld [vmem:[%s7435_s4 + $0xc0] ss:$16 sps:$4 sm:$0xff]   ;;  %v6620_v24 = vld [vmem:[%s7435_s4 + $0xc8] ss:$16 sps:$4 sm:$0xff]  }
 0x779   :  { %2613 = vmatprep.subr.bf16.mxu0 %v6602_v31  ;;  %2654 = vmatprep.subr.bf16.mxu1 %v6608_v26  ;;  %8256 = vst [vmem:[#allocation48_spill] sm:$0xff] %v6614_v4  ;;  %8257 = vst [vmem:[#allocation49_spill] sm:$0xff] %v6620_v24  ;;  %v6626_v31 = vld [vmem:[%s7435_s4 + $0xe4] ss:$16 sps:$4 sm:$0xff]   ;;  %v6632_v26 = vld [vmem:[%s7435_s4 + $0xec] ss:$16 sps:$4 sm:$0xff]  }
 0x77a   :  { %8258 = vst [vmem:[#allocation50_spill] sm:$0xff] %v6626_v31  ;;  %8259 = vst [vmem:[#allocation51_spill] sm:$0xff] %v6632_v26 }
 0x77c   :  { %2614 = vmatpush1.bf16.msra.mxu0 %v6614_v4  ;;  %2655 = vmatpush1.bf16.msra.mxu1 %v6620_v24  ;;  %v6638_v4 = vld [vmem:[%s7435_s4 + $0xe0] ss:$16 sps:$4 sm:$0xff]   ;;  %v6644_v24 = vld [vmem:[%s7435_s4 + $0xe8] ss:$16 sps:$4 sm:$0xff]  }
 0x77d   :  { %2615 = vmatprep.subr.bf16.mxu0 %v6626_v31  ;;  %2656 = vmatprep.subr.bf16.mxu1 %v6632_v26  ;;  %8260 = vst [vmem:[#allocation52_spill] sm:$0xff] %v6638_v4  ;;  %8261 = vst [vmem:[#allocation53_spill] sm:$0xff] %v6644_v24  ;;  %v6650_v31 = vld [vmem:[%s7435_s4 + $0x104] ss:$16 sps:$4 sm:$0xff]   ;;  %v6656_v26 = vld [vmem:[%s7435_s4 + $0x10c] ss:$16 sps:$4 sm:$0xff]  }
 0x77e   :  { %8262 = vst [vmem:[#allocation54_spill] sm:$0xff] %v6650_v31  ;;  %8263 = vst [vmem:[#allocation55_spill] sm:$0xff] %v6656_v26 }
 0x780   :  { %2616 = vmatpush1.bf16.msra.mxu0 %v6638_v4  ;;  %2657 = vmatpush1.bf16.msra.mxu1 %v6644_v24  ;;  %v6662_v4 = vld [vmem:[%s7435_s4 + $0x100] ss:$16 sps:$4 sm:$0xff]   ;;  %v6668_v24 = vld [vmem:[%s7435_s4 + $0x108] ss:$16 sps:$4 sm:$0xff]  }
 0x781   :  { %2617 = vmatprep.subr.bf16.mxu0 %v6650_v31  ;;  %2658 = vmatprep.subr.bf16.mxu1 %v6656_v26  ;;  %8264 = vst [vmem:[#allocation83_spill] sm:$0xff] %v6662_v4  ;;  %8265 = vst [vmem:[#allocation84_spill] sm:$0xff] %v6668_v24  ;;  %v6674_v31 = vld [vmem:[%s7435_s4 + $0x124] ss:$16 sps:$4 sm:$0xff]   ;;  %v6680_v26 = vld [vmem:[%s7435_s4 + $0x12c] ss:$16 sps:$4 sm:$0xff]  }
 0x782   :  { %8266 = vst [vmem:[#allocation85_spill] sm:$0xff] %v6674_v31  ;;  %8267 = vst [vmem:[#allocation86_spill] sm:$0xff] %v6680_v26 }
 0x784   :  { %2618 = vmatpush1.bf16.msra.mxu0 %v6662_v4  ;;  %2659 = vmatpush1.bf16.msra.mxu1 %v6668_v24  ;;  %v6686_v4 = vld [vmem:[%s7435_s4 + $0x120] ss:$16 sps:$4 sm:$0xff]   ;;  %v6692_v24 = vld [vmem:[%s7435_s4 + $0x128] ss:$16 sps:$4 sm:$0xff]  }
 0x785   :  { %2619 = vmatprep.subr.bf16.mxu0 %v6674_v31  ;;  %2660 = vmatprep.subr.bf16.mxu1 %v6680_v26  ;;  %8268 = vst [vmem:[#allocation56_spill] sm:$0xff] %v6686_v4  ;;  %8269 = vst [vmem:[#allocation57_spill] sm:$0xff] %v6692_v24  ;;  %v6698_v31 = vld [vmem:[%s7435_s4 + $0x144] ss:$16 sps:$4 sm:$0xff]   ;;  %v6704_v26 = vld [vmem:[%s7435_s4 + $0x14c] ss:$16 sps:$4 sm:$0xff]  }
 0x786   :  { %8270 = vst [vmem:[#allocation58_spill] sm:$0xff] %v6698_v31  ;;  %8271 = vst [vmem:[#allocation59_spill] sm:$0xff] %v6704_v26 }
 0x788   :  { %2620 = vmatpush1.bf16.msra.mxu0 %v6686_v4  ;;  %2661 = vmatpush1.bf16.msra.mxu1 %v6692_v24  ;;  %v6710_v4 = vld [vmem:[%s7435_s4 + $0x140] ss:$16 sps:$4 sm:$0xff]   ;;  %v6716_v24 = vld [vmem:[%s7435_s4 + $0x148] ss:$16 sps:$4 sm:$0xff]  }
 0x789   :  { %2621 = vmatprep.subr.bf16.mxu0 %v6698_v31  ;;  %2662 = vmatprep.subr.bf16.mxu1 %v6704_v26  ;;  %8272 = vst [vmem:[#allocation60_spill] sm:$0xff] %v6710_v4  ;;  %8273 = vst [vmem:[#allocation61_spill] sm:$0xff] %v6716_v24  ;;  %v6722_v31 = vld [vmem:[%s7435_s4 + $0x164] ss:$16 sps:$4 sm:$0xff]   ;;  %v6728_v26 = vld [vmem:[%s7435_s4 + $0x16c] ss:$16 sps:$4 sm:$0xff]  }
 0x78a   :  { %8274 = vst [vmem:[#allocation62_spill] sm:$0xff] %v6722_v31  ;;  %8275 = vst [vmem:[#allocation63_spill] sm:$0xff] %v6728_v26 }
 0x78c   :  { %2622 = vmatpush1.bf16.msra.mxu0 %v6710_v4  ;;  %2663 = vmatpush1.bf16.msra.mxu1 %v6716_v24  ;;  %v6734_v4 = vld [vmem:[%s7435_s4 + $0x160] ss:$16 sps:$4 sm:$0xff]   ;;  %v6740_v24 = vld [vmem:[%s7435_s4 + $0x168] ss:$16 sps:$4 sm:$0xff]  }
 0x78d   :  { %2623 = vmatprep.subr.bf16.mxu0 %v6722_v31  ;;  %2664 = vmatprep.subr.bf16.mxu1 %v6728_v26  ;;  %8276 = vst [vmem:[#allocation64_spill] sm:$0xff] %v6734_v4  ;;  %8277 = vst [vmem:[#allocation65_spill] sm:$0xff] %v6740_v24  ;;  %v6746_v31 = vld [vmem:[%s7435_s4 + $0x184] ss:$16 sps:$4 sm:$0xff]   ;;  %v6752_v26 = vld [vmem:[%s7435_s4 + $0x18c] ss:$16 sps:$4 sm:$0xff]  }
 0x78e   :  { %8278 = vst [vmem:[#allocation66_spill] sm:$0xff] %v6746_v31  ;;  %8279 = vst [vmem:[#allocation67_spill] sm:$0xff] %v6752_v26 }
 0x790   :  { %2624 = vmatpush1.bf16.msra.mxu0 %v6734_v4  ;;  %2665 = vmatpush1.bf16.msra.mxu1 %v6740_v24  ;;  %v6758_v4 = vld [vmem:[%s7435_s4 + $0x180] ss:$16 sps:$4 sm:$0xff]   ;;  %v6764_v24 = vld [vmem:[%s7435_s4 + $0x188] ss:$16 sps:$4 sm:$0xff]  }
 0x791   :  { %2625 = vmatprep.subr.bf16.mxu0 %v6746_v31  ;;  %2666 = vmatprep.subr.bf16.mxu1 %v6752_v26  ;;  %8280 = vst [vmem:[#allocation68_spill] sm:$0xff] %v6758_v4  ;;  %8281 = vst [vmem:[#allocation69_spill] sm:$0xff] %v6764_v24  ;;  %v6770_v31 = vld [vmem:[%s7435_s4 + $0x1a4] ss:$16 sps:$4 sm:$0xff]   ;;  %v6776_v26 = vld [vmem:[%s7435_s4 + $0x1ac] ss:$16 sps:$4 sm:$0xff]  }
 0x792   :  { %8282 = vst [vmem:[#allocation17_spill] sm:$0xff] %v6770_v31  ;;  %8283 = vst [vmem:[#allocation18_spill] sm:$0xff] %v6776_v26 }
 0x794   :  { %2626 = vmatpush1.bf16.msra.mxu0 %v6758_v4  ;;  %2667 = vmatpush1.bf16.msra.mxu1 %v6764_v24  ;;  %v6782_v4 = vld [vmem:[%s7435_s4 + $0x1a0] ss:$16 sps:$4 sm:$0xff]   ;;  %v6788_v24 = vld [vmem:[%s7435_s4 + $0x1a8] ss:$16 sps:$4 sm:$0xff]  }
 0x795   :  { %2627 = vmatprep.subr.bf16.mxu0 %v6770_v31  ;;  %2668 = vmatprep.subr.bf16.mxu1 %v6776_v26  ;;  %8284 = vst [vmem:[#allocation75_spill] sm:$0xff] %v6782_v4  ;;  %8285 = vst [vmem:[#allocation76_spill] sm:$0xff] %v6788_v24  ;;  %v6794_v31 = vld [vmem:[%s7435_s4 + $0x1c4] ss:$16 sps:$4 sm:$0xff]   ;;  %v6800_v26 = vld [vmem:[%s7435_s4 + $0x1cc] ss:$16 sps:$4 sm:$0xff]  }
 0x796   :  { %8286 = vst [vmem:[#allocation77_spill] sm:$0xff] %v6794_v31  ;;  %8287 = vst [vmem:[#allocation78_spill] sm:$0xff] %v6800_v26 }
 0x798   :  { %2628 = vmatpush1.bf16.msra.mxu0 %v6782_v4  ;;  %2669 = vmatpush1.bf16.msra.mxu1 %v6788_v24  ;;  %v6806_v4 = vld [vmem:[%s7435_s4 + $0x1c0] ss:$16 sps:$4 sm:$0xff]   ;;  %v6812_v24 = vld [vmem:[%s7435_s4 + $0x1c8] ss:$16 sps:$4 sm:$0xff]  }
 0x799   :  { %2629 = vmatprep.subr.bf16.mxu0 %v6794_v31  ;;  %2670 = vmatprep.subr.bf16.mxu1 %v6800_v26  ;;  %8288 = vst [vmem:[#allocation22_spill] sm:$0xff] %v6806_v4  ;;  %8289 = vst [vmem:[#allocation23_spill] sm:$0xff] %v6812_v24  ;;  %v6818_v31 = vld [vmem:[%s7435_s4 + $0x1e4] ss:$16 sps:$4 sm:$0xff]   ;;  %v6824_v26 = vld [vmem:[%s7435_s4 + $0x1ec] ss:$16 sps:$4 sm:$0xff]  }
 0x79a   :  { %8290 = vst [vmem:[#allocation24_spill] sm:$0xff] %v6818_v31  ;;  %8291 = vst [vmem:[#allocation25_spill] sm:$0xff] %v6824_v26 }
 0x79c   :  { %2630 = vmatpush1.bf16.msra.mxu0 %v6806_v4  ;;  %2671 = vmatpush1.bf16.msra.mxu1 %v6812_v24  ;;  %v6830_v4 = vld [vmem:[%s7435_s4 + $0x1e0] ss:$16 sps:$4 sm:$0xff]   ;;  %v6836_v24 = vld [vmem:[%s7435_s4 + $0x1e8] ss:$16 sps:$4 sm:$0xff]  }
 0x79d   :  { %2631 = vmatprep.subr.bf16.mxu0 %v6818_v31  ;;  %2672 = vmatprep.subr.bf16.mxu1 %v6824_v26  ;;  %8292 = vst [vmem:[#allocation26_spill] sm:$0xff] %v6830_v4  ;;  %8293 = vst [vmem:[#allocation27_spill] sm:$0xff] %v6836_v24 }
 0x7a0   :  { %2632 = vmatpush1.bf16.msra.mxu0 %v6830_v4  ;;  %2673 = vmatpush1.bf16.msra.mxu1 %v6836_v24 }
 0x7a1   :  { %2712 = vmatprep.subr.bf16.mxu0 %v8220_v25  ;;  %2753 = vmatprep.subr.bf16.mxu1 %v8221_v27 }
 0x816   :  { %v2412_v31 = vpop.f32.mrb[64].mxu0  ;;  %v2453_v26 = vpop.f32.mrb[64].mxu1 }
 0x817   :  { %v2413_v22 = vadd.f32 %v2412_v31, %v8222_v8  ;;  %v2414_v21 = vpop.f32.mrb[65].mxu0  ;;  %v2455_v7 = vpop.f32.mrb[65].mxu1  ;;  %v2454_v25 = vadd.f32 %v2453_v26, %v8224_v10 }
 0x818   :  { %v2415_v35 = vadd.f32 %v2414_v21, %v8223_v57  ;;  %v2416_v4 = vpop.f32.mrb[66].mxu0  ;;  %v2457_v56 = vpop.f32.mrb[66].mxu1 }
 0x819   :  { %v3614_v5 = vmul.f32 -1.442695, %v2413_v22  ;;  %v2417_v36 = vpop.f32.mrb[67].mxu0  ;;  %v2458_v32 = vpop.f32.mrb[67].mxu1  ;;  %v8295_v22 = vld [vmem:[#allocation92_spill] sm:$0xff] }
 0x81a   :  { %v3615_v30 = vmul.f32 -1.442695, %v2415_v35 }
 0x81b   :  { %4027 = vpow2.f32 %v3614_v5 }
 0x81c   :  { %4029 = vpow2.f32 %v3615_v30  ;;  %v8294_v30 = vld [vmem:[#allocation91_spill] sm:$0xff] }
 0x81d   :  { %4031 = vtanh.f32 %v2454_v25  ;;  %v8296_v25 = vld [vmem:[#allocation93_spill] sm:$0xff] }
 0x825   :  { %v4028_v24 = vpop.eup %4027 }
 0x826   :  { %v4030_v27 = vpop.eup %4029  ;;  %v2463_v1 = vadd.f32 1.0, %v4028_v24 }
 0x827   :  { %v2469_v6 = vadd.f32 1.0, %v4030_v27  ;;  %v4032_v31 = vpop.eup %4031 }
 0x828   :  { %4033 = vrcp.f32 %v2463_v1  ;;  %v8297_v1 = vld [vmem:[#allocation94_spill] sm:$0xff] }
 0x829   :  { %4035 = vrcp.f32 %v2469_v6 }
 0x832   :  { %v4034_v8 = vpop.eup %4033 }
 0x833   :  { %v4036_v21 = vpop.eup %4035  ;;  %v2480_v4 = vmul.f32 %v4034_v8, %v4032_v31 }
 0x834   :  { %v2479_v56 = vmul.f32 %v4036_v21, %v6411_v23  ;;  %v2456_v21 = vadd.f32 %v2455_v7, %v5499_v34 }
 0x836   :  { %v6845_v36 = vadd.f32 %v2480_v4, %v2479_v56  ;;  %v2523_v32 = vpop.f32.mrb[68].mxu0  ;;  %v2564_v5 = vpop.f32.mrb[68].mxu1  ;;  %v3616_v4 = vmul.f32 -1.442695, %v2456_v21 }
 0x837   :  { %v2571_v35 = vadd.f32 %v2523_v32, %v8294_v30  ;;  %v2573_v26 = vadd.f32 %v2564_v5, %v8295_v22  ;;  %v2525_v10 = vpop.f32.mrb[69].mxu0  ;;  %v2566_v24 = vpop.f32.mrb[69].mxu1 }
 0x838   :  { %v2572_v27 = vadd.f32 %v2525_v10, %v8296_v25  ;;  %v2574_v6 = vadd.f32 %v2566_v24, %v8297_v1  ;;  %v2527_v57 = vpop.f32.mrb[70].mxu0  ;;  %v2568_v15 = vpop.f32.mrb[70].mxu1 }
 0x839   :  { %v3617_v14 = vmul.f32 -1.442695, %v2571_v35  ;;  %v2528_v8 = vpop.f32.mrb[71].mxu0  ;;  %v2569_v31 = vpop.f32.mrb[71].mxu1 }
 0x83a   :  { %v3618_v23 = vmul.f32 -1.442695, %v2572_v27  ;;  %v3619_v56 = vmul.f32 -1.442695, %v2574_v6 }
 0x83b   :  { %4037 = vpow2.f32 %v3617_v14 }
 0x83c   :  { %4039 = vpow2.f32 %v3618_v23 }
 0x83d   :  { %4041 = vpow2.f32 %v3616_v4 }
 0x83e   :  { %4043 = vpow2.f32 %v3619_v56 }
 0x83f   :  { %4045 = vtanh.f32 %v2573_v26 }
 0x845   :  { %v4038_v32 = vpop.eup %4037 }
 0x846   :  { %v4040_v5 = vpop.eup %4039  ;;  %v2578_v30 = vadd.f32 1.0, %v4038_v32  ;;  %v8329_v32 = vld [vmem:[#allocation57_spill] sm:$0xff] }
 0x847   :  { %v2584_v10 = vadd.f32 1.0, %v4040_v5  ;;  %v4042_v57 = vpop.eup %4041  ;;  %v8330_v5 = vld [vmem:[#allocation58_spill] sm:$0xff] }
 0x848   :  { %4047 = vrcp.f32 %v2578_v30  ;;  %v4044_v15 = vpop.eup %4043  ;;  %v2476_v24 = vadd.f32 1.0, %v4042_v57  ;;  %v8331_v30 = vld [vmem:[#allocation59_spill] sm:$0xff]  ;;  %v8333_v57 = vld [vmem:[#allocation61_spill] sm:$0xff] }
 0x849   :  { %4049 = vrcp.f32 %v2584_v10  ;;  %v4046_v35 = vpop.eup %4045  ;;  %v2591_v27 = vadd.f32 1.0, %v4044_v15  ;;  %v8332_v10 = vld [vmem:[#allocation60_spill] sm:$0xff]  ;;  %v8334_v15 = vld [vmem:[#allocation62_spill] sm:$0xff] }
 0x84a   :  { %4051 = vtanh.f32 %v6845_v36 }
 0x84b   :  { %4053 = vrcp.f32 %v2476_v24  ;;  %v8337_v24 = vld [vmem:[#allocation65_spill] sm:$0xff] }
 0x84c   :  { %4055 = vrcp.f32 %v2591_v27  ;;  %v8340_v27 = vld [vmem:[#allocation68_spill] sm:$0xff] }
 0x852   :  { %v4048_v22 = vpop.eup %4047 }
 0x853   :  { %v4050_v14 = vpop.eup %4049  ;;  %v2595_v25 = vmul.f32 %v4048_v22, %v4046_v35  ;;  %v8335_v35 = vld [vmem:[#allocation63_spill] sm:$0xff]  ;;  %v8336_v22 = vld [vmem:[#allocation64_spill] sm:$0xff] }
 0x854   :  { %v2594_v7 = vmul.f32 %v4050_v14, %v6420_v28  ;;  %v4052_v26 = vpop.eup %4051  ;;  %v8319_v28 = vld [vmem:[#allocation51_spill] sm:$0xff]  ;;  %v8338_v14 = vld [vmem:[#allocation66_spill] sm:$0xff] }
 0x855   :  { %v4054_v6 = vpop.eup %4053 }
 0x856   :  { %v6854_v1 = vadd.f32 %v2595_v25, %v2594_v7  ;;  %v4056_v8 = vpop.eup %4055  ;;  %v2483_v23 = vmul.f32 %v4054_v6, %v4052_v26  ;;  %v8339_v25 = vld [vmem:[#allocation67_spill] sm:$0xff]  ;;  %v8341_v7 = vld [vmem:[#allocation69_spill] sm:$0xff]  ;;  %v8343_v6 = vld [vmem:[#allocation18_spill] sm:$0xff] }
 0x857   :  { %v8342_v26 = vld [vmem:[#allocation17_spill] sm:$0xff] }
 0x858   :  { %4057 = vtanh.f32 %v6854_v1  ;;  %v2599_v56 = vpack.c.bf16 %v2483_v23, %v2483_v23  ;;  %v8346_v23 = vld [vmem:[#allocation77_spill] sm:$0xff] }
 0x862   :  { %v4058_v31 = vpop.eup %4057 }
 0x863   :  { %v2598_v21 = vmul.f32 %v4058_v31, %v4056_v8  ;;  %v8344_v8 = vld [vmem:[#allocation75_spill] sm:$0xff]  ;;  %v8345_v31 = vld [vmem:[#allocation76_spill] sm:$0xff] }
 0x865   :  { %v2600_v4 = vpack.c.bf16 %v2598_v21, %v2598_v21  ;;  %v8347_v21 = vld [vmem:[#allocation78_spill] sm:$0xff] }
 0x867   :  { %2633 = vmatprep.mubr.bf16.mxu0 %v2600_v4  ;;  %2674 = vmatprep.mubr.bf16.mxu1 %v2600_v4 }
 0x868   :  { %2634 = vmatmul.mubr.bf16.vlgmr.msra.gmra.mrb[72].mxu0 %v2599_v56  ;;  %2675 = vmatmul.mubr.bf16.vlgmr.msra.gmra.mrb[72].mxu1 %v2599_v56  ;;  %v8349_v56 = vld [vmem:[#allocation23_spill] sm:$0xff] }
 0x869   :  { %2713 = vmatpush1.bf16.msra.mxu0 %v6247_v19  ;;  %2754 = vmatpush1.bf16.msra.mxu1 %v6250_v42  ;;  %v8298_v19 = vld [vmem:[#allocation35_spill] sm:$0xff]  ;;  %v8299_v42 = vld [vmem:[#allocation36_spill] sm:$0xff] }
 0x86a   :  { %2714 = vmatprep.subr.bf16.mxu0 %v6253_v46  ;;  %2755 = vmatprep.subr.bf16.mxu1 %v6256_v17  ;;  %v8300_v46 = vld [vmem:[#allocation37_spill] sm:$0xff]  ;;  %v8301_v17 = vld [vmem:[#allocation38_spill] sm:$0xff] }
 0x86b   :  { %2744 = vmatprep.mubr.bf16.mxu0 %v7939_v44  ;;  %2785 = vmatprep.mubr.bf16.mxu1 %v7939_v44 }
 0x86d   :  { %2715 = vmatpush1.bf16.msra.mxu0 %v6261_v18  ;;  %2756 = vmatpush1.bf16.msra.mxu1 %v6264_v37  ;;  %v8302_v18 = vld [vmem:[#allocation39_spill] sm:$0xff]  ;;  %v8303_v37 = vld [vmem:[#allocation40_spill] sm:$0xff] }
 0x86e   :  { %2716 = vmatprep.subr.bf16.mxu0 %v6267_v16  ;;  %2757 = vmatprep.subr.bf16.mxu1 %v6270_v55  ;;  %v8304_v16 = vld [vmem:[#allocation41_spill] sm:$0xff]  ;;  %v8305_v55 = vld [vmem:[#allocation42_spill] sm:$0xff] }
 0x871   :  { %2717 = vmatpush1.bf16.msra.mxu0 %v6273_v48  ;;  %2758 = vmatpush1.bf16.msra.mxu1 %v6276_v13  ;;  %v8306_v48 = vld [vmem:[#allocation43_spill] sm:$0xff]  ;;  %v8307_v13 = vld [vmem:[#allocation70_spill] sm:$0xff] }
 0x872   :  { %2718 = vmatprep.subr.bf16.mxu0 %v6279_v2  ;;  %2759 = vmatprep.subr.bf16.mxu1 %v6282_v63  ;;  %v8308_v2 = vld [vmem:[#allocation71_spill] sm:$0xff]  ;;  %v8309_v63 = vld [vmem:[#allocation72_spill] sm:$0xff] }
 0x875   :  { %2719 = vmatpush1.bf16.msra.mxu0 %v6285_v50  ;;  %2760 = vmatpush1.bf16.msra.mxu1 %v6288_v54  ;;  %v8310_v50 = vld [vmem:[#allocation73_spill] sm:$0xff]  ;;  %v8311_v54 = vld [vmem:[#allocation74_spill] sm:$0xff] }
 0x876   :  { %2720 = vmatprep.subr.bf16.mxu0 %v6291_v62  ;;  %2761 = vmatprep.subr.bf16.mxu1 %v8229_v20  ;;  %v8312_v62 = vld [vmem:[#allocation44_spill] sm:$0xff] }
 0x877   :  { %v8320_v20 = vld [vmem:[#allocation52_spill] sm:$0xff] }
 0x879   :  { %2721 = vmatpush1.bf16.msra.mxu0 %v8230_v52  ;;  %2762 = vmatpush1.bf16.msra.mxu1 %v8231_v9  ;;  %v8321_v52 = vld [vmem:[#allocation53_spill] sm:$0xff]  ;;  %v8322_v9 = vld [vmem:[#allocation54_spill] sm:$0xff] }
 0x87a   :  { %2722 = vmatprep.subr.bf16.mxu0 %v8232_v61  ;;  %2763 = vmatprep.subr.bf16.mxu1 %v8233_v41  ;;  %v8323_v61 = vld [vmem:[#allocation55_spill] sm:$0xff] }
 0x87b   :  { %v8324_v41 = vld [vmem:[#allocation83_spill] sm:$0xff] }
 0x87d   :  { %2723 = vmatpush1.bf16.msra.mxu0 %v8234_v51  ;;  %2764 = vmatpush1.bf16.msra.mxu1 %v8235_v53  ;;  %v8325_v51 = vld [vmem:[#allocation84_spill] sm:$0xff]  ;;  %v8326_v53 = vld [vmem:[#allocation85_spill] sm:$0xff] }
 0x87e   :  { %2724 = vmatprep.subr.bf16.mxu0 %v8236_v59  ;;  %2765 = vmatprep.subr.bf16.mxu1 %v8237_v60  ;;  %v8327_v59 = vld [vmem:[#allocation86_spill] sm:$0xff]  ;;  %v8328_v60 = vld [vmem:[#allocation56_spill] sm:$0xff] }
 0x881   :  { %2725 = vmatpush1.bf16.msra.mxu0 %v6321_v38  ;;  %2766 = vmatpush1.bf16.msra.mxu1 %v6324_v58  ;;  %v8316_v38 = vld [vmem:[#allocation48_spill] sm:$0xff]  ;;  %v8317_v58 = vld [vmem:[#allocation49_spill] sm:$0xff] }
 0x882   :  { %2726 = vmatprep.subr.bf16.mxu0 %v6327_v43  ;;  %2767 = vmatprep.subr.bf16.mxu1 %v6330_v39  ;;  %v8313_v39 = vld [vmem:[#allocation45_spill] sm:$0xff]  ;;  %v8318_v43 = vld [vmem:[#allocation50_spill] sm:$0xff] }
 0x885   :  { %2727 = vmatpush1.bf16.msra.mxu0 %v6333_v40  ;;  %2768 = vmatpush1.bf16.msra.mxu1 %v6336_v45  ;;  %v8314_v40 = vld [vmem:[#allocation46_spill] sm:$0xff]  ;;  %v8315_v45 = vld [vmem:[#allocation47_spill] sm:$0xff] }
 0x886   :  { %2824 = vmatprep.subr.bf16.mxu0 %v6458_v47  ;;  %2865 = vmatprep.subr.bf16.mxu1 %v6464_v0 }
 0x888   :  { %2745 = vmatmul.mubr.bf16.vlgmr.msra.gmra.mrb[76].mxu0 %v2600_v4  ;;  %2786 = vmatmul.mubr.bf16.vlgmr.msra.gmra.mrb[76].mxu1 %v2600_v4  ;;  %v8348_v4 = vld [vmem:[#allocation22_spill] sm:$0xff] }
 0x889   :  { %2825 = vmatpush1.bf16.msra.mxu0 %v6470_v49  ;;  %2866 = vmatpush1.bf16.msra.mxu1 %v6476_v29 }
 0x88a   :  { %2826 = vmatprep.subr.bf16.mxu0 %v6482_v3  ;;  %2867 = vmatprep.subr.bf16.mxu1 %v6488_v33 }
 0x88d   :  { %2827 = vmatpush1.bf16.msra.mxu0 %v6494_v11  ;;  %2868 = vmatpush1.bf16.msra.mxu1 %v6500_v12 }
 0x88e   :  { %2828 = vmatprep.subr.bf16.mxu0 %v8298_v19  ;;  %2869 = vmatprep.subr.bf16.mxu1 %v8299_v42 }
 0x891   :  { %2829 = vmatpush1.bf16.msra.mxu0 %v8300_v46  ;;  %2870 = vmatpush1.bf16.msra.mxu1 %v8301_v17 }
 0x892   :  { %2830 = vmatprep.subr.bf16.mxu0 %v8302_v18  ;;  %2871 = vmatprep.subr.bf16.mxu1 %v8303_v37 }
 0x895   :  { %2831 = vmatpush1.bf16.msra.mxu0 %v8304_v16  ;;  %2872 = vmatpush1.bf16.msra.mxu1 %v8305_v55 }
 0x896   :  { %2832 = vmatprep.subr.bf16.mxu0 %v8306_v48  ;;  %2873 = vmatprep.subr.bf16.mxu1 %v8307_v13 }
 0x899   :  { %2833 = vmatpush1.bf16.msra.mxu0 %v8308_v2  ;;  %2874 = vmatpush1.bf16.msra.mxu1 %v8309_v63 }
 0x89a   :  { %2834 = vmatprep.subr.bf16.mxu0 %v8310_v50  ;;  %2875 = vmatprep.subr.bf16.mxu1 %v8311_v54 }
 0x89d   :  { %2835 = vmatpush1.bf16.msra.mxu0 %v8312_v62  ;;  %2876 = vmatpush1.bf16.msra.mxu1 %v8313_v39 }
 0x89e   :  { %2836 = vmatprep.subr.bf16.mxu0 %v8314_v40  ;;  %2877 = vmatprep.subr.bf16.mxu1 %v8315_v45 }
 0x8a1   :  { %2837 = vmatpush1.bf16.msra.mxu0 %v8316_v38  ;;  %2878 = vmatpush1.bf16.msra.mxu1 %v8317_v58 }
 0x8a2   :  { %2838 = vmatprep.subr.bf16.mxu0 %v8318_v43  ;;  %2879 = vmatprep.subr.bf16.mxu1 %v8319_v28 }
 0x8a5   :  { %2839 = vmatpush1.bf16.msra.mxu0 %v8320_v20  ;;  %2880 = vmatpush1.bf16.msra.mxu1 %v8321_v52 }
 0x8a6   :  { %2840 = vmatprep.subr.bf16.mxu0 %v8322_v9  ;;  %2881 = vmatprep.subr.bf16.mxu1 %v8323_v61 }
 0x8a9   :  { %2841 = vmatpush1.bf16.msra.mxu0 %v8324_v41  ;;  %2882 = vmatpush1.bf16.msra.mxu1 %v8325_v51 }
 0x8aa   :  { %2842 = vmatprep.subr.bf16.mxu0 %v8326_v53  ;;  %2883 = vmatprep.subr.bf16.mxu1 %v8327_v59 }
 0x8ad   :  { %2843 = vmatpush1.bf16.msra.mxu0 %v8328_v60  ;;  %2884 = vmatpush1.bf16.msra.mxu1 %v8329_v32 }
 0x8ae   :  { %2844 = vmatprep.subr.bf16.mxu0 %v8330_v5  ;;  %2885 = vmatprep.subr.bf16.mxu1 %v8331_v30 }
 0x8b1   :  { %2845 = vmatpush1.bf16.msra.mxu0 %v8332_v10  ;;  %2886 = vmatpush1.bf16.msra.mxu1 %v8333_v57 }
 0x8b2   :  { %2846 = vmatprep.subr.bf16.mxu0 %v8334_v15  ;;  %2887 = vmatprep.subr.bf16.mxu1 %v8335_v35 }
 0x8b5   :  { %2847 = vmatpush1.bf16.msra.mxu0 %v8336_v22  ;;  %2888 = vmatpush1.bf16.msra.mxu1 %v8337_v24 }
 0x8b6   :  { %2848 = vmatprep.subr.bf16.mxu0 %v8338_v14  ;;  %2889 = vmatprep.subr.bf16.mxu1 %v8339_v25  ;;  %v8350_v25 = vld [vmem:[#allocation24_spill] sm:$0xff] }
 0x8b7   :  { %v8357_v14 = vld [vmem:[#allocation20_spill] sm:$0xff] }
 0x8b9   :  { %2849 = vmatpush1.bf16.msra.mxu0 %v8340_v27  ;;  %2890 = vmatpush1.bf16.msra.mxu1 %v8341_v7  ;;  %v8351_v27 = vld [vmem:[#allocation25_spill] sm:$0xff]  ;;  %v8352_v7 = vld [vmem:[#allocation26_spill] sm:$0xff] }
 0x8ba   :  { %2850 = vmatprep.subr.bf16.mxu0 %v8342_v26  ;;  %2891 = vmatprep.subr.bf16.mxu1 %v8343_v6  ;;  %v8353_v26 = vld [vmem:[#allocation27_spill] sm:$0xff] }
 0x8bb   :  { %v6953_v6 = vld [vmem:[#allocation7 + $0x4] ss:$16 sps:$4 sm:$0xff]  }
 0x8bc   :  { %8354 = vst [vmem:[#allocation28_spill] sm:$0xff] %v6953_v6 }
 0x8bd   :  { %2851 = vmatpush1.bf16.msra.mxu0 %v8344_v8  ;;  %2892 = vmatpush1.bf16.msra.mxu1 %v8345_v31  ;;  %v6956_v31 = vld [vmem:[#allocation7 + $0xc] ss:$16 sps:$4 sm:$0xff]  }
 0x8be   :  { %2852 = vmatprep.subr.bf16.mxu0 %v8346_v23  ;;  %2893 = vmatprep.subr.bf16.mxu1 %v8347_v21  ;;  %8355 = vst [vmem:[#allocation29_spill] sm:$0xff] %v6956_v31  ;;  %v8356_v23 = vld [vmem:[#allocation19_spill] sm:$0xff] }
 0x8c1   :  { %2853 = vmatpush1.bf16.msra.mxu0 %v8348_v4  ;;  %2894 = vmatpush1.bf16.msra.mxu1 %v8349_v56 }
 0x8c2   :  { %2854 = vmatprep.subr.bf16.mxu0 %v8350_v25  ;;  %2895 = vmatprep.subr.bf16.mxu1 %v8351_v27 }
 0x8c5   :  { %2855 = vmatpush1.bf16.msra.mxu0 %v8352_v7  ;;  %2896 = vmatpush1.bf16.msra.mxu1 %v8353_v26 }
 0x8c6   :  { %2935 = vmatprep.subr.bf16.mxu0 %v6953_v6  ;;  %2976 = vmatprep.subr.bf16.mxu1 %v6956_v31  ;;  %v8358_v6 = vld [vmem:[#allocation21_spill] sm:$0xff] }
 0x93b   :  { %v2635_v21 = vpop.f32.mrb[72].mxu0  ;;  %v2676_v4 = vpop.f32.mrb[72].mxu1 }
 0x93c   :  { %v2636_v56 = vadd.f32 %v2635_v21, %v8356_v23  ;;  %v2637_v8 = vpop.f32.mrb[73].mxu0  ;;  %v2678_v25 = vpop.f32.mrb[73].mxu1  ;;  %v2677_v57 = vadd.f32 %v2676_v4, %v8358_v6  ;;  %v8360_v4 = vld [vmem:[#allocation96_spill] sm:$0xff] }
 0x93d   :  { %v2638_v27 = vadd.f32 %v2637_v8, %v8357_v14  ;;  %v2639_v24 = vpop.f32.mrb[74].mxu0  ;;  %v2680_v7 = vpop.f32.mrb[74].mxu1 }
 0x93e   :  { %v3620_v22 = vmul.f32 -1.442695, %v2636_v56  ;;  %v2640_v26 = vpop.f32.mrb[75].mxu0  ;;  %v2681_v35 = vpop.f32.mrb[75].mxu1 }
 0x93f   :  { %v3621_v15 = vmul.f32 -1.442695, %v2638_v27 }
 0x940   :  { %4059 = vpow2.f32 %v3620_v22 }
 0x941   :  { %4061 = vpow2.f32 %v3621_v15  ;;  %v8359_v15 = vld [vmem:[#allocation95_spill] sm:$0xff] }
 0x942   :  { %4063 = vtanh.f32 %v2677_v57  ;;  %v8361_v57 = vld [vmem:[#allocation97_spill] sm:$0xff] }
 0x94a   :  { %v4060_v10 = vpop.eup %4059 }
 0x94b   :  { %v4062_v31 = vpop.eup %4061  ;;  %v2686_v30 = vadd.f32 1.0, %v4060_v10 }
 0x94c   :  { %v2692_v5 = vadd.f32 1.0, %v4062_v31  ;;  %v4064_v21 = vpop.eup %4063 }
 0x94d   :  { %4065 = vrcp.f32 %v2686_v30  ;;  %v8362_v30 = vld [vmem:[#allocation98_spill] sm:$0xff] }
 0x94e   :  { %4067 = vrcp.f32 %v2692_v5 }
 0x957   :  { %v4066_v23 = vpop.eup %4065 }
 0x958   :  { %v4068_v8 = vpop.eup %4067  ;;  %v2703_v24 = vmul.f32 %v4066_v23, %v4064_v21 }
 0x959   :  { %v2702_v7 = vmul.f32 %v4068_v8, %v6845_v36  ;;  %v2679_v8 = vadd.f32 %v2678_v25, %v5499_v34 }
 0x95b   :  { %v6963_v26 = vadd.f32 %v2703_v24, %v2702_v7  ;;  %v2746_v35 = vpop.f32.mrb[76].mxu0  ;;  %v2787_v22 = vpop.f32.mrb[76].mxu1  ;;  %v3622_v24 = vmul.f32 -1.442695, %v2679_v8 }
 0x95c   :  { %v2794_v27 = vadd.f32 %v2746_v35, %v8359_v15  ;;  %v2796_v56 = vadd.f32 %v2787_v22, %v8360_v4  ;;  %v2748_v6 = vpop.f32.mrb[77].mxu0  ;;  %v2789_v10 = vpop.f32.mrb[77].mxu1 }
 0x95d   :  { %v2795_v31 = vadd.f32 %v2748_v6, %v8361_v57  ;;  %v2797_v5 = vadd.f32 %v2789_v10, %v8362_v30  ;;  %v2750_v14 = vpop.f32.mrb[78].mxu0  ;;  %v2791_v32 = vpop.f32.mrb[78].mxu1 }
 0x95e   :  { %v3623_v60 = vmul.f32 -1.442695, %v2794_v27  ;;  %v2751_v23 = vpop.f32.mrb[79].mxu0  ;;  %v2792_v21 = vpop.f32.mrb[79].mxu1 }
 0x95f   :  { %v3624_v36 = vmul.f32 -1.442695, %v2795_v31  ;;  %v3625_v7 = vmul.f32 -1.442695, %v2797_v5 }
 0x960   :  { %4069 = vpow2.f32 %v3623_v60 }
 0x961   :  { %4071 = vpow2.f32 %v3624_v36 }
 0x962   :  { %4073 = vpow2.f32 %v3622_v24 }
 0x963   :  { %4075 = vpow2.f32 %v3625_v7 }
 0x964   :  { %4077 = vtanh.f32 %v2796_v56 }
 0x96a   :  { %v4070_v35 = vpop.eup %4069 }
 0x96b   :  { %v4072_v22 = vpop.eup %4071  ;;  %v2801_v15 = vadd.f32 1.0, %v4070_v35  ;;  %v6982_v35 = vld [vmem:[#allocation7 + $0x8] ss:$16 sps:$4 sm:$0xff]  }
 0x96c   :  { %v2807_v6 = vadd.f32 1.0, %v4072_v22  ;;  %v4074_v32 = vpop.eup %4073  ;;  %v6985_v22 = vld [vmem:[#allocation7 + $0x24] ss:$16 sps:$4 sm:$0xff]  }
 0x96d   :  { %4079 = vrcp.f32 %v2801_v15  ;;  %v4076_v14 = vpop.eup %4075  ;;  %v2699_v10 = vadd.f32 1.0, %v4074_v32  ;;  %v6988_v15 = vld [vmem:[#allocation7 + $0x2c] ss:$16 sps:$4 sm:$0xff]   ;;  %v6996_v32 = vld [vmem:[#allocation7 + $0x28] ss:$16 sps:$4 sm:$0xff]  }
 0x96e   :  { %4081 = vrcp.f32 %v2807_v6  ;;  %v4078_v27 = vpop.eup %4077  ;;  %v2814_v31 = vadd.f32 1.0, %v4076_v14  ;;  %v6993_v6 = vld [vmem:[#allocation7 + $0x20] ss:$16 sps:$4 sm:$0xff]   ;;  %v6999_v14 = vld [vmem:[#allocation7 + $0x44] ss:$16 sps:$4 sm:$0xff]  }
 0x96f   :  { %4083 = vtanh.f32 %v6963_v26 }
 0x970   :  { %4085 = vrcp.f32 %v2699_v10  ;;  %v7008_v10 = vld [vmem:[#allocation7 + $0x48] ss:$16 sps:$4 sm:$0xff]  }
 0x971   :  { %4087 = vrcp.f32 %v2814_v31  ;;  %v7017_v31 = vld [vmem:[#allocation7 + $0x60] ss:$16 sps:$4 sm:$0xff]  }
 0x977   :  { %v4080_v4 = vpop.eup %4079 }
 0x978   :  { %v4082_v60 = vpop.eup %4081  ;;  %v2818_v57 = vmul.f32 %v4080_v4, %v4078_v27  ;;  %v7002_v27 = vld [vmem:[#allocation7 + $0x4c] ss:$16 sps:$4 sm:$0xff]   ;;  %v7005_v4 = vld [vmem:[#allocation7 + $0x40] ss:$16 sps:$4 sm:$0xff]  }
 0x979   :  { %v2817_v25 = vmul.f32 %v4082_v60, %v6854_v1  ;;  %v4084_v56 = vpop.eup %4083  ;;  %v6979_v1 = vld [vmem:[#allocation7] ss:$16 sps:$4 sm:$0xff]   ;;  %v7011_v60 = vld [vmem:[#allocation7 + $0x64] ss:$16 sps:$4 sm:$0xff]  }
 0x97a   :  { %v4086_v5 = vpop.eup %4085 }
 0x97b   :  { %v6972_v30 = vadd.f32 %v2818_v57, %v2817_v25  ;;  %v4088_v23 = vpop.eup %4087  ;;  %v2706_v36 = vmul.f32 %v4086_v5, %v4084_v56  ;;  %v7014_v57 = vld [vmem:[#allocation7 + $0x6c] ss:$16 sps:$4 sm:$0xff]   ;;  %v7020_v25 = vld [vmem:[#allocation7 + $0x68] ss:$16 sps:$4 sm:$0xff]   ;;  %v7023_v56 = vld [vmem:[#allocation7 + $0x84] ss:$16 sps:$4 sm:$0xff]  }
 0x97c   :  { %v7026_v5 = vld [vmem:[#allocation7 + $0x8c] ss:$16 sps:$4 sm:$0xff]  }
 0x97d   :  { %4089 = vtanh.f32 %v6972_v30  ;;  %v2822_v7 = vpack.c.bf16 %v2706_v36, %v2706_v36  ;;  %8363 = vst [vmem:[#allocation87_spill] sm:$0xff] %v7026_v5  ;;  %v7035_v36 = vld [vmem:[#allocation7 + $0xa4] ss:$16 sps:$4 sm:$0xff]  }
 0x97e   :  { %8366 = vst [vmem:[#allocation90_spill] sm:$0xff] %v7035_v36 }
 0x987   :  { %v4090_v21 = vpop.eup %4089 }
 0x988   :  { %v2821_v8 = vmul.f32 %v4090_v21, %v4088_v23  ;;  %v7029_v23 = vld [vmem:[#allocation7 + $0x80] ss:$16 sps:$4 sm:$0xff]   ;;  %v7032_v21 = vld [vmem:[#allocation7 + $0x88] ss:$16 sps:$4 sm:$0xff]  }
 0x989   :  { %8364 = vst [vmem:[#allocation88_spill] sm:$0xff] %v7029_v23  ;;  %8365 = vst [vmem:[#allocation89_spill] sm:$0xff] %v7032_v21 }
 0x98a   :  { %v6975_v24 = vpack.c.bf16 %v2821_v8, %v2821_v8  ;;  %v7038_v8 = vld [vmem:[#allocation7 + $0xac] ss:$16 sps:$4 sm:$0xff]  }
 0x98b   :  { %8367 = vst [vmem:[#allocation30_spill] sm:$0xff] %v7038_v8 }
 0x98c   :  { %2856 = vmatprep.mubr.bf16.mxu0 %v6975_v24  ;;  %2897 = vmatprep.mubr.bf16.mxu1 %v6975_v24 }
 0x98d   :  { %2857 = vmatmul.mubr.bf16.vlgmr.msra.gmra.mrb[80].mxu0 %v2822_v7  ;;  %2898 = vmatmul.mubr.bf16.vlgmr.msra.gmra.mrb[80].mxu1 %v2822_v7  ;;  %v7041_v7 = vld [vmem:[#allocation7 + $0xa0] ss:$16 sps:$4 sm:$0xff]  }
 0x98e   :  { %2936 = vmatpush1.bf16.msra.mxu0 %v6979_v1  ;;  %2977 = vmatpush1.bf16.msra.mxu1 %v6982_v35  ;;  %8368 = vst [vmem:[#allocation79_spill] sm:$0xff] %v7041_v7 }
 0x98f   :  { %2937 = vmatprep.subr.bf16.mxu0 %v6985_v22  ;;  %2978 = vmatprep.subr.bf16.mxu1 %v6988_v15 }
 0x990   :  { %2967 = vmatprep.mubr.bf16.mxu0 %v7939_v44  ;;  %3008 = vmatprep.mubr.bf16.mxu1 %v7939_v44 }
 0x992   :  { %2938 = vmatpush1.bf16.msra.mxu0 %v6993_v6  ;;  %2979 = vmatpush1.bf16.msra.mxu1 %v6996_v32 }
 0x993   :  { %2939 = vmatprep.subr.bf16.mxu0 %v6999_v14  ;;  %2980 = vmatprep.subr.bf16.mxu1 %v7002_v27 }
 0x996   :  { %2940 = vmatpush1.bf16.msra.mxu0 %v7005_v4  ;;  %2981 = vmatpush1.bf16.msra.mxu1 %v7008_v10 }
 0x997   :  { %2941 = vmatprep.subr.bf16.mxu0 %v7011_v60  ;;  %2982 = vmatprep.subr.bf16.mxu1 %v7014_v57 }
 0x99a   :  { %2942 = vmatpush1.bf16.msra.mxu0 %v7017_v31  ;;  %2983 = vmatpush1.bf16.msra.mxu1 %v7020_v25 }
 0x99b   :  { %2943 = vmatprep.subr.bf16.mxu0 %v7023_v56  ;;  %2984 = vmatprep.subr.bf16.mxu1 %v7026_v5  ;;  %v7044_v5 = vld [vmem:[#allocation7 + $0xa8] ss:$16 sps:$4 sm:$0xff]  }
 0x99c   :  { %8369 = vst [vmem:[#allocation80_spill] sm:$0xff] %v7044_v5 }
 0x99e   :  { %2944 = vmatpush1.bf16.msra.mxu0 %v7029_v23  ;;  %2985 = vmatpush1.bf16.msra.mxu1 %v7032_v21  ;;  %v7047_v23 = vld [vmem:[#allocation7 + $0xc4] ss:$16 sps:$4 sm:$0xff]   ;;  %v7050_v21 = vld [vmem:[#allocation7 + $0xcc] ss:$16 sps:$4 sm:$0xff]  }
 0x99f   :  { %2945 = vmatprep.subr.bf16.mxu0 %v7035_v36  ;;  %2986 = vmatprep.subr.bf16.mxu1 %v7038_v8  ;;  %8370 = vst [vmem:[#allocation81_spill] sm:$0xff] %v7047_v23  ;;  %8371 = vst [vmem:[#allocation82_spill] sm:$0xff] %v7050_v21  ;;  %v7053_v36 = vld [vmem:[#allocation7 + $0xc0] ss:$16 sps:$4 sm:$0xff]   ;;  %v7056_v8 = vld [vmem:[#allocation7 + $0xc8] ss:$16 sps:$4 sm:$0xff]  }
 0x9a2   :  { %2946 = vmatpush1.bf16.msra.mxu0 %v7041_v7  ;;  %2987 = vmatpush1.bf16.msra.mxu1 %v7044_v5  ;;  %v7059_v7 = vld [vmem:[#allocation7 + $0xe4] ss:$16 sps:$4 sm:$0xff]   ;;  %v7062_v5 = vld [vmem:[#allocation7 + $0xec] ss:$16 sps:$4 sm:$0xff]  }
 0x9a3   :  { %2947 = vmatprep.subr.bf16.mxu0 %v7047_v23  ;;  %2988 = vmatprep.subr.bf16.mxu1 %v7050_v21  ;;  %v7065_v23 = vld [vmem:[#allocation7 + $0xe0] ss:$16 sps:$4 sm:$0xff]   ;;  %v7068_v21 = vld [vmem:[#allocation7 + $0xe8] ss:$16 sps:$4 sm:$0xff]  }
 0x9a6   :  { %2948 = vmatpush1.bf16.msra.mxu0 %v7053_v36  ;;  %2989 = vmatpush1.bf16.msra.mxu1 %v7056_v8 }
 0x9a7   :  { %2949 = vmatprep.subr.bf16.mxu0 %v7059_v7  ;;  %2990 = vmatprep.subr.bf16.mxu1 %v7062_v5 }
 0x9aa   :  { %2950 = vmatpush1.bf16.msra.mxu0 %v7065_v23  ;;  %2991 = vmatpush1.bf16.msra.mxu1 %v7068_v21 }
 0x9ab   :  { %3047 = vmatprep.subr.bf16.mxu0 %v6458_v47  ;;  %3088 = vmatprep.subr.bf16.mxu1 %v6464_v0  ;;  %v8372_v47 = vld [vmem:[#allocation56_spill] sm:$0xff]  ;;  %v8373_v0 = vld [vmem:[#allocation57_spill] sm:$0xff] }
 0x9ad   :  { %2968 = vmatmul.mubr.bf16.vlgmr.msra.gmra.mrb[84].mxu0 %v6975_v24  ;;  %3009 = vmatmul.mubr.bf16.vlgmr.msra.gmra.mrb[84].mxu1 %v6975_v24 }
 0x9ae   :  { %3048 = vmatpush1.bf16.msra.mxu0 %v6470_v49  ;;  %3089 = vmatpush1.bf16.msra.mxu1 %v6476_v29  ;;  %v8374_v49 = vld [vmem:[#allocation58_spill] sm:$0xff]  ;;  %v8375_v29 = vld [vmem:[#allocation59_spill] sm:$0xff] }
 0x9af   :  { %3049 = vmatprep.subr.bf16.mxu0 %v6482_v3  ;;  %3090 = vmatprep.subr.bf16.mxu1 %v6488_v33  ;;  %v8376_v3 = vld [vmem:[#allocation60_spill] sm:$0xff]  ;;  %v8377_v33 = vld [vmem:[#allocation61_spill] sm:$0xff] }
 0x9b2   :  { %3050 = vmatpush1.bf16.msra.mxu0 %v6494_v11  ;;  %3091 = vmatpush1.bf16.msra.mxu1 %v6500_v12  ;;  %v8378_v11 = vld [vmem:[#allocation62_spill] sm:$0xff]  ;;  %v8379_v12 = vld [vmem:[#allocation63_spill] sm:$0xff] }
 0x9b3   :  { %3051 = vmatprep.subr.bf16.mxu0 %v8298_v19  ;;  %3092 = vmatprep.subr.bf16.mxu1 %v8299_v42  ;;  %v8380_v19 = vld [vmem:[#allocation64_spill] sm:$0xff]  ;;  %v8381_v42 = vld [vmem:[#allocation65_spill] sm:$0xff] }
 0x9b6   :  { %3052 = vmatpush1.bf16.msra.mxu0 %v8300_v46  ;;  %3093 = vmatpush1.bf16.msra.mxu1 %v8301_v17  ;;  %v8382_v46 = vld [vmem:[#allocation66_spill] sm:$0xff]  ;;  %v8383_v17 = vld [vmem:[#allocation67_spill] sm:$0xff] }
 0x9b7   :  { %3053 = vmatprep.subr.bf16.mxu0 %v8302_v18  ;;  %3094 = vmatprep.subr.bf16.mxu1 %v8303_v37  ;;  %v8384_v18 = vld [vmem:[#allocation68_spill] sm:$0xff]  ;;  %v8385_v37 = vld [vmem:[#allocation69_spill] sm:$0xff] }
 0x9ba   :  { %3054 = vmatpush1.bf16.msra.mxu0 %v8304_v16  ;;  %3095 = vmatpush1.bf16.msra.mxu1 %v8305_v55  ;;  %v8386_v16 = vld [vmem:[#allocation17_spill] sm:$0xff]  ;;  %v8387_v55 = vld [vmem:[#allocation18_spill] sm:$0xff] }
 0x9bb   :  { %3055 = vmatprep.subr.bf16.mxu0 %v8306_v48  ;;  %3096 = vmatprep.subr.bf16.mxu1 %v8307_v13  ;;  %v8388_v48 = vld [vmem:[#allocation75_spill] sm:$0xff]  ;;  %v8389_v13 = vld [vmem:[#allocation76_spill] sm:$0xff] }
 0x9be   :  { %3056 = vmatpush1.bf16.msra.mxu0 %v8308_v2  ;;  %3097 = vmatpush1.bf16.msra.mxu1 %v8309_v63  ;;  %v8390_v2 = vld [vmem:[#allocation77_spill] sm:$0xff]  ;;  %v8391_v63 = vld [vmem:[#allocation78_spill] sm:$0xff] }
 0x9bf   :  { %3057 = vmatprep.subr.bf16.mxu0 %v8310_v50  ;;  %3098 = vmatprep.subr.bf16.mxu1 %v8311_v54  ;;  %v8392_v50 = vld [vmem:[#allocation22_spill] sm:$0xff]  ;;  %v8393_v54 = vld [vmem:[#allocation23_spill] sm:$0xff] }
 0x9c2   :  { %3058 = vmatpush1.bf16.msra.mxu0 %v8312_v62  ;;  %3099 = vmatpush1.bf16.msra.mxu1 %v8313_v39  ;;  %v8394_v62 = vld [vmem:[#allocation24_spill] sm:$0xff]  ;;  %v8395_v39 = vld [vmem:[#allocation25_spill] sm:$0xff] }
 0x9c3   :  { %3059 = vmatprep.subr.bf16.mxu0 %v8314_v40  ;;  %3100 = vmatprep.subr.bf16.mxu1 %v8315_v45  ;;  %v8396_v40 = vld [vmem:[#allocation26_spill] sm:$0xff]  ;;  %v8397_v45 = vld [vmem:[#allocation27_spill] sm:$0xff] }
 0x9c6   :  { %3060 = vmatpush1.bf16.msra.mxu0 %v8316_v38  ;;  %3101 = vmatpush1.bf16.msra.mxu1 %v8317_v58  ;;  %v8398_v38 = vld [vmem:[#allocation28_spill] sm:$0xff]  ;;  %v8399_v58 = vld [vmem:[#allocation29_spill] sm:$0xff] }
 0x9c7   :  { %3061 = vmatprep.subr.bf16.mxu0 %v8318_v43  ;;  %3102 = vmatprep.subr.bf16.mxu1 %v8319_v28 }
 0x9ca   :  { %3062 = vmatpush1.bf16.msra.mxu0 %v8320_v20  ;;  %3103 = vmatpush1.bf16.msra.mxu1 %v8321_v52  ;;  %v8400_v20 = vld [vmem:[#allocation19_spill] sm:$0xff] }
 0x9cb   :  { %3063 = vmatprep.subr.bf16.mxu0 %v8322_v9  ;;  %3104 = vmatprep.subr.bf16.mxu1 %v8323_v61 }
 0x9ce   :  { %3064 = vmatpush1.bf16.msra.mxu0 %v8324_v41  ;;  %3105 = vmatpush1.bf16.msra.mxu1 %v8325_v51  ;;  %v8401_v41 = vld [vmem:[#allocation20_spill] sm:$0xff] }
 0x9cf   :  { %3065 = vmatprep.subr.bf16.mxu0 %v8326_v53  ;;  %3106 = vmatprep.subr.bf16.mxu1 %v8327_v59 }
 0x9d2   :  { %3066 = vmatpush1.bf16.msra.mxu0 %v8372_v47  ;;  %3107 = vmatpush1.bf16.msra.mxu1 %v8373_v0 }
 0x9d3   :  { %3067 = vmatprep.subr.bf16.mxu0 %v8374_v49  ;;  %3108 = vmatprep.subr.bf16.mxu1 %v8375_v29  ;;  %v8402_v29 = vld [vmem:[#allocation21_spill] sm:$0xff] }
 0x9d6   :  { %3068 = vmatpush1.bf16.msra.mxu0 %v8376_v3  ;;  %3109 = vmatpush1.bf16.msra.mxu1 %v8377_v33 }
 0x9d7   :  { %3069 = vmatprep.subr.bf16.mxu0 %v8378_v11  ;;  %3110 = vmatprep.subr.bf16.mxu1 %v8379_v12 }
 0x9da   :  { %3070 = vmatpush1.bf16.msra.mxu0 %v8380_v19  ;;  %3111 = vmatpush1.bf16.msra.mxu1 %v8381_v42 }
 0x9db   :  { %3071 = vmatprep.subr.bf16.mxu0 %v8382_v46  ;;  %3112 = vmatprep.subr.bf16.mxu1 %v8383_v17 }
 0x9de   :  { %3072 = vmatpush1.bf16.msra.mxu0 %v8384_v18  ;;  %3113 = vmatpush1.bf16.msra.mxu1 %v8385_v37 }
 0x9df   :  { %3073 = vmatprep.subr.bf16.mxu0 %v8386_v16  ;;  %3114 = vmatprep.subr.bf16.mxu1 %v8387_v55 }
 0x9e2   :  { %3074 = vmatpush1.bf16.msra.mxu0 %v8388_v48  ;;  %3115 = vmatpush1.bf16.msra.mxu1 %v8389_v13  ;;  %v8403_v13 = vld [vmem:[#allocation99_spill] sm:$0xff] }
 0x9e3   :  { %3075 = vmatprep.subr.bf16.mxu0 %v8390_v2  ;;  %3116 = vmatprep.subr.bf16.mxu1 %v8391_v63  ;;  %v8404_v63 = vld [vmem:[#allocation100_spill] sm:$0xff] }
 0x9e6   :  { %3076 = vmatpush1.bf16.msra.mxu0 %v8392_v50  ;;  %3117 = vmatpush1.bf16.msra.mxu1 %v8393_v54 }
 0x9e7   :  { %3077 = vmatprep.subr.bf16.mxu0 %v8394_v62  ;;  %3118 = vmatprep.subr.bf16.mxu1 %v8395_v39  ;;  %v8405_v39 = vld [vmem:[#allocation101_spill] sm:$0xff] }
 0x9ea   :  { %3078 = vmatpush1.bf16.msra.mxu0 %v8396_v40  ;;  %3119 = vmatpush1.bf16.msra.mxu1 %v8397_v45  ;;  %v8406_v45 = vld [vmem:[#allocation102_spill] sm:$0xff] }
 0x9eb   :  { %3158 = vmatprep.subr.bf16.mxu0 %v8398_v38  ;;  %3199 = vmatprep.subr.bf16.mxu1 %v8399_v58 }
 0xa60   :  { %v2858_v43 = vpop.f32.mrb[80].mxu0  ;;  %v2899_v28 = vpop.f32.mrb[80].mxu1 }
 0xa61   :  { %v2859_v52 = vadd.f32 %v2858_v43, %v8400_v20  ;;  %v2860_v9 = vpop.f32.mrb[81].mxu0  ;;  %v2901_v61 = vpop.f32.mrb[81].mxu1  ;;  %v2900_v3 = vadd.f32 %v2899_v28, %v8402_v29 }
 0xa62   :  { %v2861_v51 = vadd.f32 %v2860_v9, %v8401_v41  ;;  %v2862_v53 = vpop.f32.mrb[82].mxu0  ;;  %v2903_v59 = vpop.f32.mrb[82].mxu1 }
 0xa63   :  { %v3626_v24 = vmul.f32 -1.442695, %v2859_v52  ;;  %v2863_v47 = vpop.f32.mrb[83].mxu0  ;;  %v2904_v0 = vpop.f32.mrb[83].mxu1 }
 0xa64   :  { %v3627_v49 = vmul.f32 -1.442695, %v2861_v51  ;;  %v2902_v51 = vadd.f32 %v2901_v61, %v5499_v34 }
 0xa65   :  { %4091 = vpow2.f32 %v3626_v24 }
 0xa66   :  { %4093 = vpow2.f32 %v3627_v49  ;;  %v3628_v53 = vmul.f32 -1.442695, %v2902_v51  ;;  %v4424_v51 = vld [vmem:[%s7435_s4 + $0xcc] ss:$16 sps:$4 sm:$0xff]  }
 0xa67   :  { %4095 = vtanh.f32 %v2900_v3 }
 0xa6f   :  { %v4092_v33 = vpop.eup %4091 }
 0xa70   :  { %v4094_v11 = vpop.eup %4093  ;;  %v2909_v12 = vadd.f32 1.0, %v4092_v33 }
 0xa71   :  { %v2915_v19 = vadd.f32 1.0, %v4094_v11  ;;  %v4096_v42 = vpop.eup %4095 }
 0xa72   :  { %4097 = vrcp.f32 %v2909_v12 }
 0xa73   :  { %4099 = vrcp.f32 %v2915_v19 }
 0xa7c   :  { %v4098_v46 = vpop.eup %4097 }
 0xa7d   :  { %v4100_v17 = vpop.eup %4099  ;;  %v2926_v18 = vmul.f32 %v4098_v46, %v4096_v42 }
 0xa7e   :  { %v2925_v37 = vmul.f32 %v4100_v17, %v6963_v26 }
 0xa80   :  { %v7143_v16 = vadd.f32 %v2926_v18, %v2925_v37  ;;  %v2969_v55 = vpop.f32.mrb[84].mxu0  ;;  %v3010_v48 = vpop.f32.mrb[84].mxu1 }
 0xa81   :  { %v3017_v2 = vadd.f32 %v2969_v55, %v8403_v13  ;;  %v3019_v50 = vadd.f32 %v3010_v48, %v8404_v63  ;;  %v2971_v54 = vpop.f32.mrb[85].mxu0  ;;  %v3012_v62 = vpop.f32.mrb[85].mxu1 }
 0xa82   :  { %v3018_v40 = vadd.f32 %v2971_v54, %v8405_v39  ;;  %v3020_v38 = vadd.f32 %v3012_v62, %v8406_v45  ;;  %v2973_v58 = vpop.f32.mrb[86].mxu0  ;;  %v3014_v43 = vpop.f32.mrb[86].mxu1  ;;  %v4413_v62 = vld [vmem:[%s7435_s4 + $0x60] ss:$16 sps:$4 sm:$0xff]   ;;  %v4414_v39 = vld [vmem:[%s7435_s4 + $0x68] ss:$16 sps:$4 sm:$0xff]  }
 0xa83   :  { %v3629_v28 = vmul.f32 -1.442695, %v3017_v2  ;;  %v2974_v52 = vpop.f32.mrb[87].mxu0  ;;  %v3015_v9 = vpop.f32.mrb[87].mxu1  ;;  %v4416_v45 = vld [vmem:[%s7435_s4 + $0x8c] ss:$16 sps:$4 sm:$0xff]  }
 0xa84   :  { %v3630_v26 = vmul.f32 -1.442695, %v3018_v40  ;;  %v3631_v59 = vmul.f32 -1.442695, %v3020_v38  ;;  %v4415_v40 = vld [vmem:[%s7435_s4 + $0x84] ss:$16 sps:$4 sm:$0xff]  }
 0xa85   :  { %4101 = vpow2.f32 %v3629_v28  ;;  %v4417_v38 = vld [vmem:[%s7435_s4 + $0x80] ss:$16 sps:$4 sm:$0xff]   ;;  %v4418_v58 = vld [vmem:[%s7435_s4 + $0x88] ss:$16 sps:$4 sm:$0xff]   ;;  %v4419_v43 = vld [vmem:[%s7435_s4 + $0xa4] ss:$16 sps:$4 sm:$0xff]  }
 0xa86   :  { %4103 = vpow2.f32 %v3630_v26  ;;  %v4420_v28 = vld [vmem:[%s7435_s4 + $0xac] ss:$16 sps:$4 sm:$0xff]   ;;  %v4421_v52 = vld [vmem:[%s7435_s4 + $0xa0] ss:$16 sps:$4 sm:$0xff]   ;;  %v4422_v9 = vld [vmem:[%s7435_s4 + $0xa8] ss:$16 sps:$4 sm:$0xff]  }
 0xa87   :  { %4105 = vpow2.f32 %v3628_v53  ;;  %v4423_v26 = vld [vmem:[%s7435_s4 + $0xc4] ss:$16 sps:$4 sm:$0xff]   ;;  %v4425_v53 = vld [vmem:[%s7435_s4 + $0xc0] ss:$16 sps:$4 sm:$0xff]  }
 0xa88   :  { %4107 = vpow2.f32 %v3631_v59  ;;  %v4426_v59 = vld [vmem:[%s7435_s4 + $0xc8] ss:$16 sps:$4 sm:$0xff]  }
 0xa89   :  { %4109 = vtanh.f32 %v3019_v50 }
 0xa8f   :  { %v4102_v24 = vpop.eup %4101 }
 0xa90   :  { %v4104_v47 = vpop.eup %4103  ;;  %v3024_v0 = vadd.f32 1.0, %v4102_v24  ;;  %v4427_v24 = vld [vmem:[%s7435_s4 + $0xe4] ss:$16 sps:$4 sm:$0xff]  }
 0xa91   :  { %v3030_v49 = vadd.f32 1.0, %v4104_v47  ;;  %v4106_v3 = vpop.eup %4105  ;;  %v4428_v47 = vld [vmem:[%s7435_s4 + $0xec] ss:$16 sps:$4 sm:$0xff]  }
 0xa92   :  { %4111 = vrcp.f32 %v3024_v0  ;;  %v4108_v33 = vpop.eup %4107  ;;  %v2922_v19 = vadd.f32 1.0, %v4106_v3  ;;  %v4429_v0 = vld [vmem:[%s7435_s4 + $0xe0] ss:$16 sps:$4 sm:$0xff]   ;;  %v4431_v3 = vld [vmem:[%s7435_s4 + $0x104] ss:$16 sps:$4 sm:$0xff]  }
 0xa93   :  { %4113 = vrcp.f32 %v3030_v49  ;;  %v4110_v11 = vpop.eup %4109  ;;  %v3037_v17 = vadd.f32 1.0, %v4108_v33  ;;  %v4430_v49 = vld [vmem:[%s7435_s4 + $0xe8] ss:$16 sps:$4 sm:$0xff]   ;;  %v4432_v33 = vld [vmem:[%s7435_s4 + $0x10c] ss:$16 sps:$4 sm:$0xff]  }
 0xa94   :  { %4115 = vtanh.f32 %v7143_v16 }
 0xa95   :  { %4117 = vrcp.f32 %v2922_v19  ;;  %v4435_v19 = vld [vmem:[%s7435_s4 + $0x124] ss:$16 sps:$4 sm:$0xff]  }
 0xa96   :  { %4119 = vrcp.f32 %v3037_v17  ;;  %v4438_v17 = vld [vmem:[%s7435_s4 + $0x128] ss:$16 sps:$4 sm:$0xff]  }
 0xa9c   :  { %v4112_v12 = vpop.eup %4111 }
 0xa9d   :  { %v4114_v42 = vpop.eup %4113  ;;  %v3041_v46 = vmul.f32 %v4112_v12, %v4110_v11  ;;  %v4433_v11 = vld [vmem:[%s7435_s4 + $0x100] ss:$16 sps:$4 sm:$0xff]   ;;  %v4434_v12 = vld [vmem:[%s7435_s4 + $0x108] ss:$16 sps:$4 sm:$0xff]  }
 0xa9e   :  { %v3040_v61 = vmul.f32 %v4114_v42, %v6972_v30  ;;  %v4116_v37 = vpop.eup %4115  ;;  %v8408_v30 = vld [vmem:[#allocation88_spill] sm:$0xff] }
 0xa9f   :  { %v4118_v55 = vpop.eup %4117  ;;  %v4436_v42 = vld [vmem:[%s7435_s4 + $0x12c] ss:$16 sps:$4 sm:$0xff]  }
 0xaa0   :  { %v7152_v18 = vadd.f32 %v3041_v46, %v3040_v61  ;;  %v4120_v48 = vpop.eup %4119  ;;  %v2929_v2 = vmul.f32 %v4118_v55, %v4116_v37  ;;  %v4437_v46 = vld [vmem:[%s7435_s4 + $0x120] ss:$16 sps:$4 sm:$0xff]   ;;  %v4439_v61 = vld [vmem:[%s7435_s4 + $0x144] ss:$16 sps:$4 sm:$0xff]   ;;  %v4440_v37 = vld [vmem:[%s7435_s4 + $0x14c] ss:$16 sps:$4 sm:$0xff]  }
 0xaa1   :  { %v4441_v55 = vld [vmem:[%s7435_s4 + $0x140] ss:$16 sps:$4 sm:$0xff]  }
 0xaa2   :  { %4121 = vtanh.f32 %v7152_v18  ;;  %v3045_v54 = vpack.c.bf16 %v2929_v2, %v2929_v2  ;;  %v4444_v2 = vld [vmem:[%s7435_s4 + $0x16c] ss:$16 sps:$4 sm:$0xff]  }
 0xaac   :  { %v4122_v13 = vpop.eup %4121 }
 0xaad   :  { %v3044_v63 = vmul.f32 %v4122_v13, %v4120_v48  ;;  %v4442_v48 = vld [vmem:[%s7435_s4 + $0x148] ss:$16 sps:$4 sm:$0xff]   ;;  %v4443_v13 = vld [vmem:[%s7435_s4 + $0x164] ss:$16 sps:$4 sm:$0xff]  }
 0xaaf   :  { %v3046_v50 = vpack.c.bf16 %v3044_v63, %v3044_v63  ;;  %v4445_v63 = vld [vmem:[%s7435_s4 + $0x160] ss:$16 sps:$4 sm:$0xff]  }
 0xab1   :  { %3079 = vmatprep.mubr.bf16.mxu0 %v3046_v50  ;;  %3120 = vmatprep.mubr.bf16.mxu1 %v3046_v50 }
 0xab2   :  { %3080 = vmatmul.mubr.bf16.vlgmr.msra.gmra.mrb[88].mxu0 %v3045_v54  ;;  %3121 = vmatmul.mubr.bf16.vlgmr.msra.gmra.mrb[88].mxu1 %v3045_v54  ;;  %v4447_v54 = vld [vmem:[%s7435_s4 + $0x184] ss:$16 sps:$4 sm:$0xff]  }
 0xab3   :  { %3159 = vmatpush1.bf16.msra.mxu0 %v6979_v1  ;;  %3200 = vmatpush1.bf16.msra.mxu1 %v6982_v35  ;;  %v8409_v1 = vld [vmem:[#allocation89_spill] sm:$0xff]  ;;  %v8410_v35 = vld [vmem:[#allocation90_spill] sm:$0xff] }
 0xab4   :  { %3160 = vmatprep.subr.bf16.mxu0 %v6985_v22  ;;  %3201 = vmatprep.subr.bf16.mxu1 %v6988_v15  ;;  %v8411_v22 = vld [vmem:[#allocation30_spill] sm:$0xff]  ;;  %v8412_v15 = vld [vmem:[#allocation79_spill] sm:$0xff] }
 0xab5   :  { %3190 = vmatprep.mubr.bf16.mxu0 %v7939_v44  ;;  %3231 = vmatprep.mubr.bf16.mxu1 %v7939_v44  ;;  %v8407_v44 = vld [vmem:[#allocation87_spill] sm:$0xff] }
 0xab7   :  { %3161 = vmatpush1.bf16.msra.mxu0 %v6993_v6  ;;  %3202 = vmatpush1.bf16.msra.mxu1 %v6996_v32  ;;  %v8413_v6 = vld [vmem:[#allocation80_spill] sm:$0xff]  ;;  %v8414_v32 = vld [vmem:[#allocation81_spill] sm:$0xff] }
 0xab8   :  { %3162 = vmatprep.subr.bf16.mxu0 %v6999_v14  ;;  %3203 = vmatprep.subr.bf16.mxu1 %v7002_v27  ;;  %v8415_v14 = vld [vmem:[#allocation82_spill] sm:$0xff]  ;;  %v4399_v27 = vld [vmem:[%s7435_s4 + $0x4] ss:$16 sps:$4 sm:$0xff]  }
 0xabb   :  { %3163 = vmatpush1.bf16.msra.mxu0 %v7005_v4  ;;  %3204 = vmatpush1.bf16.msra.mxu1 %v7008_v10  ;;  %v4400_v4 = vld [vmem:[%s7435_s4 + $0xc] ss:$16 sps:$4 sm:$0xff]   ;;  %v4401_v10 = vld [vmem:[%s7435_s4] ss:$16 sps:$4 sm:$0xff]  }
 0xabc   :  { %3164 = vmatprep.subr.bf16.mxu0 %v7011_v60  ;;  %3205 = vmatprep.subr.bf16.mxu1 %v7014_v57  ;;  %v4402_v60 = vld [vmem:[%s7435_s4 + $0x8] ss:$16 sps:$4 sm:$0xff]   ;;  %v4403_v57 = vld [vmem:[%s7435_s4 + $0x24] ss:$16 sps:$4 sm:$0xff]  }
 0xabf   :  { %3165 = vmatpush1.bf16.msra.mxu0 %v7017_v31  ;;  %3206 = vmatpush1.bf16.msra.mxu1 %v7020_v25  ;;  %v4404_v31 = vld [vmem:[%s7435_s4 + $0x2c] ss:$16 sps:$4 sm:$0xff]   ;;  %v4405_v25 = vld [vmem:[%s7435_s4 + $0x20] ss:$16 sps:$4 sm:$0xff]  }
 0xac0   :  { %3166 = vmatprep.subr.bf16.mxu0 %v7023_v56  ;;  %3207 = vmatprep.subr.bf16.mxu1 %v8407_v44  ;;  %v4406_v56 = vld [vmem:[%s7435_s4 + $0x28] ss:$16 sps:$4 sm:$0xff]   ;;  %v4448_v44 = vld [vmem:[%s7435_s4 + $0x18c] ss:$16 sps:$4 sm:$0xff]  }
 0xac3   :  { %3167 = vmatpush1.bf16.msra.mxu0 %v8408_v30  ;;  %3208 = vmatpush1.bf16.msra.mxu1 %v8409_v1  ;;  %v4449_v30 = vld [vmem:[%s7435_s4 + $0x180] ss:$16 sps:$4 sm:$0xff]   ;;  %v4450_v1 = vld [vmem:[%s7435_s4 + $0x188] ss:$16 sps:$4 sm:$0xff]  }
 0xac4   :  { %3168 = vmatprep.subr.bf16.mxu0 %v8410_v35  ;;  %3209 = vmatprep.subr.bf16.mxu1 %v8411_v22  ;;  %v4451_v35 = vld [vmem:[%s7435_s4 + $0x1a4] ss:$16 sps:$4 sm:$0xff]   ;;  %v4452_v22 = vld [vmem:[%s7435_s4 + $0x1ac] ss:$16 sps:$4 sm:$0xff]  }
 0xac7   :  { %3169 = vmatpush1.bf16.msra.mxu0 %v8412_v15  ;;  %3210 = vmatpush1.bf16.msra.mxu1 %v8413_v6  ;;  %v4453_v15 = vld [vmem:[%s7435_s4 + $0x1a0] ss:$16 sps:$4 sm:$0xff]   ;;  %v4454_v6 = vld [vmem:[%s7435_s4 + $0x1a8] ss:$16 sps:$4 sm:$0xff]  }
 0xac8   :  { %3170 = vmatprep.subr.bf16.mxu0 %v8414_v32  ;;  %3211 = vmatprep.subr.bf16.mxu1 %v8415_v14  ;;  %v4455_v32 = vld [vmem:[%s7435_s4 + $0x1c4] ss:$16 sps:$4 sm:$0xff]   ;;  %v4456_v14 = vld [vmem:[%s7435_s4 + $0x1cc] ss:$16 sps:$4 sm:$0xff]  }
 0xacb   :  { %3171 = vmatpush1.bf16.msra.mxu0 %v7053_v36  ;;  %3212 = vmatpush1.bf16.msra.mxu1 %v7056_v8  ;;  %v4410_v36 = vld [vmem:[%s7435_s4 + $0x48] ss:$16 sps:$4 sm:$0xff]   ;;  %v4411_v8 = vld [vmem:[%s7435_s4 + $0x64] ss:$16 sps:$4 sm:$0xff]  }
 0xacc   :  { %3172 = vmatprep.subr.bf16.mxu0 %v7059_v7  ;;  %3213 = vmatprep.subr.bf16.mxu1 %v7062_v5  ;;  %v4407_v5 = vld [vmem:[%s7435_s4 + $0x44] ss:$16 sps:$4 sm:$0xff]   ;;  %v4412_v7 = vld [vmem:[%s7435_s4 + $0x6c] ss:$16 sps:$4 sm:$0xff]  }
 0xacf   :  { %3173 = vmatpush1.bf16.msra.mxu0 %v7065_v23  ;;  %3214 = vmatpush1.bf16.msra.mxu1 %v7068_v21  ;;  %v4408_v23 = vld [vmem:[%s7435_s4 + $0x4c] ss:$16 sps:$4 sm:$0xff]   ;;  %v4409_v21 = vld [vmem:[%s7435_s4 + $0x40] ss:$16 sps:$4 sm:$0xff]  }
 0xad0   :  { %3270 = vmatprep.subr.bf16.mxu0 %v4399_v27  ;;  %3311 = vmatprep.subr.bf16.mxu1 %v4400_v4  ;;  %v4457_v27 = vld [vmem:[%s7435_s4 + $0x1c0] ss:$16 sps:$4 sm:$0xff]   ;;  %v4458_v4 = vld [vmem:[%s7435_s4 + $0x1c8] ss:$16 sps:$4 sm:$0xff]  }
 0xad2   :  { %3191 = vmatmul.mubr.bf16.vlgmr.msra.gmra.mrb[92].mxu0 %v3046_v50  ;;  %3232 = vmatmul.mubr.bf16.vlgmr.msra.gmra.mrb[92].mxu1 %v3046_v50  ;;  %v4446_v50 = vld [vmem:[%s7435_s4 + $0x168] ss:$16 sps:$4 sm:$0xff]  }
 0xad3   :  { %3271 = vmatpush1.bf16.msra.mxu0 %v4401_v10  ;;  %3312 = vmatpush1.bf16.msra.mxu1 %v4402_v60  ;;  %v4459_v10 = vld [vmem:[%s7435_s4 + $0x1e4] ss:$16 sps:$4 sm:$0xff]   ;;  %v4460_v60 = vld [vmem:[%s7435_s4 + $0x1ec] ss:$16 sps:$4 sm:$0xff]  }
 0xad4   :  { %3272 = vmatprep.subr.bf16.mxu0 %v4403_v57  ;;  %3313 = vmatprep.subr.bf16.mxu1 %v4404_v31  ;;  %v4461_v57 = vld [vmem:[%s7435_s4 + $0x1e0] ss:$16 sps:$4 sm:$0xff]   ;;  %v4462_v31 = vld [vmem:[%s7435_s4 + $0x1e8] ss:$16 sps:$4 sm:$0xff]   ;;  %s4587_s4 = smov [#allocation10]  }
 0xad5   :  { %s3415_s15 = sshll.u32 %s4587_s4, 4  ;;  %s3416_s15 = int_to_ptr.vmem [resolvable:$true] %s3415_s15 }
 0xad6   :  { %s4529_s20 = scalar_lea.vmem %s3416_s15, 256  ;;  %p4534_p11 = scmp.lt.s32.totalorder %s3416_s15, %s3416_s15 }
 0xad7   :  { %3273 = vmatpush1.bf16.msra.mxu0 %v4405_v25  ;;  %3314 = vmatpush1.bf16.msra.mxu1 %v4406_v56  ;;  %p4530_p10 = scmp.ne.s32.totalorder %s3416_s15, %s4529_s20  ;;  %p4535_p12 = scmp.lt.s32.totalorder %s4529_s20, %s4529_s20 }
 0xad8   :  { %3274 = vmatprep.subr.bf16.mxu0 %v4407_v5  ;;  %3315 = vmatprep.subr.bf16.mxu1 %v4408_v23 }
 0xad9   :  { %p4536_p13 = por %p4535_p12, %p4534_p11 }
 0xadb   :  { %3275 = vmatpush1.bf16.msra.mxu0 %v4409_v21  ;;  %3316 = vmatpush1.bf16.msra.mxu1 %v4410_v36  ;;  %p4537_p0 = pnand %p4536_p13, %p4530_p10 }
 0xadc   :  { %3276 = vmatprep.subr.bf16.mxu0 %v4411_v8  ;;  %3317 = vmatprep.subr.bf16.mxu1 %v4412_v7 }
 0xadf   :  { %3277 = vmatpush1.bf16.msra.mxu0 %v4413_v62  ;;  %3318 = vmatpush1.bf16.msra.mxu1 %v4414_v39 }
 0xae0   :  { %3278 = vmatprep.subr.bf16.mxu0 %v4415_v40  ;;  %3319 = vmatprep.subr.bf16.mxu1 %v4416_v45 }
 0xae3   :  { %3279 = vmatpush1.bf16.msra.mxu0 %v4417_v38  ;;  %3320 = vmatpush1.bf16.msra.mxu1 %v4418_v58 }
 0xae4   :  { %3280 = vmatprep.subr.bf16.mxu0 %v4419_v43  ;;  %3321 = vmatprep.subr.bf16.mxu1 %v4420_v28 }
 0xae7   :  { %3281 = vmatpush1.bf16.msra.mxu0 %v4421_v52  ;;  %3322 = vmatpush1.bf16.msra.mxu1 %v4422_v9 }
 0xae8   :  { %3282 = vmatprep.subr.bf16.mxu0 %v4423_v26  ;;  %3323 = vmatprep.subr.bf16.mxu1 %v4424_v51 }
 0xaeb   :  { %3283 = vmatpush1.bf16.msra.mxu0 %v4425_v53  ;;  %3324 = vmatpush1.bf16.msra.mxu1 %v4426_v59 }
 0xaec   :  { %3284 = vmatprep.subr.bf16.mxu0 %v4427_v24  ;;  %3325 = vmatprep.subr.bf16.mxu1 %v4428_v47 }
 0xaef   :  { %3285 = vmatpush1.bf16.msra.mxu0 %v4429_v0  ;;  %3326 = vmatpush1.bf16.msra.mxu1 %v4430_v49  ;;  %v8416_v49 = vld [vmem:[#allocation103_spill] sm:$0xff] }
 0xaf0   :  { %3286 = vmatprep.subr.bf16.mxu0 %v4431_v3  ;;  %3327 = vmatprep.subr.bf16.mxu1 %v4432_v33  ;;  %v8417_v33 = vld [vmem:[#allocation104_spill] sm:$0xff] }
 0xaf3   :  { %3287 = vmatpush1.bf16.msra.mxu0 %v4433_v11  ;;  %3328 = vmatpush1.bf16.msra.mxu1 %v4434_v12 }
 0xaf4   :  { %3288 = vmatprep.subr.bf16.mxu0 %v4435_v19  ;;  %3329 = vmatprep.subr.bf16.mxu1 %v4436_v42  ;;  %v8418_v42 = vld [vmem:[#allocation105_spill] sm:$0xff] }
 0xaf7   :  { %3289 = vmatpush1.bf16.msra.mxu0 %v4437_v46  ;;  %3330 = vmatpush1.bf16.msra.mxu1 %v4438_v17  ;;  %v8419_v17 = vld [vmem:[#allocation106_spill] sm:$0xff] }
 0xaf8   :  { %3290 = vmatprep.subr.bf16.mxu0 %v4439_v61  ;;  %3331 = vmatprep.subr.bf16.mxu1 %v4440_v37 }
 0xafb   :  { %3291 = vmatpush1.bf16.msra.mxu0 %v4441_v55  ;;  %3332 = vmatpush1.bf16.msra.mxu1 %v4442_v48 }
 0xafc   :  { %3292 = vmatprep.subr.bf16.mxu0 %v4443_v13  ;;  %3333 = vmatprep.subr.bf16.mxu1 %v4444_v2 }
 0xaff   :  { %3293 = vmatpush1.bf16.msra.mxu0 %v4445_v63  ;;  %3334 = vmatpush1.bf16.msra.mxu1 %v4446_v50 }
 0xb00   :  { %3294 = vmatprep.subr.bf16.mxu0 %v4447_v54  ;;  %3335 = vmatprep.subr.bf16.mxu1 %v4448_v44 }
 0xb03   :  { %3295 = vmatpush1.bf16.msra.mxu0 %v4449_v30  ;;  %3336 = vmatpush1.bf16.msra.mxu1 %v4450_v1 }
 0xb04   :  { %3296 = vmatprep.subr.bf16.mxu0 %v4451_v35  ;;  %3337 = vmatprep.subr.bf16.mxu1 %v4452_v22 }
 0xb07   :  { %3297 = vmatpush1.bf16.msra.mxu0 %v4453_v15  ;;  %3338 = vmatpush1.bf16.msra.mxu1 %v4454_v6 }
 0xb08   :  { %3298 = vmatprep.subr.bf16.mxu0 %v4455_v32  ;;  %3339 = vmatprep.subr.bf16.mxu1 %v4456_v14 }
 0xb0b   :  { %3299 = vmatpush1.bf16.msra.mxu0 %v4457_v27  ;;  %3340 = vmatpush1.bf16.msra.mxu1 %v4458_v4 }
 0xb0c   :  { %3300 = vmatprep.subr.bf16.mxu0 %v4459_v10  ;;  %3341 = vmatprep.subr.bf16.mxu1 %v4460_v60 }
 0xb0f   :  { %3301 = vmatpush1.bf16.msra.mxu0 %v4461_v57  ;;  %3342 = vmatpush1.bf16.msra.mxu1 %v4462_v31 }
 0xb85   :  { %v3081_v25 = vpop.f32.mrb[88].mxu0  ;;  %v3122_v56 = vpop.f32.mrb[88].mxu1 }
 0xb86   :  { %v3082_v5 = vadd.f32 %v3081_v25, %v8400_v20  ;;  %v3083_v23 = vpop.f32.mrb[89].mxu0  ;;  %v3124_v21 = vpop.f32.mrb[89].mxu1  ;;  %v3123_v38 = vadd.f32 %v3122_v56, %v8402_v29 }
 0xb87   :  { %v3084_v36 = vadd.f32 %v3083_v23, %v8401_v41  ;;  %v3085_v8 = vpop.f32.mrb[90].mxu0  ;;  %v3126_v7 = vpop.f32.mrb[90].mxu1  ;;  %v3125_v63 = vadd.f32 %v3124_v21, %v5499_v34 }
 0xb88   :  { %v3632_v62 = vmul.f32 -1.442695, %v3082_v5  ;;  %v3086_v39 = vpop.f32.mrb[91].mxu0  ;;  %v3127_v40 = vpop.f32.mrb[91].mxu1 }
 0xb89   :  { %v3633_v45 = vmul.f32 -1.442695, %v3084_v36  ;;  %v3634_v50 = vmul.f32 -1.442695, %v3125_v63 }
 0xb8a   :  { %4123 = vpow2.f32 %v3632_v62 }
 0xb8b   :  { %4125 = vpow2.f32 %v3633_v45 }
 0xb8c   :  { %4127 = vtanh.f32 %v3123_v38 }
 0xb94   :  { %v4124_v58 = vpop.eup %4123 }
 0xb95   :  { %v4126_v43 = vpop.eup %4125  ;;  %v3132_v28 = vadd.f32 1.0, %v4124_v58 }
 0xb96   :  { %v3138_v52 = vadd.f32 1.0, %v4126_v43  ;;  %v4128_v9 = vpop.eup %4127 }
 0xb97   :  { %4129 = vrcp.f32 %v3132_v28 }
 0xb98   :  { %4131 = vrcp.f32 %v3138_v52 }
 0xba1   :  { %v4130_v26 = vpop.eup %4129 }
 0xba2   :  { %v4132_v51 = vpop.eup %4131  ;;  %v3149_v53 = vmul.f32 %v4130_v26, %v4128_v9 }
 0xba3   :  { %v3148_v59 = vmul.f32 %v4132_v51, %v7143_v16 }
 0xba5   :  { %v7383_v24 = vadd.f32 %v3149_v53, %v3148_v59  ;;  %v3192_v47 = vpop.f32.mrb[92].mxu0  ;;  %v3233_v0 = vpop.f32.mrb[92].mxu1 }
 0xba6   :  { %v3240_v3 = vadd.f32 %v3192_v47, %v8416_v49  ;;  %v3242_v11 = vadd.f32 %v3233_v0, %v8417_v33  ;;  %v3194_v12 = vpop.f32.mrb[93].mxu0  ;;  %v3235_v19 = vpop.f32.mrb[93].mxu1 }
 0xba7   :  { %v3241_v46 = vadd.f32 %v3194_v12, %v8418_v42  ;;  %v3243_v61 = vadd.f32 %v3235_v19, %v8419_v17  ;;  %v3196_v37 = vpop.f32.mrb[94].mxu0  ;;  %v3237_v55 = vpop.f32.mrb[94].mxu1 }
 0xba8   :  { %v3635_v48 = vmul.f32 -1.442695, %v3240_v3  ;;  %v3197_v13 = vpop.f32.mrb[95].mxu0  ;;  %v3238_v2 = vpop.f32.mrb[95].mxu1 }
 0xba9   :  { %v3636_v16 = vmul.f32 -1.442695, %v3241_v46  ;;  %v3637_v54 = vmul.f32 -1.442695, %v3243_v61  ;;  %v3641_v46 = vld [vmem:[#allocation9] ss:$0 sm:$0xff] }
 0xbaa   :  { %4133 = vpow2.f32 %v3635_v48 }
 0xbab   :  { %4135 = vpow2.f32 %v3636_v16 }
 0xbac   :  { %4137 = vpow2.f32 %v3634_v50 }
 0xbad   :  { %4139 = vpow2.f32 %v3637_v54 }
 0xbae   :  { %4141 = vtanh.f32 %v3242_v11 }
 0xbb4   :  { %v4134_v44 = vpop.eup %4133 }
 0xbb5   :  { %v4136_v30 = vpop.eup %4135  ;;  %v3247_v1 = vadd.f32 1.0, %v4134_v44 }
 0xbb6   :  { %v3253_v35 = vadd.f32 1.0, %v4136_v30  ;;  %v4138_v22 = vpop.eup %4137 }
 0xbb7   :  { %4143 = vrcp.f32 %v3247_v1  ;;  %v4140_v15 = vpop.eup %4139  ;;  %v3145_v14 = vadd.f32 1.0, %v4138_v22 }
 0xbb8   :  { %4145 = vrcp.f32 %v3253_v35  ;;  %v4142_v6 = vpop.eup %4141  ;;  %v3260_v10 = vadd.f32 1.0, %v4140_v15 }
 0xbb9   :  { %4147 = vtanh.f32 %v7383_v24 }
 0xbba   :  { %4149 = vrcp.f32 %v3145_v14 }
 0xbbb   :  { %4151 = vrcp.f32 %v3260_v10 }
 0xbc1   :  { %v4144_v32 = vpop.eup %4143 }
 0xbc2   :  { %v4146_v27 = vpop.eup %4145  ;;  %v3264_v4 = vmul.f32 %v4144_v32, %v4142_v6 }
 0xbc3   :  { %v3263_v60 = vmul.f32 %v4146_v27, %v7152_v18  ;;  %v4148_v31 = vpop.eup %4147 }
 0xbc4   :  { %v4150_v25 = vpop.eup %4149 }
 0xbc5   :  { %v3265_v57 = vadd.f32 %v3264_v4, %v3263_v60  ;;  %v4152_v56 = vpop.eup %4151  ;;  %v3152_v23 = vmul.f32 %v4150_v25, %v4148_v31 }
 0xbc7   :  { %3377 = vst [vmem:[#allocation11] sm:$0xff] %v3265_v57  ;;  %4153 = vtanh.f32 %v3265_v57  ;;  %v3268_v8 = vpack.c.bf16 %v3152_v23, %v3152_v23 }
 0xbd1   :  { %v4154_v5 = vpop.eup %4153 }
 0xbd2   :  { %v3267_v21 = vmul.f32 %v4154_v5, %v4152_v56 }
 0xbd4   :  { %v3269_v36 = vpack.c.bf16 %v3267_v21, %v3267_v21  ;;  %3376 = vst [vmem:[#allocation10] sm:$0xff] %v3267_v21 }
 0xbd6   :  { %3302 = vmatprep.mubr.bf16.mxu0 %v3269_v36  ;;  %3343 = vmatprep.mubr.bf16.mxu1 %v3269_v36 }
 0xbd7   :  { %3303 = vmatmul.mubr.bf16.vlgmr.msra.gmra.mrb[96].mxu0 %v3268_v8  ;;  %3344 = vmatmul.mubr.bf16.vlgmr.msra.gmra.mrb[96].mxu1 %v3268_v8 }
 0xcaa   :  { %v3304_v18 = vpop.f32.mrb[96].mxu0  ;;  %v3345_v7 = vpop.f32.mrb[96].mxu1 }
 0xcab   :  { %v3305_v62 = vadd.f32 %v3304_v18, %v8400_v20  ;;  %v3306_v39 = vpop.f32.mrb[97].mxu0  ;;  %v3347_v40 = vpop.f32.mrb[97].mxu1  ;;  %v3346_v53 = vadd.f32 %v3345_v7, %v8402_v29 }
 0xcac   :  { %v3307_v45 = vadd.f32 %v3306_v39, %v8401_v41  ;;  %v3308_v38 = vpop.f32.mrb[98].mxu0  ;;  %v3349_v58 = vpop.f32.mrb[98].mxu1  ;;  %v3348_v26 = vadd.f32 %v3347_v40, %v5499_v34 }
 0xcad   :  { %v3638_v43 = vmul.f32 -1.442695, %v3305_v62  ;;  %v3309_v28 = vpop.f32.mrb[99].mxu0  ;;  %v3350_v52 = vpop.f32.mrb[99].mxu1 }
 0xcae   :  { %v3639_v9 = vmul.f32 -1.442695, %v3307_v45  ;;  %v3640_v51 = vmul.f32 -1.442695, %v3348_v26 }
 0xcaf   :  { %4155 = vpow2.f32 %v3638_v43 }
 0xcb0   :  { %4157 = vpow2.f32 %v3639_v9 }
 0xcb1   :  { %4159 = vpow2.f32 %v3640_v51 }
 0xcb2   :  { %4161 = vtanh.f32 %v3346_v53 }
 0xcb9   :  { %v4156_v59 = vpop.eup %4155 }
 0xcba   :  { %v4158_v47 = vpop.eup %4157  ;;  %v3355_v20 = vadd.f32 1.0, %v4156_v59 }
 0xcbb   :  { %v3361_v0 = vadd.f32 1.0, %v4158_v47  ;;  %v4160_v41 = vpop.eup %4159 }
 0xcbc   :  { %4163 = vrcp.f32 %v3355_v20  ;;  %v4162_v49 = vpop.eup %4161  ;;  %v3368_v12 = vadd.f32 1.0, %v4160_v41 }
 0xcbd   :  { %4165 = vrcp.f32 %v3361_v0 }
 0xcbe   :  { %4167 = vrcp.f32 %v3368_v12 }
 0xcc6   :  { %v4164_v3 = vpop.eup %4163 }
 0xcc7   :  { %v4166_v33 = vpop.eup %4165  ;;  %v3372_v11 = vmul.f32 %v4164_v3, %v4162_v49 }
 0xcc8   :  { %v3371_v19 = vmul.f32 %v4166_v33, %v7383_v24  ;;  %v4168_v29 = vpop.eup %4167 }
 0xcca   :  { %v3373_v34 = vadd.f32 %v3372_v11, %v3371_v19 }
 0xccc   :  { %4169 = vtanh.f32 %v3373_v34  ;;  %3381 = vst [vmem:[#allocation11 + $0x8] sm:$0xff] %v3373_v34 }
 0xcd6   :  { %v4170_v42 = vpop.eup %4169 }
 0xcd7   :  { %v3375_v17 = vmul.f32 %v4170_v42, %v4168_v29 }
 0xcd9   :  { %3379 = vst [vmem:[#allocation10 + $0x8] sm:$0xff] %v3375_v17  ;;  %v3389_v61 = vmul.f32 %v3641_v46, %v3375_v17 }
 0xcdb   :  { %3390 = vadd.xlane.f32.xlu0 %v3389_v61 }
 0xcdc   :  { %4540 = shalt.err (!%p4537_p0)
}
 0xcdd   :  { %s4541_s1 = scalar_lea.hbm %s7442_s11, 256 }
 0xcde   :  { %p4542_p1 = scmp.ne.s32.totalorder %s7442_s11, %s4541_s1  ;;  %p4545_p2 = scmp.lt.u32.totalorder %s4541_s1, %s7442_s11 }
 0xce0   :  { %p4547_p3 = pnand %p4545_p2, %p4542_p1 }
 0xce2   :  { %4550 = shalt.err (!%p4547_p3)
}
 0xce3   :  { %s4589_s23 = smov 128   ;;  %s4590_s25 = smov 8  }
 0xce4   :  { %3421 = dma.vmem_to_hbm [thread:$0]  %s3416_s15, 256, %s7442_s11, [#allocation6], %s4589_s23, %s4589_s23, %s4590_s25  }
 0xce5   :  { %s4551_s28 = scalar_lea.vmem %s7397_s19, 256  ;;  %p4556_p5 = scmp.lt.s32.totalorder %s7397_s19, %s7397_s19 }
 0xce6   :  { %p4552_p4 = scmp.ne.s32.totalorder %s7397_s19, %s4551_s28  ;;  %p4557_p6 = scmp.lt.s32.totalorder %s4551_s28, %s4551_s28 }
 0xce8   :  { %p4558_p7 = por %p4557_p6, %p4556_p5 }
 0xcea   :  { %p4559_p8 = pnand %p4558_p7, %p4552_p4 }
 0xcec   :  { %4562 = shalt.err (!%p4559_p8)
}
 0xced   :  { %s4563_s2 = scalar_lea.hbm %s7443_s12, 256 }
 0xcee   :  { %p4564_p9 = scmp.ne.s32.totalorder %s7443_s12, %s4563_s2  ;;  %p4567_p10 = scmp.lt.u32.totalorder %s4563_s2, %s7443_s12 }
 0xcf0   :  { %p4569_p11 = pnand %p4567_p10, %p4564_p9 }
 0xcf2   :  { %4572 = shalt.err (!%p4569_p11)
}
 0xcf3   :  { %3433 = dma.vmem_to_hbm [thread:$0]  %s7397_s19, 256, %s7443_s12, [#allocation12], %s4589_s23, %s4589_s23, %s4590_s25   ;;  %v3642_v24 = vld [vmem:[#allocation3] ss:$0 sm:$0xff]  ;;  %vm3406_vm0 = vcmask 7168  }
 0xd68   :  { %v3391_v37 = vpop.xlane.xlu0 %3390 }
 0xd69   :  { %v3399_v55 = vadd.f32 %v3642_v24, %v3391_v37 }
 0xd6b   :  { %v3643_v48 = vmul.f32 -1.442695, %v3399_v55 }
 0xd6d   :  { %4171 = vpow2.f32 %v3643_v48 }
 0xd77   :  { %v4172_v13 = vpop.eup %4171 }
 0xd78   :  { %v3403_v2 = vadd.f32 1.0, %v4172_v13 }
 0xd7a   :  { %4173 = vrcp.f32 %v3403_v2 }
 0xd84   :  { %v4174_v16 = vpop.eup %4173 }
 0xd85   :  { %3407 = vst.msk [vmem:[%s7441_s10] sm:$0xff] %vm3406_vm0, %v4174_v16 }
 0xd86   :  { %4577 = dma.done.wait [#allocation6], 256  }
 0xd87   :  { %4578 = vsyncadd [#allocation6], 4294967040 }
 0xd88   :  { %4579 = dma.done.wait [#allocation12], 256  }
 0xd89   :  { %4580 = vsyncadd [#allocation12], 4294967040 }
 0xd8a   :  { %3442 = vsyncpa [#allocation5], 1 }
 0xd8b   :  { %3443 = vsyncpa [#allocation8], 1 }
 0xd8c   :  { %3444 = vsyncpa [#allocation6], 1 }
 0xd8d   :  { %3445 = vsyncpa [#allocation12], 1 }

</bundles_post_ra>
